<compile_context>
chip_gen: v7x
topology: tpu7x:2x2x1
jax: 0.10.0
libtpu: 0.0.40
codegen_flags: <defaults>
</compile_context>

<pallas_src>
import math
import functools

import jax
import jax.numpy as jnp
from jax.experimental import pallas as pl
from jax.experimental.pallas import tpu as pltpu


# Kernel gate column order is [i, f, o, g]; PyTorch row order is [i, f, g, o].
_GATE_ORDER = (0, 1, 3, 2)   # kernel gate position -> PyTorch gate index


# ----------------------------------------------------------------------------
# Fused kernel: all LSTM layers + FC tail in one invocation.
#
# Layouts (everything 2D, lane-dense):
#   x            : (T*B, D)        rows are time-major (t*B + b)
#   activations  : (T*B, 4H)       lanes [h_f_start | h_f_end | h_b_start | h_b_end]
#   xp (value)   : (T*B, 16H)      lanes [fwd gates 8H | bwd gates 8H],
#                                  each 8H = [i|f|o|g], each 2H = [start|end]
#   W_hh per dir : (2H, 8H), bias  : (1, 16H), FC : (4H, 2)
# ----------------------------------------------------------------------------
def _decoder_kernel(x_ref, *rest, H, T, B, num_layers, apply_sigmoid):
    n_w = 4 * num_layers
    layer_refs = rest[:n_w]
    fcw_ref = rest[n_w]
    fcb_ref = rest[n_w + 1]
    out_ref = rest[n_w + 2]
    act = (rest[n_w + 3], rest[n_w + 4])      # ping-pong VMEM slabs

    HH = 2 * H          # per-direction hidden width (both heads fused)
    G8 = 8 * H          # per-direction gate width

    def cell(g, c):
        # g columns: [i(2H) | f(2H) | o(2H) | g(2H)]
        sig = jax.nn.sigmoid(g[:, 0:6 * H])           # one contiguous sigmoid
        gg = jnp.tanh(g[:, 6 * H:8 * H])
        i = sig[:, 0:HH]
        f = sig[:, HH:2 * HH]
        o = sig[:, 2 * HH:3 * HH]
        c_new = f * c + i * gg
        h_new = o * jnp.tanh(c_new)
        return h_new, c_new

    src = x_ref
    for layer in range(num_layers):
        wih_ref, whh_f_ref, whh_b_ref, b_ref = layer_refs[4 * layer:4 * layer + 4]
        dst_ref = act[layer % 2]
        cdt = wih_ref.dtype                       # bf16 on v6e/v7x if requested

        # Hoisted input projection for ALL steps, both directions, bias folded.
        xp = (jnp.dot(src[...].astype(cdt), wih_ref[...],
                      preferred_element_type=jnp.float32)
              + b_ref[...])                       # (T*B, 16H), f32

        # Loop-invariant recurrent weights read once.
        whh_f = whh_f_ref[...]
        whh_b = whh_b_ref[...]

        h_f = jnp.zeros((B, HH), jnp.float32)
        c_f = jnp.zeros((B, HH), jnp.float32)
        h_b = jnp.zeros((B, HH), jnp.float32)
        c_b = jnp.zeros((B, HH), jnp.float32)

        # Fully static unroll: T is small; all slice indices are compile-time.
        for t in range(T):
            rt = T - 1 - t
            gf = (jnp.dot(h_f.astype(cdt), whh_f,
                          preferred_element_type=jnp.float32)
                  + xp[t * B:(t + 1) * B, 0:G8])
            gb = (jnp.dot(h_b.astype(cdt), whh_b,
                          preferred_element_type=jnp.float32)
                  + xp[rt * B:(rt + 1) * B, G8:2 * G8])
            h_f, c_f = cell(gf, c_f)
            h_b, c_b = cell(gb, c_b)
            dst_ref[t * B:(t + 1) * B, 0:HH] = h_f        # fwd at real time t
            dst_ref[rt * B:(rt + 1) * B, HH:2 * HH] = h_b  # bwd at real time rt
        src = dst_ref

    # Batched FC tail for both heads over the resident slab.
    y = (jnp.dot(src[...].astype(fcw_ref.dtype), fcw_ref[...],
                 preferred_element_type=jnp.float32)
         + fcb_ref[...])                          # (T*B, 2): col 0=start, 1=end
    if apply_sigmoid:
        y = jax.nn.sigmoid(y)
    out_ref[...] = y


# ----------------------------------------------------------------------------
# Single pallas_call wrapper
# ----------------------------------------------------------------------------
def decoder_rnn_forward(params, x_rnn, *, sigmoid=True):
    """x_rnn: (B, T, D) float32 -> (start, end), each (B, T, 1)."""
    B, T, D = x_rnn.shape
    layers = params["layers"]
    num_layers = len(layers)
    H = layers[0]["whh_f"].shape[0] // 2          # static (from shape)

    # Time-major, flattened rows so the kernel only sees lane-dense 2D slabs.
    x2d = jnp.transpose(x_rnn, (1, 0, 2)).reshape(T * B, D).astype(jnp.float32)

    inputs = [x2d]
    in_specs = [pl.BlockSpec((T * B, D), lambda: (0, 0))]
    for lw in layers:
        for name in ("wih", "whh_f", "whh_b", "b"):
            a = lw[name]
            inputs.append(a)
            in_specs.append(pl.BlockSpec(a.shape, lambda: (0, 0)))
    inputs.append(params["fc_w"])
    in_specs.append(pl.BlockSpec(params["fc_w"].shape, lambda: (0, 0)))
    inputs.append(params["fc_b"])
    in_specs.append(pl.BlockSpec(params["fc_b"].shape, lambda: (0, 0)))

    kernel = functools.partial(_decoder_kernel, H=H, T=T, B=B,
                               num_layers=num_layers, apply_sigmoid=sigmoid)

    y = pl.pallas_call(
        kernel,
        out_shape=jax.ShapeDtypeStruct((T * B, 2), jnp.float32),
        in_specs=in_specs,
        out_specs=pl.BlockSpec((T * B, 2), lambda: (0, 0)),
        scratch_shapes=[pltpu.VMEM((T * B, 4 * H), jnp.float32),
                        pltpu.VMEM((T * B, 4 * H), jnp.float32)],
        compiler_params=pltpu.CompilerParams(vmem_limit_bytes=64 << 20),
    )(*inputs)

    y = y.reshape(T, B, 2)
    start = jnp.transpose(y[:, :, 0:1], (1, 0, 2))     # (B, T, 1)
    end = jnp.transpose(y[:, :, 1:2], (1, 0, 2))
    return start, end


# ----------------------------------------------------------------------------
# Weight stacking (done once, outside the kernel)
# Gate column layout per direction (width 8H): [i|f|o|g], each 2H = [start|end]
# Activation row/lane layout (width 4H): [fwd_start|fwd_end|bwd_start|bwd_end]
# ----------------------------------------------------------------------------
def _stack_wih_layer0(wih_s, wih_e, H):
    # both heads consume the full input x -> (D, 8H)
    cols = []
    for g in _GATE_ORDER:
        cols.append(wih_s[g * H:(g + 1) * H, :].T)
        cols.append(wih_e[g * H:(g + 1) * H, :].T)
    return jnp.concatenate(cols, axis=1)


def _stack_wih_inner(wih_s, wih_e, H):
    # input is the (4H)-wide slab; raw w_ih is (4H, 2H): cols 0:H act on the
    # head's fwd hidden, H:2H on its bwd hidden -> (4H, 8H)
    z = jnp.zeros((H, H), jnp.float32)
    cols = []
    for g in _GATE_ORDER:
        ws = wih_s[g * H:(g + 1) * H, :]       # (H, 2H)
        we = wih_e[g * H:(g + 1) * H, :]
        col_s = jnp.concatenate([ws[:, :H].T, z, ws[:, H:].T, z], axis=0)
        col_e = jnp.concatenate([z, we[:, :H].T, z, we[:, H:].T], axis=0)
        cols.append(col_s)
        cols.append(col_e)
    return jnp.concatenate(cols, axis=1)


def _stack_whh(whh_s, whh_e, H):
    # recurrence on h = [start H | end H] -> (2H, 8H), block-diag across heads
    z = jnp.zeros((H, H), jnp.float32)
    cols = []
    for g in _GATE_ORDER:
        cols.append(jnp.concatenate([whh_s[g * H:(g + 1) * H].T, z], axis=0))
        cols.append(jnp.concatenate([z, whh_e[g * H:(g + 1) * H].T], axis=0))
    return jnp.concatenate(cols, axis=1)


def _stack_bias(b_s, b_e, H):
    segs = []
    for g in _GATE_ORDER:
        segs.append(b_s[g * H:(g + 1) * H])
        segs.append(b_e[g * H:(g + 1) * H])
    return jnp.concatenate(segs)                # (8H,)


def _stack_fc(fcw_s, fcw_e, fcb_s, fcb_e, H):
    # combined FC for both heads over the (4H)-wide slab -> (4H, 2)
    z = jnp.zeros((H,), jnp.float32)
    col_s = jnp.concatenate([fcw_s[0, :H], z, fcw_s[0, H:], z])
    col_e = jnp.concatenate([z, fcw_e[0, :H], z, fcw_e[0, H:]])
    w = jnp.stack([col_s, col_e], axis=1)                       # (4H, 2)
    b = jnp.concatenate([fcb_s, fcb_e])[None, :]                # (1, 2)
    return w, b


def build_fused_params(raw, h_rnn, param_dtype=jnp.float32):
    # param_dtype=jnp.bfloat16 is recommended on v6e/v7x (native MXU rate,
    # half the weight VMEM); keep f32 on v5e and re-validate tolerance if used.
    H = h_rnn
    layers = []
    for l in range(len(raw["start"])):
        s, e = raw["start"][l], raw["end"][l]
        stack = _stack_wih_layer0 if l == 0 else _stack_wih_inner
        wih_f = stack(s["w_ih_f"], e["w_ih_f"], H)
        wih_b = stack(s["w_ih_b"], e["w_ih_b"], H)
        b_f = _stack_bias(s["b_ih_f"] + s["b_hh_f"],
                          e["b_ih_f"] + e["b_hh_f"], H)
        b_b = _stack_bias(s["b_ih_b"] + s["b_hh_b"],
                          e["b_ih_b"] + e["b_hh_b"], H)
        layers.append({
            "wih": jnp.concatenate([wih_f, wih_b], axis=1).astype(param_dtype),
            "whh_f": _stack_whh(s["w_hh_f"], e["w_hh_f"], H).astype(param_dtype),
            "whh_b": _stack_whh(s["w_hh_b"], e["w_hh_b"], H).astype(param_dtype),
            "b": jnp.concatenate([b_f, b_b])[None, :].astype(jnp.float32),
        })
    fc_w, fc_b = _stack_fc(raw["fc_start_w"], raw["fc_end_w"],
                           raw["fc_start_b"], raw["fc_end_b"], H)
    return {"layers": layers,
            "fc_w": fc_w.astype(param_dtype),
            "fc_b": fc_b.astype(jnp.float32)}


# ----------------------------------------------------------------------------
# Deterministic PyTorch-style parameter init (raw nn.LSTM / nn.Linear layout)
# ----------------------------------------------------------------------------
def init_decoder_params(key, cnn_embed_dim, h_rnn_layers, h_rnn):
    bound = 1.0 / math.sqrt(h_rnn)
    fc_bound = 1.0 / math.sqrt(2 * h_rnn)
    counter = [0]

    def u(shape, b):
        counter[0] += 1
        k = jax.random.fold_in(key, counter[0])
        return jax.random.uniform(k, shape, jnp.float32, -b, b)

    def make_head():
        layers = []
        for layer in range(h_rnn_layers):
            din = cnn_embed_dim if layer == 0 else 2 * h_rnn
            layers.append({
                "w_ih_f": u((4 * h_rnn, din), bound),
                "w_hh_f": u((4 * h_rnn, h_rnn), bound),
                "b_ih_f": u((4 * h_rnn,), bound),
                "b_hh_f": u((4 * h_rnn,), bound),
                "w_ih_b": u((4 * h_rnn, din), bound),
                "w_hh_b": u((4 * h_rnn, h_rnn), bound),
                "b_ih_b": u((4 * h_rnn,), bound),
                "b_hh_b": u((4 * h_rnn,), bound),
            })
        return layers

    return {
        "start": make_head(),
        "end": make_head(),
        "fc_start_w": u((1, 2 * h_rnn), fc_bound),
        "fc_start_b": u((1,), fc_bound),
        "fc_end_w": u((1, 2 * h_rnn), fc_bound),
        "fc_end_b": u((1,), fc_bound),
    }


# ----------------------------------------------------------------------------
# Pure-JAX reference (mirrors PyTorch nn.LSTM semantics) for correctness check
# ----------------------------------------------------------------------------
def reference_forward(raw, x_rnn, h_rnn, *, sigmoid=True):
    H = h_rnn
    hp = jax.lax.Precision.HIGHEST

    def lstm_dir(x_tbd, w_ih, w_hh, b_ih, b_hh, reverse):
        xs = x_tbd[::-1] if reverse else x_tbd
        B = x_tbd.shape[1]

        def step(carry, x_t):
            h, c = carry
            gates = (jnp.dot(x_t, w_ih.T, precision=hp)
                     + jnp.dot(h, w_hh.T, precision=hp) + b_ih + b_hh)
            i = jax.nn.sigmoid(gates[:, 0 * H:1 * H])
            f = jax.nn.sigmoid(gates[:, 1 * H:2 * H])
            g = jnp.tanh(gates[:, 2 * H:3 * H])
            o = jax.nn.sigmoid(gates[:, 3 * H:4 * H])
            c = f * c + i * g
            h = o * jnp.tanh(c)
            return (h, c), h

        h0 = jnp.zeros((B, H), jnp.float32)
        _, hs = jax.lax.scan(step, (h0, h0), xs)
        return hs[::-1] if reverse else hs

    def head(layers, fc_w, fc_b):
        inp = jnp.transpose(x_rnn, (1, 0, 2)).astype(jnp.float32)
        for p in layers:
            hf = lstm_dir(inp, p["w_ih_f"], p["w_hh_f"], p["b_ih_f"], p["b_hh_f"], False)
            hb = lstm_dir(inp, p["w_ih_b"], p["w_hh_b"], p["b_ih_b"], p["b_hh_b"], True)
            inp = jnp.concatenate([hf, hb], axis=-1)
        y = jnp.dot(inp, fc_w.T, precision=hp) + fc_b
        if sigmoid:
            y = jax.nn.sigmoid(y)
        return jnp.transpose(y, (1, 0, 2))

    return (head(raw["start"], raw["fc_start_w"], raw["fc_start_b"]),
            head(raw["end"], raw["fc_end_w"], raw["fc_end_b"]))


if __name__ == "__main__":
    # Small shapes consistent with the module: batch=2, seq=8, embed=64, hidden=32
    B, T = 2, 8
    CNN_embed_dim, h_RNN_layers, h_RNN = 64, 2, 32

    key = jax.random.PRNGKey(0)
    raw = init_decoder_params(key, CNN_embed_dim, h_RNN_layers, h_RNN)
    params = build_fused_params(raw, h_RNN)          # f32; use bf16 on v6e/v7x
    x = jax.random.normal(jax.random.fold_in(key, 9999),
                          (B, T, CNN_embed_dim), jnp.float32)

    fwd = jax.jit(functools.partial(decoder_rnn_forward, sigmoid=True))
    start_x, end_x = fwd(params, x)
    jax.block_until_ready((start_x, end_x))

    assert start_x.shape == (B, T, 1) and end_x.shape == (B, T, 1)
    assert bool(jnp.all(jnp.isfinite(start_x))) and bool(jnp.all(jnp.isfinite(end_x)))
    assert bool(jnp.all((start_x >= 0) & (start_x <= 1)))
    assert bool(jnp.all((end_x >= 0) & (end_x <= 1)))

    # Numerical check against a pure-JAX reference of the PyTorch module.
    ref_s, ref_e = reference_forward(raw, x, h_RNN, sigmoid=True)
    assert bool(jnp.allclose(start_x, ref_s, atol=2e-3, rtol=2e-3))
    assert bool(jnp.allclose(end_x, ref_e, atol=2e-3, rtol=2e-3))

    print("KERNEL_OK")
</pallas_src>

<mosaic_0001>
module attributes {stable_mosaic.version = 11 : i64} {
  func.func @_decoder_kernel(%arg0: memref<16x64xf32, #tpu.memory_space<vmem>>, %arg1: memref<64x512xf32, #tpu.memory_space<vmem>>, %arg2: memref<64x256xf32, #tpu.memory_space<vmem>>, %arg3: memref<64x256xf32, #tpu.memory_space<vmem>>, %arg4: memref<1x512xf32, #tpu.memory_space<vmem>>, %arg5: memref<128x512xf32, #tpu.memory_space<vmem>>, %arg6: memref<64x256xf32, #tpu.memory_space<vmem>>, %arg7: memref<64x256xf32, #tpu.memory_space<vmem>>, %arg8: memref<1x512xf32, #tpu.memory_space<vmem>>, %arg9: memref<128x2xf32, #tpu.memory_space<vmem>>, %arg10: memref<1x2xf32, #tpu.memory_space<vmem>>, %arg11: memref<16x2xf32, #tpu.memory_space<vmem>>, %arg12: memref<16x128xf32, #tpu.memory_space<vmem>>, %arg13: memref<16x128xf32, #tpu.memory_space<vmem>>) attributes {dimension_semantics = [], scalar_prefetch = 0 : i64, scratch_operands = 2 : i64, tpu.core_type = #tpu.core_type<tc>} {
    %c0 = arith.constant 0 : index
    %c0_0 = arith.constant 0 : index
    %0 = vector.load %arg0[%c0, %c0_0] : memref<16x64xf32, #tpu.memory_space<vmem>>, vector<16x64xf32>
    %c0_1 = arith.constant 0 : index
    %c0_2 = arith.constant 0 : index
    %1 = vector.load %arg1[%c0_1, %c0_2] : memref<64x512xf32, #tpu.memory_space<vmem>>, vector<64x512xf32>
    %cst = arith.constant dense<0.000000e+00> : vector<16x512xf32>
    %2 = tpu.matmul %0, %1, %cst {dimension_numbers = #tpu.dot_dimension_numbers<[1], [0], [0], [1], [0, 0, 1, 1], [], []>} : vector<16x64xf32>, vector<64x512xf32>, vector<16x512xf32> -> vector<16x512xf32>
    %c0_3 = arith.constant 0 : index
    %c0_4 = arith.constant 0 : index
    %3 = vector.load %arg4[%c0_3, %c0_4] : memref<1x512xf32, #tpu.memory_space<vmem>>, vector<1x512xf32>
    %4 = vector.broadcast %3 : vector<1x512xf32> to vector<16x512xf32>
    %5 = arith.addf %2, %4 : vector<16x512xf32>
    %c0_5 = arith.constant 0 : index
    %c0_6 = arith.constant 0 : index
    %6 = vector.load %arg2[%c0_5, %c0_6] : memref<64x256xf32, #tpu.memory_space<vmem>>, vector<64x256xf32>
    %c0_7 = arith.constant 0 : index
    %c0_8 = arith.constant 0 : index
    %7 = vector.load %arg3[%c0_7, %c0_8] : memref<64x256xf32, #tpu.memory_space<vmem>>, vector<64x256xf32>
    %cst_9 = arith.constant 0.000000e+00 : f32
    %8 = vector.broadcast %cst_9 : f32 to vector<2x64xf32>
    %cst_10 = arith.constant 0.000000e+00 : f32
    %9 = vector.broadcast %cst_10 : f32 to vector<2x64xf32>
    %cst_11 = arith.constant 0.000000e+00 : f32
    %10 = vector.broadcast %cst_11 : f32 to vector<2x64xf32>
    %cst_12 = arith.constant 0.000000e+00 : f32
    %11 = vector.broadcast %cst_12 : f32 to vector<2x64xf32>
    %cst_13 = arith.constant dense<0.000000e+00> : vector<2x256xf32>
    %12 = tpu.matmul %8, %6, %cst_13 {dimension_numbers = #tpu.dot_dimension_numbers<[1], [0], [0], [1], [0, 0, 1, 1], [], []>} : vector<2x64xf32>, vector<64x256xf32>, vector<2x256xf32> -> vector<2x256xf32>
    %13 = vector.extract_strided_slice %5 {offsets = [0, 0], sizes = [2, 256], strides = [1, 1]} : vector<16x512xf32> to vector<2x256xf32>
    %14 = arith.addf %12, %13 : vector<2x256xf32>
    %cst_14 = arith.constant dense<0.000000e+00> : vector<2x256xf32>
    %15 = tpu.matmul %10, %7, %cst_14 {dimension_numbers = #tpu.dot_dimension_numbers<[1], [0], [0], [1], [0, 0, 1, 1], [], []>} : vector<2x64xf32>, vector<64x256xf32>, vector<2x256xf32> -> vector<2x256xf32>
    %16 = vector.extract_strided_slice %5 {offsets = [14, 256], sizes = [2, 256], strides = [1, 1]} : vector<16x512xf32> to vector<2x256xf32>
    %17 = arith.addf %15, %16 : vector<2x256xf32>
    %18 = vector.extract_strided_slice %14 {offsets = [0, 0], sizes = [2, 192], strides = [1, 1]} : vector<2x256xf32> to vector<2x192xf32>
    %19 = arith.negf %18 : vector<2x192xf32>
    %20 = math.exp %19 : vector<2x192xf32>
    %cst_15 = arith.constant 1.000000e+00 : f32
    %21 = vector.broadcast %cst_15 : f32 to vector<2x192xf32>
    %22 = arith.addf %21, %20 : vector<2x192xf32>
    %23 = arith.divf %21, %22 : vector<2x192xf32>
    %24 = vector.extract_strided_slice %14 {offsets = [0, 192], sizes = [2, 64], strides = [1, 1]} : vector<2x256xf32> to vector<2x64xf32>
    %25 = math.tanh %24 : vector<2x64xf32>
    %26 = vector.extract_strided_slice %23 {offsets = [0, 0], sizes = [2, 64], strides = [1, 1]} : vector<2x192xf32> to vector<2x64xf32>
    %27 = vector.extract_strided_slice %23 {offsets = [0, 64], sizes = [2, 64], strides = [1, 1]} : vector<2x192xf32> to vector<2x64xf32>
    %28 = vector.extract_strided_slice %23 {offsets = [0, 128], sizes = [2, 64], strides = [1, 1]} : vector<2x192xf32> to vector<2x64xf32>
    %29 = arith.mulf %27, %9 : vector<2x64xf32>
    %30 = arith.mulf %26, %25 : vector<2x64xf32>
    %31 = arith.addf %29, %30 : vector<2x64xf32>
    %32 = math.tanh %31 : vector<2x64xf32>
    %33 = arith.mulf %28, %32 : vector<2x64xf32>
    %34 = vector.extract_strided_slice %17 {offsets = [0, 0], sizes = [2, 192], strides = [1, 1]} : vector<2x256xf32> to vector<2x192xf32>
    %35 = arith.negf %34 : vector<2x192xf32>
    %36 = math.exp %35 : vector<2x192xf32>
    %cst_16 = arith.constant 1.000000e+00 : f32
    %37 = vector.broadcast %cst_16 : f32 to vector<2x192xf32>
    %38 = arith.addf %37, %36 : vector<2x192xf32>
    %39 = arith.divf %37, %38 : vector<2x192xf32>
    %40 = vector.extract_strided_slice %17 {offsets = [0, 192], sizes = [2, 64], strides = [1, 1]} : vector<2x256xf32> to vector<2x64xf32>
    %41 = math.tanh %40 : vector<2x64xf32>
    %42 = vector.extract_strided_slice %39 {offsets = [0, 0], sizes = [2, 64], strides = [1, 1]} : vector<2x192xf32> to vector<2x64xf32>
    %43 = vector.extract_strided_slice %39 {offsets = [0, 64], sizes = [2, 64], strides = [1, 1]} : vector<2x192xf32> to vector<2x64xf32>
    %44 = vector.extract_strided_slice %39 {offsets = [0, 128], sizes = [2, 64], strides = [1, 1]} : vector<2x192xf32> to vector<2x64xf32>
    %45 = arith.mulf %43, %11 : vector<2x64xf32>
    %46 = arith.mulf %42, %41 : vector<2x64xf32>
    %47 = arith.addf %45, %46 : vector<2x64xf32>
    %48 = math.tanh %47 : vector<2x64xf32>
    %49 = arith.mulf %44, %48 : vector<2x64xf32>
    %c0_17 = arith.constant 0 : index
    %c0_18 = arith.constant 0 : index
    %50 = vector.load %arg12[%c0_17, %c0_18] : memref<16x128xf32, #tpu.memory_space<vmem>>, vector<2x64xf32>
    tpu.vector_store %arg12[%c0_17, %c0_18], %33 {strides = array<i32>} : memref<16x128xf32, #tpu.memory_space<vmem>>, vector<2x64xf32>,
    %c14 = arith.constant 14 : index
    %c64 = arith.constant 64 : index
    %51 = vector.load %arg12[%c14, %c64] : memref<16x128xf32, #tpu.memory_space<vmem>>, vector<2x64xf32>
    tpu.vector_store %arg12[%c14, %c64], %49 {strides = array<i32>} : memref<16x128xf32, #tpu.memory_space<vmem>>, vector<2x64xf32>,
    %cst_19 = arith.constant dense<0.000000e+00> : vector<2x256xf32>
    %52 = tpu.matmul %33, %6, %cst_19 {dimension_numbers = #tpu.dot_dimension_numbers<[1], [0], [0], [1], [0, 0, 1, 1], [], []>} : vector<2x64xf32>, vector<64x256xf32>, vector<2x256xf32> -> vector<2x256xf32>
    %53 = vector.extract_strided_slice %5 {offsets = [2, 0], sizes = [2, 256], strides = [1, 1]} : vector<16x512xf32> to vector<2x256xf32>
    %54 = arith.addf %52, %53 : vector<2x256xf32>
    %cst_20 = arith.constant dense<0.000000e+00> : vector<2x256xf32>
    %55 = tpu.matmul %49, %7, %cst_20 {dimension_numbers = #tpu.dot_dimension_numbers<[1], [0], [0], [1], [0, 0, 1, 1], [], []>} : vector<2x64xf32>, vector<64x256xf32>, vector<2x256xf32> -> vector<2x256xf32>
    %56 = vector.extract_strided_slice %5 {offsets = [12, 256], sizes = [2, 256], strides = [1, 1]} : vector<16x512xf32> to vector<2x256xf32>
    %57 = arith.addf %55, %56 : vector<2x256xf32>
    %58 = vector.extract_strided_slice %54 {offsets = [0, 0], sizes = [2, 192], strides = [1, 1]} : vector<2x256xf32> to vector<2x192xf32>
    %59 = arith.negf %58 : vector<2x192xf32>
    %60 = math.exp %59 : vector<2x192xf32>
    %cst_21 = arith.constant 1.000000e+00 : f32
    %61 = vector.broadcast %cst_21 : f32 to vector<2x192xf32>
    %62 = arith.addf %61, %60 : vector<2x192xf32>
    %63 = arith.divf %61, %62 : vector<2x192xf32>
    %64 = vector.extract_strided_slice %54 {offsets = [0, 192], sizes = [2, 64], strides = [1, 1]} : vector<2x256xf32> to vector<2x64xf32>
    %65 = math.tanh %64 : vector<2x64xf32>
    %66 = vector.extract_strided_slice %63 {offsets = [0, 0], sizes = [2, 64], strides = [1, 1]} : vector<2x192xf32> to vector<2x64xf32>
    %67 = vector.extract_strided_slice %63 {offsets = [0, 64], sizes = [2, 64], strides = [1, 1]} : vector<2x192xf32> to vector<2x64xf32>
    %68 = vector.extract_strided_slice %63 {offsets = [0, 128], sizes = [2, 64], strides = [1, 1]} : vector<2x192xf32> to vector<2x64xf32>
    %69 = arith.mulf %67, %31 : vector<2x64xf32>
    %70 = arith.mulf %66, %65 : vector<2x64xf32>
    %71 = arith.addf %69, %70 : vector<2x64xf32>
    %72 = math.tanh %71 : vector<2x64xf32>
    %73 = arith.mulf %68, %72 : vector<2x64xf32>
    %74 = vector.extract_strided_slice %57 {offsets = [0, 0], sizes = [2, 192], strides = [1, 1]} : vector<2x256xf32> to vector<2x192xf32>
    %75 = arith.negf %74 : vector<2x192xf32>
    %76 = math.exp %75 : vector<2x192xf32>
    %cst_22 = arith.constant 1.000000e+00 : f32
    %77 = vector.broadcast %cst_22 : f32 to vector<2x192xf32>
    %78 = arith.addf %77, %76 : vector<2x192xf32>
    %79 = arith.divf %77, %78 : vector<2x192xf32>
    %80 = vector.extract_strided_slice %57 {offsets = [0, 192], sizes = [2, 64], strides = [1, 1]} : vector<2x256xf32> to vector<2x64xf32>
    %81 = math.tanh %80 : vector<2x64xf32>
    %82 = vector.extract_strided_slice %79 {offsets = [0, 0], sizes = [2, 64], strides = [1, 1]} : vector<2x192xf32> to vector<2x64xf32>
    %83 = vector.extract_strided_slice %79 {offsets = [0, 64], sizes = [2, 64], strides = [1, 1]} : vector<2x192xf32> to vector<2x64xf32>
    %84 = vector.extract_strided_slice %79 {offsets = [0, 128], sizes = [2, 64], strides = [1, 1]} : vector<2x192xf32> to vector<2x64xf32>
    %85 = arith.mulf %83, %47 : vector<2x64xf32>
    %86 = arith.mulf %82, %81 : vector<2x64xf32>
    %87 = arith.addf %85, %86 : vector<2x64xf32>
    %88 = math.tanh %87 : vector<2x64xf32>
    %89 = arith.mulf %84, %88 : vector<2x64xf32>
    %c2 = arith.constant 2 : index
    %c0_23 = arith.constant 0 : index
    %90 = vector.load %arg12[%c2, %c0_23] : memref<16x128xf32, #tpu.memory_space<vmem>>, vector<2x64xf32>
    tpu.vector_store %arg12[%c2, %c0_23], %73 {strides = array<i32>} : memref<16x128xf32, #tpu.memory_space<vmem>>, vector<2x64xf32>,
    %c12 = arith.constant 12 : index
    %c64_24 = arith.constant 64 : index
    %91 = vector.load %arg12[%c12, %c64_24] : memref<16x128xf32, #tpu.memory_space<vmem>>, vector<2x64xf32>
    tpu.vector_store %arg12[%c12, %c64_24], %89 {strides = array<i32>} : memref<16x128xf32, #tpu.memory_space<vmem>>, vector<2x64xf32>,
    %cst_25 = arith.constant dense<0.000000e+00> : vector<2x256xf32>
    %92 = tpu.matmul %73, %6, %cst_25 {dimension_numbers = #tpu.dot_dimension_numbers<[1], [0], [0], [1], [0, 0, 1, 1], [], []>} : vector<2x64xf32>, vector<64x256xf32>, vector<2x256xf32> -> vector<2x256xf32>
    %93 = vector.extract_strided_slice %5 {offsets = [4, 0], sizes = [2, 256], strides = [1, 1]} : vector<16x512xf32> to vector<2x256xf32>
    %94 = arith.addf %92, %93 : vector<2x256xf32>
    %cst_26 = arith.constant dense<0.000000e+00> : vector<2x256xf32>
    %95 = tpu.matmul %89, %7, %cst_26 {dimension_numbers = #tpu.dot_dimension_numbers<[1], [0], [0], [1], [0, 0, 1, 1], [], []>} : vector<2x64xf32>, vector<64x256xf32>, vector<2x256xf32> -> vector<2x256xf32>
    %96 = vector.extract_strided_slice %5 {offsets = [10, 256], sizes = [2, 256], strides = [1, 1]} : vector<16x512xf32> to vector<2x256xf32>
    %97 = arith.addf %95, %96 : vector<2x256xf32>
    %98 = vector.extract_strided_slice %94 {offsets = [0, 0], sizes = [2, 192], strides = [1, 1]} : vector<2x256xf32> to vector<2x192xf32>
    %99 = arith.negf %98 : vector<2x192xf32>
    %100 = math.exp %99 : vector<2x192xf32>
    %cst_27 = arith.constant 1.000000e+00 : f32
    %101 = vector.broadcast %cst_27 : f32 to vector<2x192xf32>
    %102 = arith.addf %101, %100 : vector<2x192xf32>
    %103 = arith.divf %101, %102 : vector<2x192xf32>
    %104 = vector.extract_strided_slice %94 {offsets = [0, 192], sizes = [2, 64], strides = [1, 1]} : vector<2x256xf32> to vector<2x64xf32>
    %105 = math.tanh %104 : vector<2x64xf32>
    %106 = vector.extract_strided_slice %103 {offsets = [0, 0], sizes = [2, 64], strides = [1, 1]} : vector<2x192xf32> to vector<2x64xf32>
    %107 = vector.extract_strided_slice %103 {offsets = [0, 64], sizes = [2, 64], strides = [1, 1]} : vector<2x192xf32> to vector<2x64xf32>
    %108 = vector.extract_strided_slice %103 {offsets = [0, 128], sizes = [2, 64], strides = [1, 1]} : vector<2x192xf32> to vector<2x64xf32>
    %109 = arith.mulf %107, %71 : vector<2x64xf32>
    %110 = arith.mulf %106, %105 : vector<2x64xf32>
    %111 = arith.addf %109, %110 : vector<2x64xf32>
    %112 = math.tanh %111 : vector<2x64xf32>
    %113 = arith.mulf %108, %112 : vector<2x64xf32>
    %114 = vector.extract_strided_slice %97 {offsets = [0, 0], sizes = [2, 192], strides = [1, 1]} : vector<2x256xf32> to vector<2x192xf32>
    %115 = arith.negf %114 : vector<2x192xf32>
    %116 = math.exp %115 : vector<2x192xf32>
    %cst_28 = arith.constant 1.000000e+00 : f32
    %117 = vector.broadcast %cst_28 : f32 to vector<2x192xf32>
    %118 = arith.addf %117, %116 : vector<2x192xf32>
    %119 = arith.divf %117, %118 : vector<2x192xf32>
    %120 = vector.extract_strided_slice %97 {offsets = [0, 192], sizes = [2, 64], strides = [1, 1]} : vector<2x256xf32> to vector<2x64xf32>
    %121 = math.tanh %120 : vector<2x64xf32>
    %122 = vector.extract_strided_slice %119 {offsets = [0, 0], sizes = [2, 64], strides = [1, 1]} : vector<2x192xf32> to vector<2x64xf32>
    %123 = vector.extract_strided_slice %119 {offsets = [0, 64], sizes = [2, 64], strides = [1, 1]} : vector<2x192xf32> to vector<2x64xf32>
    %124 = vector.extract_strided_slice %119 {offsets = [0, 128], sizes = [2, 64], strides = [1, 1]} : vector<2x192xf32> to vector<2x64xf32>
    %125 = arith.mulf %123, %87 : vector<2x64xf32>
    %126 = arith.mulf %122, %121 : vector<2x64xf32>
    %127 = arith.addf %125, %126 : vector<2x64xf32>
    %128 = math.tanh %127 : vector<2x64xf32>
    %129 = arith.mulf %124, %128 : vector<2x64xf32>
    %c4 = arith.constant 4 : index
    %c0_29 = arith.constant 0 : index
    %130 = vector.load %arg12[%c4, %c0_29] : memref<16x128xf32, #tpu.memory_space<vmem>>, vector<2x64xf32>
    tpu.vector_store %arg12[%c4, %c0_29], %113 {strides = array<i32>} : memref<16x128xf32, #tpu.memory_space<vmem>>, vector<2x64xf32>,
    %c10 = arith.constant 10 : index
    %c64_30 = arith.constant 64 : index
    %131 = vector.load %arg12[%c10, %c64_30] : memref<16x128xf32, #tpu.memory_space<vmem>>, vector<2x64xf32>
    tpu.vector_store %arg12[%c10, %c64_30], %129 {strides = array<i32>} : memref<16x128xf32, #tpu.memory_space<vmem>>, vector<2x64xf32>,
    %cst_31 = arith.constant dense<0.000000e+00> : vector<2x256xf32>
    %132 = tpu.matmul %113, %6, %cst_31 {dimension_numbers = #tpu.dot_dimension_numbers<[1], [0], [0], [1], [0, 0, 1, 1], [], []>} : vector<2x64xf32>, vector<64x256xf32>, vector<2x256xf32> -> vector<2x256xf32>
    %133 = vector.extract_strided_slice %5 {offsets = [6, 0], sizes = [2, 256], strides = [1, 1]} : vector<16x512xf32> to vector<2x256xf32>
    %134 = arith.addf %132, %133 : vector<2x256xf32>
    %cst_32 = arith.constant dense<0.000000e+00> : vector<2x256xf32>
    %135 = tpu.matmul %129, %7, %cst_32 {dimension_numbers = #tpu.dot_dimension_numbers<[1], [0], [0], [1], [0, 0, 1, 1], [], []>} : vector<2x64xf32>, vector<64x256xf32>, vector<2x256xf32> -> vector<2x256xf32>
    %136 = vector.extract_strided_slice %5 {offsets = [8, 256], sizes = [2, 256], strides = [1, 1]} : vector<16x512xf32> to vector<2x256xf32>
    %137 = arith.addf %135, %136 : vector<2x256xf32>
    %138 = vector.extract_strided_slice %134 {offsets = [0, 0], sizes = [2, 192], strides = [1, 1]} : vector<2x256xf32> to vector<2x192xf32>
    %139 = arith.negf %138 : vector<2x192xf32>
    %140 = math.exp %139 : vector<2x192xf32>
    %cst_33 = arith.constant 1.000000e+00 : f32
    %141 = vector.broadcast %cst_33 : f32 to vector<2x192xf32>
    %142 = arith.addf %141, %140 : vector<2x192xf32>
    %143 = arith.divf %141, %142 : vector<2x192xf32>
    %144 = vector.extract_strided_slice %134 {offsets = [0, 192], sizes = [2, 64], strides = [1, 1]} : vector<2x256xf32> to vector<2x64xf32>
    %145 = math.tanh %144 : vector<2x64xf32>
    %146 = vector.extract_strided_slice %143 {offsets = [0, 0], sizes = [2, 64], strides = [1, 1]} : vector<2x192xf32> to vector<2x64xf32>
    %147 = vector.extract_strided_slice %143 {offsets = [0, 64], sizes = [2, 64], strides = [1, 1]} : vector<2x192xf32> to vector<2x64xf32>
    %148 = vector.extract_strided_slice %143 {offsets = [0, 128], sizes = [2, 64], strides = [1, 1]} : vector<2x192xf32> to vector<2x64xf32>
    %149 = arith.mulf %147, %111 : vector<2x64xf32>
    %150 = arith.mulf %146, %145 : vector<2x64xf32>
    %151 = arith.addf %149, %150 : vector<2x64xf32>
    %152 = math.tanh %151 : vector<2x64xf32>
    %153 = arith.mulf %148, %152 : vector<2x64xf32>
    %154 = vector.extract_strided_slice %137 {offsets = [0, 0], sizes = [2, 192], strides = [1, 1]} : vector<2x256xf32> to vector<2x192xf32>
    %155 = arith.negf %154 : vector<2x192xf32>
    %156 = math.exp %155 : vector<2x192xf32>
    %cst_34 = arith.constant 1.000000e+00 : f32
    %157 = vector.broadcast %cst_34 : f32 to vector<2x192xf32>
    %158 = arith.addf %157, %156 : vector<2x192xf32>
    %159 = arith.divf %157, %158 : vector<2x192xf32>
    %160 = vector.extract_strided_slice %137 {offsets = [0, 192], sizes = [2, 64], strides = [1, 1]} : vector<2x256xf32> to vector<2x64xf32>
    %161 = math.tanh %160 : vector<2x64xf32>
    %162 = vector.extract_strided_slice %159 {offsets = [0, 0], sizes = [2, 64], strides = [1, 1]} : vector<2x192xf32> to vector<2x64xf32>
    %163 = vector.extract_strided_slice %159 {offsets = [0, 64], sizes = [2, 64], strides = [1, 1]} : vector<2x192xf32> to vector<2x64xf32>
    %164 = vector.extract_strided_slice %159 {offsets = [0, 128], sizes = [2, 64], strides = [1, 1]} : vector<2x192xf32> to vector<2x64xf32>
    %165 = arith.mulf %163, %127 : vector<2x64xf32>
    %166 = arith.mulf %162, %161 : vector<2x64xf32>
    %167 = arith.addf %165, %166 : vector<2x64xf32>
    %168 = math.tanh %167 : vector<2x64xf32>
    %169 = arith.mulf %164, %168 : vector<2x64xf32>
    %c6 = arith.constant 6 : index
    %c0_35 = arith.constant 0 : index
    %170 = vector.load %arg12[%c6, %c0_35] : memref<16x128xf32, #tpu.memory_space<vmem>>, vector<2x64xf32>
    tpu.vector_store %arg12[%c6, %c0_35], %153 {strides = array<i32>} : memref<16x128xf32, #tpu.memory_space<vmem>>, vector<2x64xf32>,
    %c8 = arith.constant 8 : index
    %c64_36 = arith.constant 64 : index
    %171 = vector.load %arg12[%c8, %c64_36] : memref<16x128xf32, #tpu.memory_space<vmem>>, vector<2x64xf32>
    tpu.vector_store %arg12[%c8, %c64_36], %169 {strides = array<i32>} : memref<16x128xf32, #tpu.memory_space<vmem>>, vector<2x64xf32>,
    %cst_37 = arith.constant dense<0.000000e+00> : vector<2x256xf32>
    %172 = tpu.matmul %153, %6, %cst_37 {dimension_numbers = #tpu.dot_dimension_numbers<[1], [0], [0], [1], [0, 0, 1, 1], [], []>} : vector<2x64xf32>, vector<64x256xf32>, vector<2x256xf32> -> vector<2x256xf32>
    %173 = vector.extract_strided_slice %5 {offsets = [8, 0], sizes = [2, 256], strides = [1, 1]} : vector<16x512xf32> to vector<2x256xf32>
    %174 = arith.addf %172, %173 : vector<2x256xf32>
    %cst_38 = arith.constant dense<0.000000e+00> : vector<2x256xf32>
    %175 = tpu.matmul %169, %7, %cst_38 {dimension_numbers = #tpu.dot_dimension_numbers<[1], [0], [0], [1], [0, 0, 1, 1], [], []>} : vector<2x64xf32>, vector<64x256xf32>, vector<2x256xf32> -> vector<2x256xf32>
    %176 = vector.extract_strided_slice %5 {offsets = [6, 256], sizes = [2, 256], strides = [1, 1]} : vector<16x512xf32> to vector<2x256xf32>
    %177 = arith.addf %175, %176 : vector<2x256xf32>
    %178 = vector.extract_strided_slice %174 {offsets = [0, 0], sizes = [2, 192], strides = [1, 1]} : vector<2x256xf32> to vector<2x192xf32>
    %179 = arith.negf %178 : vector<2x192xf32>
    %180 = math.exp %179 : vector<2x192xf32>
    %cst_39 = arith.constant 1.000000e+00 : f32
    %181 = vector.broadcast %cst_39 : f32 to vector<2x192xf32>
    %182 = arith.addf %181, %180 : vector<2x192xf32>
    %183 = arith.divf %181, %182 : vector<2x192xf32>
    %184 = vector.extract_strided_slice %174 {offsets = [0, 192], sizes = [2, 64], strides = [1, 1]} : vector<2x256xf32> to vector<2x64xf32>
    %185 = math.tanh %184 : vector<2x64xf32>
    %186 = vector.extract_strided_slice %183 {offsets = [0, 0], sizes = [2, 64], strides = [1, 1]} : vector<2x192xf32> to vector<2x64xf32>
    %187 = vector.extract_strided_slice %183 {offsets = [0, 64], sizes = [2, 64], strides = [1, 1]} : vector<2x192xf32> to vector<2x64xf32>
    %188 = vector.extract_strided_slice %183 {offsets = [0, 128], sizes = [2, 64], strides = [1, 1]} : vector<2x192xf32> to vector<2x64xf32>
    %189 = arith.mulf %187, %151 : vector<2x64xf32>
    %190 = arith.mulf %186, %185 : vector<2x64xf32>
    %191 = arith.addf %189, %190 : vector<2x64xf32>
    %192 = math.tanh %191 : vector<2x64xf32>
    %193 = arith.mulf %188, %192 : vector<2x64xf32>
    %194 = vector.extract_strided_slice %177 {offsets = [0, 0], sizes = [2, 192], strides = [1, 1]} : vector<2x256xf32> to vector<2x192xf32>
    %195 = arith.negf %194 : vector<2x192xf32>
    %196 = math.exp %195 : vector<2x192xf32>
    %cst_40 = arith.constant 1.000000e+00 : f32
    %197 = vector.broadcast %cst_40 : f32 to vector<2x192xf32>
    %198 = arith.addf %197, %196 : vector<2x192xf32>
    %199 = arith.divf %197, %198 : vector<2x192xf32>
    %200 = vector.extract_strided_slice %177 {offsets = [0, 192], sizes = [2, 64], strides = [1, 1]} : vector<2x256xf32> to vector<2x64xf32>
    %201 = math.tanh %200 : vector<2x64xf32>
    %202 = vector.extract_strided_slice %199 {offsets = [0, 0], sizes = [2, 64], strides = [1, 1]} : vector<2x192xf32> to vector<2x64xf32>
    %203 = vector.extract_strided_slice %199 {offsets = [0, 64], sizes = [2, 64], strides = [1, 1]} : vector<2x192xf32> to vector<2x64xf32>
    %204 = vector.extract_strided_slice %199 {offsets = [0, 128], sizes = [2, 64], strides = [1, 1]} : vector<2x192xf32> to vector<2x64xf32>
    %205 = arith.mulf %203, %167 : vector<2x64xf32>
    %206 = arith.mulf %202, %201 : vector<2x64xf32>
    %207 = arith.addf %205, %206 : vector<2x64xf32>
    %208 = math.tanh %207 : vector<2x64xf32>
    %209 = arith.mulf %204, %208 : vector<2x64xf32>
    %c8_41 = arith.constant 8 : index
    %c0_42 = arith.constant 0 : index
    %210 = vector.load %arg12[%c8_41, %c0_42] : memref<16x128xf32, #tpu.memory_space<vmem>>, vector<2x64xf32>
    tpu.vector_store %arg12[%c8_41, %c0_42], %193 {strides = array<i32>} : memref<16x128xf32, #tpu.memory_space<vmem>>, vector<2x64xf32>,
    %c6_43 = arith.constant 6 : index
    %c64_44 = arith.constant 64 : index
    %211 = vector.load %arg12[%c6_43, %c64_44] : memref<16x128xf32, #tpu.memory_space<vmem>>, vector<2x64xf32>
    tpu.vector_store %arg12[%c6_43, %c64_44], %209 {strides = array<i32>} : memref<16x128xf32, #tpu.memory_space<vmem>>, vector<2x64xf32>,
    %cst_45 = arith.constant dense<0.000000e+00> : vector<2x256xf32>
    %212 = tpu.matmul %193, %6, %cst_45 {dimension_numbers = #tpu.dot_dimension_numbers<[1], [0], [0], [1], [0, 0, 1, 1], [], []>} : vector<2x64xf32>, vector<64x256xf32>, vector<2x256xf32> -> vector<2x256xf32>
    %213 = vector.extract_strided_slice %5 {offsets = [10, 0], sizes = [2, 256], strides = [1, 1]} : vector<16x512xf32> to vector<2x256xf32>
    %214 = arith.addf %212, %213 : vector<2x256xf32>
    %cst_46 = arith.constant dense<0.000000e+00> : vector<2x256xf32>
    %215 = tpu.matmul %209, %7, %cst_46 {dimension_numbers = #tpu.dot_dimension_numbers<[1], [0], [0], [1], [0, 0, 1, 1], [], []>} : vector<2x64xf32>, vector<64x256xf32>, vector<2x256xf32> -> vector<2x256xf32>
    %216 = vector.extract_strided_slice %5 {offsets = [4, 256], sizes = [2, 256], strides = [1, 1]} : vector<16x512xf32> to vector<2x256xf32>
    %217 = arith.addf %215, %216 : vector<2x256xf32>
    %218 = vector.extract_strided_slice %214 {offsets = [0, 0], sizes = [2, 192], strides = [1, 1]} : vector<2x256xf32> to vector<2x192xf32>
    %219 = arith.negf %218 : vector<2x192xf32>
    %220 = math.exp %219 : vector<2x192xf32>
    %cst_47 = arith.constant 1.000000e+00 : f32
    %221 = vector.broadcast %cst_47 : f32 to vector<2x192xf32>
    %222 = arith.addf %221, %220 : vector<2x192xf32>
    %223 = arith.divf %221, %222 : vector<2x192xf32>
    %224 = vector.extract_strided_slice %214 {offsets = [0, 192], sizes = [2, 64], strides = [1, 1]} : vector<2x256xf32> to vector<2x64xf32>
    %225 = math.tanh %224 : vector<2x64xf32>
    %226 = vector.extract_strided_slice %223 {offsets = [0, 0], sizes = [2, 64], strides = [1, 1]} : vector<2x192xf32> to vector<2x64xf32>
    %227 = vector.extract_strided_slice %223 {offsets = [0, 64], sizes = [2, 64], strides = [1, 1]} : vector<2x192xf32> to vector<2x64xf32>
    %228 = vector.extract_strided_slice %223 {offsets = [0, 128], sizes = [2, 64], strides = [1, 1]} : vector<2x192xf32> to vector<2x64xf32>
    %229 = arith.mulf %227, %191 : vector<2x64xf32>
    %230 = arith.mulf %226, %225 : vector<2x64xf32>
    %231 = arith.addf %229, %230 : vector<2x64xf32>
    %232 = math.tanh %231 : vector<2x64xf32>
    %233 = arith.mulf %228, %232 : vector<2x64xf32>
    %234 = vector.extract_strided_slice %217 {offsets = [0, 0], sizes = [2, 192], strides = [1, 1]} : vector<2x256xf32> to vector<2x192xf32>
    %235 = arith.negf %234 : vector<2x192xf32>
    %236 = math.exp %235 : vector<2x192xf32>
    %cst_48 = arith.constant 1.000000e+00 : f32
    %237 = vector.broadcast %cst_48 : f32 to vector<2x192xf32>
    %238 = arith.addf %237, %236 : vector<2x192xf32>
    %239 = arith.divf %237, %238 : vector<2x192xf32>
    %240 = vector.extract_strided_slice %217 {offsets = [0, 192], sizes = [2, 64], strides = [1, 1]} : vector<2x256xf32> to vector<2x64xf32>
    %241 = math.tanh %240 : vector<2x64xf32>
    %242 = vector.extract_strided_slice %239 {offsets = [0, 0], sizes = [2, 64], strides = [1, 1]} : vector<2x192xf32> to vector<2x64xf32>
    %243 = vector.extract_strided_slice %239 {offsets = [0, 64], sizes = [2, 64], strides = [1, 1]} : vector<2x192xf32> to vector<2x64xf32>
    %244 = vector.extract_strided_slice %239 {offsets = [0, 128], sizes = [2, 64], strides = [1, 1]} : vector<2x192xf32> to vector<2x64xf32>
    %245 = arith.mulf %243, %207 : vector<2x64xf32>
    %246 = arith.mulf %242, %241 : vector<2x64xf32>
    %247 = arith.addf %245, %246 : vector<2x64xf32>
    %248 = math.tanh %247 : vector<2x64xf32>
    %249 = arith.mulf %244, %248 : vector<2x64xf32>
    %c10_49 = arith.constant 10 : index
    %c0_50 = arith.constant 0 : index
    %250 = vector.load %arg12[%c10_49, %c0_50] : memref<16x128xf32, #tpu.memory_space<vmem>>, vector<2x64xf32>
    tpu.vector_store %arg12[%c10_49, %c0_50], %233 {strides = array<i32>} : memref<16x128xf32, #tpu.memory_space<vmem>>, vector<2x64xf32>,
    %c4_51 = arith.constant 4 : index
    %c64_52 = arith.constant 64 : index
    %251 = vector.load %arg12[%c4_51, %c64_52] : memref<16x128xf32, #tpu.memory_space<vmem>>, vector<2x64xf32>
    tpu.vector_store %arg12[%c4_51, %c64_52], %249 {strides = array<i32>} : memref<16x128xf32, #tpu.memory_space<vmem>>, vector<2x64xf32>,
    %cst_53 = arith.constant dense<0.000000e+00> : vector<2x256xf32>
    %252 = tpu.matmul %233, %6, %cst_53 {dimension_numbers = #tpu.dot_dimension_numbers<[1], [0], [0], [1], [0, 0, 1, 1], [], []>} : vector<2x64xf32>, vector<64x256xf32>, vector<2x256xf32> -> vector<2x256xf32>
    %253 = vector.extract_strided_slice %5 {offsets = [12, 0], sizes = [2, 256], strides = [1, 1]} : vector<16x512xf32> to vector<2x256xf32>
    %254 = arith.addf %252, %253 : vector<2x256xf32>
    %cst_54 = arith.constant dense<0.000000e+00> : vector<2x256xf32>
    %255 = tpu.matmul %249, %7, %cst_54 {dimension_numbers = #tpu.dot_dimension_numbers<[1], [0], [0], [1], [0, 0, 1, 1], [], []>} : vector<2x64xf32>, vector<64x256xf32>, vector<2x256xf32> -> vector<2x256xf32>
    %256 = vector.extract_strided_slice %5 {offsets = [2, 256], sizes = [2, 256], strides = [1, 1]} : vector<16x512xf32> to vector<2x256xf32>
    %257 = arith.addf %255, %256 : vector<2x256xf32>
    %258 = vector.extract_strided_slice %254 {offsets = [0, 0], sizes = [2, 192], strides = [1, 1]} : vector<2x256xf32> to vector<2x192xf32>
    %259 = arith.negf %258 : vector<2x192xf32>
    %260 = math.exp %259 : vector<2x192xf32>
    %cst_55 = arith.constant 1.000000e+00 : f32
    %261 = vector.broadcast %cst_55 : f32 to vector<2x192xf32>
    %262 = arith.addf %261, %260 : vector<2x192xf32>
    %263 = arith.divf %261, %262 : vector<2x192xf32>
    %264 = vector.extract_strided_slice %254 {offsets = [0, 192], sizes = [2, 64], strides = [1, 1]} : vector<2x256xf32> to vector<2x64xf32>
    %265 = math.tanh %264 : vector<2x64xf32>
    %266 = vector.extract_strided_slice %263 {offsets = [0, 0], sizes = [2, 64], strides = [1, 1]} : vector<2x192xf32> to vector<2x64xf32>
    %267 = vector.extract_strided_slice %263 {offsets = [0, 64], sizes = [2, 64], strides = [1, 1]} : vector<2x192xf32> to vector<2x64xf32>
    %268 = vector.extract_strided_slice %263 {offsets = [0, 128], sizes = [2, 64], strides = [1, 1]} : vector<2x192xf32> to vector<2x64xf32>
    %269 = arith.mulf %267, %231 : vector<2x64xf32>
    %270 = arith.mulf %266, %265 : vector<2x64xf32>
    %271 = arith.addf %269, %270 : vector<2x64xf32>
    %272 = math.tanh %271 : vector<2x64xf32>
    %273 = arith.mulf %268, %272 : vector<2x64xf32>
    %274 = vector.extract_strided_slice %257 {offsets = [0, 0], sizes = [2, 192], strides = [1, 1]} : vector<2x256xf32> to vector<2x192xf32>
    %275 = arith.negf %274 : vector<2x192xf32>
    %276 = math.exp %275 : vector<2x192xf32>
    %cst_56 = arith.constant 1.000000e+00 : f32
    %277 = vector.broadcast %cst_56 : f32 to vector<2x192xf32>
    %278 = arith.addf %277, %276 : vector<2x192xf32>
    %279 = arith.divf %277, %278 : vector<2x192xf32>
    %280 = vector.extract_strided_slice %257 {offsets = [0, 192], sizes = [2, 64], strides = [1, 1]} : vector<2x256xf32> to vector<2x64xf32>
    %281 = math.tanh %280 : vector<2x64xf32>
    %282 = vector.extract_strided_slice %279 {offsets = [0, 0], sizes = [2, 64], strides = [1, 1]} : vector<2x192xf32> to vector<2x64xf32>
    %283 = vector.extract_strided_slice %279 {offsets = [0, 64], sizes = [2, 64], strides = [1, 1]} : vector<2x192xf32> to vector<2x64xf32>
    %284 = vector.extract_strided_slice %279 {offsets = [0, 128], sizes = [2, 64], strides = [1, 1]} : vector<2x192xf32> to vector<2x64xf32>
    %285 = arith.mulf %283, %247 : vector<2x64xf32>
    %286 = arith.mulf %282, %281 : vector<2x64xf32>
    %287 = arith.addf %285, %286 : vector<2x64xf32>
    %288 = math.tanh %287 : vector<2x64xf32>
    %289 = arith.mulf %284, %288 : vector<2x64xf32>
    %c12_57 = arith.constant 12 : index
    %c0_58 = arith.constant 0 : index
    %290 = vector.load %arg12[%c12_57, %c0_58] : memref<16x128xf32, #tpu.memory_space<vmem>>, vector<2x64xf32>
    tpu.vector_store %arg12[%c12_57, %c0_58], %273 {strides = array<i32>} : memref<16x128xf32, #tpu.memory_space<vmem>>, vector<2x64xf32>,
    %c2_59 = arith.constant 2 : index
    %c64_60 = arith.constant 64 : index
    %291 = vector.load %arg12[%c2_59, %c64_60] : memref<16x128xf32, #tpu.memory_space<vmem>>, vector<2x64xf32>
    tpu.vector_store %arg12[%c2_59, %c64_60], %289 {strides = array<i32>} : memref<16x128xf32, #tpu.memory_space<vmem>>, vector<2x64xf32>,
    %cst_61 = arith.constant dense<0.000000e+00> : vector<2x256xf32>
    %292 = tpu.matmul %273, %6, %cst_61 {dimension_numbers = #tpu.dot_dimension_numbers<[1], [0], [0], [1], [0, 0, 1, 1], [], []>} : vector<2x64xf32>, vector<64x256xf32>, vector<2x256xf32> -> vector<2x256xf32>
    %293 = vector.extract_strided_slice %5 {offsets = [14, 0], sizes = [2, 256], strides = [1, 1]} : vector<16x512xf32> to vector<2x256xf32>
    %294 = arith.addf %292, %293 : vector<2x256xf32>
    %cst_62 = arith.constant dense<0.000000e+00> : vector<2x256xf32>
    %295 = tpu.matmul %289, %7, %cst_62 {dimension_numbers = #tpu.dot_dimension_numbers<[1], [0], [0], [1], [0, 0, 1, 1], [], []>} : vector<2x64xf32>, vector<64x256xf32>, vector<2x256xf32> -> vector<2x256xf32>
    %296 = vector.extract_strided_slice %5 {offsets = [0, 256], sizes = [2, 256], strides = [1, 1]} : vector<16x512xf32> to vector<2x256xf32>
    %297 = arith.addf %295, %296 : vector<2x256xf32>
    %298 = vector.extract_strided_slice %294 {offsets = [0, 0], sizes = [2, 192], strides = [1, 1]} : vector<2x256xf32> to vector<2x192xf32>
    %299 = arith.negf %298 : vector<2x192xf32>
    %300 = math.exp %299 : vector<2x192xf32>
    %cst_63 = arith.constant 1.000000e+00 : f32
    %301 = vector.broadcast %cst_63 : f32 to vector<2x192xf32>
    %302 = arith.addf %301, %300 : vector<2x192xf32>
    %303 = arith.divf %301, %302 : vector<2x192xf32>
    %304 = vector.extract_strided_slice %294 {offsets = [0, 192], sizes = [2, 64], strides = [1, 1]} : vector<2x256xf32> to vector<2x64xf32>
    %305 = math.tanh %304 : vector<2x64xf32>
    %306 = vector.extract_strided_slice %303 {offsets = [0, 0], sizes = [2, 64], strides = [1, 1]} : vector<2x192xf32> to vector<2x64xf32>
    %307 = vector.extract_strided_slice %303 {offsets = [0, 64], sizes = [2, 64], strides = [1, 1]} : vector<2x192xf32> to vector<2x64xf32>
    %308 = vector.extract_strided_slice %303 {offsets = [0, 128], sizes = [2, 64], strides = [1, 1]} : vector<2x192xf32> to vector<2x64xf32>
    %309 = arith.mulf %307, %271 : vector<2x64xf32>
    %310 = arith.mulf %306, %305 : vector<2x64xf32>
    %311 = arith.addf %309, %310 : vector<2x64xf32>
    %312 = math.tanh %311 : vector<2x64xf32>
    %313 = arith.mulf %308, %312 : vector<2x64xf32>
    %314 = vector.extract_strided_slice %297 {offsets = [0, 0], sizes = [2, 192], strides = [1, 1]} : vector<2x256xf32> to vector<2x192xf32>
    %315 = arith.negf %314 : vector<2x192xf32>
    %316 = math.exp %315 : vector<2x192xf32>
    %cst_64 = arith.constant 1.000000e+00 : f32
    %317 = vector.broadcast %cst_64 : f32 to vector<2x192xf32>
    %318 = arith.addf %317, %316 : vector<2x192xf32>
    %319 = arith.divf %317, %318 : vector<2x192xf32>
    %320 = vector.extract_strided_slice %297 {offsets = [0, 192], sizes = [2, 64], strides = [1, 1]} : vector<2x256xf32> to vector<2x64xf32>
    %321 = math.tanh %320 : vector<2x64xf32>
    %322 = vector.extract_strided_slice %319 {offsets = [0, 0], sizes = [2, 64], strides = [1, 1]} : vector<2x192xf32> to vector<2x64xf32>
    %323 = vector.extract_strided_slice %319 {offsets = [0, 64], sizes = [2, 64], strides = [1, 1]} : vector<2x192xf32> to vector<2x64xf32>
    %324 = vector.extract_strided_slice %319 {offsets = [0, 128], sizes = [2, 64], strides = [1, 1]} : vector<2x192xf32> to vector<2x64xf32>
    %325 = arith.mulf %323, %287 : vector<2x64xf32>
    %326 = arith.mulf %322, %321 : vector<2x64xf32>
    %327 = arith.addf %325, %326 : vector<2x64xf32>
    %328 = math.tanh %327 : vector<2x64xf32>
    %329 = arith.mulf %324, %328 : vector<2x64xf32>
    %c14_65 = arith.constant 14 : index
    %c0_66 = arith.constant 0 : index
    %330 = vector.load %arg12[%c14_65, %c0_66] : memref<16x128xf32, #tpu.memory_space<vmem>>, vector<2x64xf32>
    tpu.vector_store %arg12[%c14_65, %c0_66], %313 {strides = array<i32>} : memref<16x128xf32, #tpu.memory_space<vmem>>, vector<2x64xf32>,
    %c0_67 = arith.constant 0 : index
    %c64_68 = arith.constant 64 : index
    %331 = vector.load %arg12[%c0_67, %c64_68] : memref<16x128xf32, #tpu.memory_space<vmem>>, vector<2x64xf32>
    tpu.vector_store %arg12[%c0_67, %c64_68], %329 {strides = array<i32>} : memref<16x128xf32, #tpu.memory_space<vmem>>, vector<2x64xf32>,
    %c0_69 = arith.constant 0 : index
    %c0_70 = arith.constant 0 : index
    %332 = vector.load %arg12[%c0_69, %c0_70] : memref<16x128xf32, #tpu.memory_space<vmem>>, vector<16x128xf32>
    %c0_71 = arith.constant 0 : index
    %c0_72 = arith.constant 0 : index
    %333 = vector.load %arg5[%c0_71, %c0_72] : memref<128x512xf32, #tpu.memory_space<vmem>>, vector<128x512xf32>
    %cst_73 = arith.constant dense<0.000000e+00> : vector<16x512xf32>
    %334 = tpu.matmul %332, %333, %cst_73 {dimension_numbers = #tpu.dot_dimension_numbers<[1], [0], [0], [1], [0, 0, 1, 1], [], []>} : vector<16x128xf32>, vector<128x512xf32>, vector<16x512xf32> -> vector<16x512xf32>
    %c0_74 = arith.constant 0 : index
    %c0_75 = arith.constant 0 : index
    %335 = vector.load %arg8[%c0_74, %c0_75] : memref<1x512xf32, #tpu.memory_space<vmem>>, vector<1x512xf32>
    %336 = vector.broadcast %335 : vector<1x512xf32> to vector<16x512xf32>
    %337 = arith.addf %334, %336 : vector<16x512xf32>
    %c0_76 = arith.constant 0 : index
    %c0_77 = arith.constant 0 : index
    %338 = vector.load %arg6[%c0_76, %c0_77] : memref<64x256xf32, #tpu.memory_space<vmem>>, vector<64x256xf32>
    %c0_78 = arith.constant 0 : index
    %c0_79 = arith.constant 0 : index
    %339 = vector.load %arg7[%c0_78, %c0_79] : memref<64x256xf32, #tpu.memory_space<vmem>>, vector<64x256xf32>
    %cst_80 = arith.constant 0.000000e+00 : f32
    %340 = vector.broadcast %cst_80 : f32 to vector<2x64xf32>
    %cst_81 = arith.constant 0.000000e+00 : f32
    %341 = vector.broadcast %cst_81 : f32 to vector<2x64xf32>
    %cst_82 = arith.constant 0.000000e+00 : f32
    %342 = vector.broadcast %cst_82 : f32 to vector<2x64xf32>
    %cst_83 = arith.constant 0.000000e+00 : f32
    %343 = vector.broadcast %cst_83 : f32 to vector<2x64xf32>
    %cst_84 = arith.constant dense<0.000000e+00> : vector<2x256xf32>
    %344 = tpu.matmul %340, %338, %cst_84 {dimension_numbers = #tpu.dot_dimension_numbers<[1], [0], [0], [1], [0, 0, 1, 1], [], []>} : vector<2x64xf32>, vector<64x256xf32>, vector<2x256xf32> -> vector<2x256xf32>
    %345 = vector.extract_strided_slice %337 {offsets = [0, 0], sizes = [2, 256], strides = [1, 1]} : vector<16x512xf32> to vector<2x256xf32>
    %346 = arith.addf %344, %345 : vector<2x256xf32>
    %cst_85 = arith.constant dense<0.000000e+00> : vector<2x256xf32>
    %347 = tpu.matmul %342, %339, %cst_85 {dimension_numbers = #tpu.dot_dimension_numbers<[1], [0], [0], [1], [0, 0, 1, 1], [], []>} : vector<2x64xf32>, vector<64x256xf32>, vector<2x256xf32> -> vector<2x256xf32>
    %348 = vector.extract_strided_slice %337 {offsets = [14, 256], sizes = [2, 256], strides = [1, 1]} : vector<16x512xf32> to vector<2x256xf32>
    %349 = arith.addf %347, %348 : vector<2x256xf32>
    %350 = vector.extract_strided_slice %346 {offsets = [0, 0], sizes = [2, 192], strides = [1, 1]} : vector<2x256xf32> to vector<2x192xf32>
    %351 = arith.negf %350 : vector<2x192xf32>
    %352 = math.exp %351 : vector<2x192xf32>
    %cst_86 = arith.constant 1.000000e+00 : f32
    %353 = vector.broadcast %cst_86 : f32 to vector<2x192xf32>
    %354 = arith.addf %353, %352 : vector<2x192xf32>
    %355 = arith.divf %353, %354 : vector<2x192xf32>
    %356 = vector.extract_strided_slice %346 {offsets = [0, 192], sizes = [2, 64], strides = [1, 1]} : vector<2x256xf32> to vector<2x64xf32>
    %357 = math.tanh %356 : vector<2x64xf32>
    %358 = vector.extract_strided_slice %355 {offsets = [0, 0], sizes = [2, 64], strides = [1, 1]} : vector<2x192xf32> to vector<2x64xf32>
    %359 = vector.extract_strided_slice %355 {offsets = [0, 64], sizes = [2, 64], strides = [1, 1]} : vector<2x192xf32> to vector<2x64xf32>
    %360 = vector.extract_strided_slice %355 {offsets = [0, 128], sizes = [2, 64], strides = [1, 1]} : vector<2x192xf32> to vector<2x64xf32>
    %361 = arith.mulf %359, %341 : vector<2x64xf32>
    %362 = arith.mulf %358, %357 : vector<2x64xf32>
    %363 = arith.addf %361, %362 : vector<2x64xf32>
    %364 = math.tanh %363 : vector<2x64xf32>
    %365 = arith.mulf %360, %364 : vector<2x64xf32>
    %366 = vector.extract_strided_slice %349 {offsets = [0, 0], sizes = [2, 192], strides = [1, 1]} : vector<2x256xf32> to vector<2x192xf32>
    %367 = arith.negf %366 : vector<2x192xf32>
    %368 = math.exp %367 : vector<2x192xf32>
    %cst_87 = arith.constant 1.000000e+00 : f32
    %369 = vector.broadcast %cst_87 : f32 to vector<2x192xf32>
    %370 = arith.addf %369, %368 : vector<2x192xf32>
    %371 = arith.divf %369, %370 : vector<2x192xf32>
    %372 = vector.extract_strided_slice %349 {offsets = [0, 192], sizes = [2, 64], strides = [1, 1]} : vector<2x256xf32> to vector<2x64xf32>
    %373 = math.tanh %372 : vector<2x64xf32>
    %374 = vector.extract_strided_slice %371 {offsets = [0, 0], sizes = [2, 64], strides = [1, 1]} : vector<2x192xf32> to vector<2x64xf32>
    %375 = vector.extract_strided_slice %371 {offsets = [0, 64], sizes = [2, 64], strides = [1, 1]} : vector<2x192xf32> to vector<2x64xf32>
    %376 = vector.extract_strided_slice %371 {offsets = [0, 128], sizes = [2, 64], strides = [1, 1]} : vector<2x192xf32> to vector<2x64xf32>
    %377 = arith.mulf %375, %343 : vector<2x64xf32>
    %378 = arith.mulf %374, %373 : vector<2x64xf32>
    %379 = arith.addf %377, %378 : vector<2x64xf32>
    %380 = math.tanh %379 : vector<2x64xf32>
    %381 = arith.mulf %376, %380 : vector<2x64xf32>
    %c0_88 = arith.constant 0 : index
    %c0_89 = arith.constant 0 : index
    %382 = vector.load %arg13[%c0_88, %c0_89] : memref<16x128xf32, #tpu.memory_space<vmem>>, vector<2x64xf32>
    tpu.vector_store %arg13[%c0_88, %c0_89], %365 {strides = array<i32>} : memref<16x128xf32, #tpu.memory_space<vmem>>, vector<2x64xf32>,
    %c14_90 = arith.constant 14 : index
    %c64_91 = arith.constant 64 : index
    %383 = vector.load %arg13[%c14_90, %c64_91] : memref<16x128xf32, #tpu.memory_space<vmem>>, vector<2x64xf32>
    tpu.vector_store %arg13[%c14_90, %c64_91], %381 {strides = array<i32>} : memref<16x128xf32, #tpu.memory_space<vmem>>, vector<2x64xf32>,
    %cst_92 = arith.constant dense<0.000000e+00> : vector<2x256xf32>
    %384 = tpu.matmul %365, %338, %cst_92 {dimension_numbers = #tpu.dot_dimension_numbers<[1], [0], [0], [1], [0, 0, 1, 1], [], []>} : vector<2x64xf32>, vector<64x256xf32>, vector<2x256xf32> -> vector<2x256xf32>
    %385 = vector.extract_strided_slice %337 {offsets = [2, 0], sizes = [2, 256], strides = [1, 1]} : vector<16x512xf32> to vector<2x256xf32>
    %386 = arith.addf %384, %385 : vector<2x256xf32>
    %cst_93 = arith.constant dense<0.000000e+00> : vector<2x256xf32>
    %387 = tpu.matmul %381, %339, %cst_93 {dimension_numbers = #tpu.dot_dimension_numbers<[1], [0], [0], [1], [0, 0, 1, 1], [], []>} : vector<2x64xf32>, vector<64x256xf32>, vector<2x256xf32> -> vector<2x256xf32>
    %388 = vector.extract_strided_slice %337 {offsets = [12, 256], sizes = [2, 256], strides = [1, 1]} : vector<16x512xf32> to vector<2x256xf32>
    %389 = arith.addf %387, %388 : vector<2x256xf32>
    %390 = vector.extract_strided_slice %386 {offsets = [0, 0], sizes = [2, 192], strides = [1, 1]} : vector<2x256xf32> to vector<2x192xf32>
    %391 = arith.negf %390 : vector<2x192xf32>
    %392 = math.exp %391 : vector<2x192xf32>
    %cst_94 = arith.constant 1.000000e+00 : f32
    %393 = vector.broadcast %cst_94 : f32 to vector<2x192xf32>
    %394 = arith.addf %393, %392 : vector<2x192xf32>
    %395 = arith.divf %393, %394 : vector<2x192xf32>
    %396 = vector.extract_strided_slice %386 {offsets = [0, 192], sizes = [2, 64], strides = [1, 1]} : vector<2x256xf32> to vector<2x64xf32>
    %397 = math.tanh %396 : vector<2x64xf32>
    %398 = vector.extract_strided_slice %395 {offsets = [0, 0], sizes = [2, 64], strides = [1, 1]} : vector<2x192xf32> to vector<2x64xf32>
    %399 = vector.extract_strided_slice %395 {offsets = [0, 64], sizes = [2, 64], strides = [1, 1]} : vector<2x192xf32> to vector<2x64xf32>
    %400 = vector.extract_strided_slice %395 {offsets = [0, 128], sizes = [2, 64], strides = [1, 1]} : vector<2x192xf32> to vector<2x64xf32>
    %401 = arith.mulf %399, %363 : vector<2x64xf32>
    %402 = arith.mulf %398, %397 : vector<2x64xf32>
    %403 = arith.addf %401, %402 : vector<2x64xf32>
    %404 = math.tanh %403 : vector<2x64xf32>
    %405 = arith.mulf %400, %404 : vector<2x64xf32>
    %406 = vector.extract_strided_slice %389 {offsets = [0, 0], sizes = [2, 192], strides = [1, 1]} : vector<2x256xf32> to vector<2x192xf32>
    %407 = arith.negf %406 : vector<2x192xf32>
    %408 = math.exp %407 : vector<2x192xf32>
    %cst_95 = arith.constant 1.000000e+00 : f32
    %409 = vector.broadcast %cst_95 : f32 to vector<2x192xf32>
    %410 = arith.addf %409, %408 : vector<2x192xf32>
    %411 = arith.divf %409, %410 : vector<2x192xf32>
    %412 = vector.extract_strided_slice %389 {offsets = [0, 192], sizes = [2, 64], strides = [1, 1]} : vector<2x256xf32> to vector<2x64xf32>
    %413 = math.tanh %412 : vector<2x64xf32>
    %414 = vector.extract_strided_slice %411 {offsets = [0, 0], sizes = [2, 64], strides = [1, 1]} : vector<2x192xf32> to vector<2x64xf32>
    %415 = vector.extract_strided_slice %411 {offsets = [0, 64], sizes = [2, 64], strides = [1, 1]} : vector<2x192xf32> to vector<2x64xf32>
    %416 = vector.extract_strided_slice %411 {offsets = [0, 128], sizes = [2, 64], strides = [1, 1]} : vector<2x192xf32> to vector<2x64xf32>
    %417 = arith.mulf %415, %379 : vector<2x64xf32>
    %418 = arith.mulf %414, %413 : vector<2x64xf32>
    %419 = arith.addf %417, %418 : vector<2x64xf32>
    %420 = math.tanh %419 : vector<2x64xf32>
    %421 = arith.mulf %416, %420 : vector<2x64xf32>
    %c2_96 = arith.constant 2 : index
    %c0_97 = arith.constant 0 : index
    %422 = vector.load %arg13[%c2_96, %c0_97] : memref<16x128xf32, #tpu.memory_space<vmem>>, vector<2x64xf32>
    tpu.vector_store %arg13[%c2_96, %c0_97], %405 {strides = array<i32>} : memref<16x128xf32, #tpu.memory_space<vmem>>, vector<2x64xf32>,
    %c12_98 = arith.constant 12 : index
    %c64_99 = arith.constant 64 : index
    %423 = vector.load %arg13[%c12_98, %c64_99] : memref<16x128xf32, #tpu.memory_space<vmem>>, vector<2x64xf32>
    tpu.vector_store %arg13[%c12_98, %c64_99], %421 {strides = array<i32>} : memref<16x128xf32, #tpu.memory_space<vmem>>, vector<2x64xf32>,
    %cst_100 = arith.constant dense<0.000000e+00> : vector<2x256xf32>
    %424 = tpu.matmul %405, %338, %cst_100 {dimension_numbers = #tpu.dot_dimension_numbers<[1], [0], [0], [1], [0, 0, 1, 1], [], []>} : vector<2x64xf32>, vector<64x256xf32>, vector<2x256xf32> -> vector<2x256xf32>
    %425 = vector.extract_strided_slice %337 {offsets = [4, 0], sizes = [2, 256], strides = [1, 1]} : vector<16x512xf32> to vector<2x256xf32>
    %426 = arith.addf %424, %425 : vector<2x256xf32>
    %cst_101 = arith.constant dense<0.000000e+00> : vector<2x256xf32>
    %427 = tpu.matmul %421, %339, %cst_101 {dimension_numbers = #tpu.dot_dimension_numbers<[1], [0], [0], [1], [0, 0, 1, 1], [], []>} : vector<2x64xf32>, vector<64x256xf32>, vector<2x256xf32> -> vector<2x256xf32>
    %428 = vector.extract_strided_slice %337 {offsets = [10, 256], sizes = [2, 256], strides = [1, 1]} : vector<16x512xf32> to vector<2x256xf32>
    %429 = arith.addf %427, %428 : vector<2x256xf32>
    %430 = vector.extract_strided_slice %426 {offsets = [0, 0], sizes = [2, 192], strides = [1, 1]} : vector<2x256xf32> to vector<2x192xf32>
    %431 = arith.negf %430 : vector<2x192xf32>
    %432 = math.exp %431 : vector<2x192xf32>
    %cst_102 = arith.constant 1.000000e+00 : f32
    %433 = vector.broadcast %cst_102 : f32 to vector<2x192xf32>
    %434 = arith.addf %433, %432 : vector<2x192xf32>
    %435 = arith.divf %433, %434 : vector<2x192xf32>
    %436 = vector.extract_strided_slice %426 {offsets = [0, 192], sizes = [2, 64], strides = [1, 1]} : vector<2x256xf32> to vector<2x64xf32>
    %437 = math.tanh %436 : vector<2x64xf32>
    %438 = vector.extract_strided_slice %435 {offsets = [0, 0], sizes = [2, 64], strides = [1, 1]} : vector<2x192xf32> to vector<2x64xf32>
    %439 = vector.extract_strided_slice %435 {offsets = [0, 64], sizes = [2, 64], strides = [1, 1]} : vector<2x192xf32> to vector<2x64xf32>
    %440 = vector.extract_strided_slice %435 {offsets = [0, 128], sizes = [2, 64], strides = [1, 1]} : vector<2x192xf32> to vector<2x64xf32>
    %441 = arith.mulf %439, %403 : vector<2x64xf32>
    %442 = arith.mulf %438, %437 : vector<2x64xf32>
    %443 = arith.addf %441, %442 : vector<2x64xf32>
    %444 = math.tanh %443 : vector<2x64xf32>
    %445 = arith.mulf %440, %444 : vector<2x64xf32>
    %446 = vector.extract_strided_slice %429 {offsets = [0, 0], sizes = [2, 192], strides = [1, 1]} : vector<2x256xf32> to vector<2x192xf32>
    %447 = arith.negf %446 : vector<2x192xf32>
    %448 = math.exp %447 : vector<2x192xf32>
    %cst_103 = arith.constant 1.000000e+00 : f32
    %449 = vector.broadcast %cst_103 : f32 to vector<2x192xf32>
    %450 = arith.addf %449, %448 : vector<2x192xf32>
    %451 = arith.divf %449, %450 : vector<2x192xf32>
    %452 = vector.extract_strided_slice %429 {offsets = [0, 192], sizes = [2, 64], strides = [1, 1]} : vector<2x256xf32> to vector<2x64xf32>
    %453 = math.tanh %452 : vector<2x64xf32>
    %454 = vector.extract_strided_slice %451 {offsets = [0, 0], sizes = [2, 64], strides = [1, 1]} : vector<2x192xf32> to vector<2x64xf32>
    %455 = vector.extract_strided_slice %451 {offsets = [0, 64], sizes = [2, 64], strides = [1, 1]} : vector<2x192xf32> to vector<2x64xf32>
    %456 = vector.extract_strided_slice %451 {offsets = [0, 128], sizes = [2, 64], strides = [1, 1]} : vector<2x192xf32> to vector<2x64xf32>
    %457 = arith.mulf %455, %419 : vector<2x64xf32>
    %458 = arith.mulf %454, %453 : vector<2x64xf32>
    %459 = arith.addf %457, %458 : vector<2x64xf32>
    %460 = math.tanh %459 : vector<2x64xf32>
    %461 = arith.mulf %456, %460 : vector<2x64xf32>
    %c4_104 = arith.constant 4 : index
    %c0_105 = arith.constant 0 : index
    %462 = vector.load %arg13[%c4_104, %c0_105] : memref<16x128xf32, #tpu.memory_space<vmem>>, vector<2x64xf32>
    tpu.vector_store %arg13[%c4_104, %c0_105], %445 {strides = array<i32>} : memref<16x128xf32, #tpu.memory_space<vmem>>, vector<2x64xf32>,
    %c10_106 = arith.constant 10 : index
    %c64_107 = arith.constant 64 : index
    %463 = vector.load %arg13[%c10_106, %c64_107] : memref<16x128xf32, #tpu.memory_space<vmem>>, vector<2x64xf32>
    tpu.vector_store %arg13[%c10_106, %c64_107], %461 {strides = array<i32>} : memref<16x128xf32, #tpu.memory_space<vmem>>, vector<2x64xf32>,
    %cst_108 = arith.constant dense<0.000000e+00> : vector<2x256xf32>
    %464 = tpu.matmul %445, %338, %cst_108 {dimension_numbers = #tpu.dot_dimension_numbers<[1], [0], [0], [1], [0, 0, 1, 1], [], []>} : vector<2x64xf32>, vector<64x256xf32>, vector<2x256xf32> -> vector<2x256xf32>
    %465 = vector.extract_strided_slice %337 {offsets = [6, 0], sizes = [2, 256], strides = [1, 1]} : vector<16x512xf32> to vector<2x256xf32>
    %466 = arith.addf %464, %465 : vector<2x256xf32>
    %cst_109 = arith.constant dense<0.000000e+00> : vector<2x256xf32>
    %467 = tpu.matmul %461, %339, %cst_109 {dimension_numbers = #tpu.dot_dimension_numbers<[1], [0], [0], [1], [0, 0, 1, 1], [], []>} : vector<2x64xf32>, vector<64x256xf32>, vector<2x256xf32> -> vector<2x256xf32>
    %468 = vector.extract_strided_slice %337 {offsets = [8, 256], sizes = [2, 256], strides = [1, 1]} : vector<16x512xf32> to vector<2x256xf32>
    %469 = arith.addf %467, %468 : vector<2x256xf32>
    %470 = vector.extract_strided_slice %466 {offsets = [0, 0], sizes = [2, 192], strides = [1, 1]} : vector<2x256xf32> to vector<2x192xf32>
    %471 = arith.negf %470 : vector<2x192xf32>
    %472 = math.exp %471 : vector<2x192xf32>
    %cst_110 = arith.constant 1.000000e+00 : f32
    %473 = vector.broadcast %cst_110 : f32 to vector<2x192xf32>
    %474 = arith.addf %473, %472 : vector<2x192xf32>
    %475 = arith.divf %473, %474 : vector<2x192xf32>
    %476 = vector.extract_strided_slice %466 {offsets = [0, 192], sizes = [2, 64], strides = [1, 1]} : vector<2x256xf32> to vector<2x64xf32>
    %477 = math.tanh %476 : vector<2x64xf32>
    %478 = vector.extract_strided_slice %475 {offsets = [0, 0], sizes = [2, 64], strides = [1, 1]} : vector<2x192xf32> to vector<2x64xf32>
    %479 = vector.extract_strided_slice %475 {offsets = [0, 64], sizes = [2, 64], strides = [1, 1]} : vector<2x192xf32> to vector<2x64xf32>
    %480 = vector.extract_strided_slice %475 {offsets = [0, 128], sizes = [2, 64], strides = [1, 1]} : vector<2x192xf32> to vector<2x64xf32>
    %481 = arith.mulf %479, %443 : vector<2x64xf32>
    %482 = arith.mulf %478, %477 : vector<2x64xf32>
    %483 = arith.addf %481, %482 : vector<2x64xf32>
    %484 = math.tanh %483 : vector<2x64xf32>
    %485 = arith.mulf %480, %484 : vector<2x64xf32>
    %486 = vector.extract_strided_slice %469 {offsets = [0, 0], sizes = [2, 192], strides = [1, 1]} : vector<2x256xf32> to vector<2x192xf32>
    %487 = arith.negf %486 : vector<2x192xf32>
    %488 = math.exp %487 : vector<2x192xf32>
    %cst_111 = arith.constant 1.000000e+00 : f32
    %489 = vector.broadcast %cst_111 : f32 to vector<2x192xf32>
    %490 = arith.addf %489, %488 : vector<2x192xf32>
    %491 = arith.divf %489, %490 : vector<2x192xf32>
    %492 = vector.extract_strided_slice %469 {offsets = [0, 192], sizes = [2, 64], strides = [1, 1]} : vector<2x256xf32> to vector<2x64xf32>
    %493 = math.tanh %492 : vector<2x64xf32>
    %494 = vector.extract_strided_slice %491 {offsets = [0, 0], sizes = [2, 64], strides = [1, 1]} : vector<2x192xf32> to vector<2x64xf32>
    %495 = vector.extract_strided_slice %491 {offsets = [0, 64], sizes = [2, 64], strides = [1, 1]} : vector<2x192xf32> to vector<2x64xf32>
    %496 = vector.extract_strided_slice %491 {offsets = [0, 128], sizes = [2, 64], strides = [1, 1]} : vector<2x192xf32> to vector<2x64xf32>
    %497 = arith.mulf %495, %459 : vector<2x64xf32>
    %498 = arith.mulf %494, %493 : vector<2x64xf32>
    %499 = arith.addf %497, %498 : vector<2x64xf32>
    %500 = math.tanh %499 : vector<2x64xf32>
    %501 = arith.mulf %496, %500 : vector<2x64xf32>
    %c6_112 = arith.constant 6 : index
    %c0_113 = arith.constant 0 : index
    %502 = vector.load %arg13[%c6_112, %c0_113] : memref<16x128xf32, #tpu.memory_space<vmem>>, vector<2x64xf32>
    tpu.vector_store %arg13[%c6_112, %c0_113], %485 {strides = array<i32>} : memref<16x128xf32, #tpu.memory_space<vmem>>, vector<2x64xf32>,
    %c8_114 = arith.constant 8 : index
    %c64_115 = arith.constant 64 : index
    %503 = vector.load %arg13[%c8_114, %c64_115] : memref<16x128xf32, #tpu.memory_space<vmem>>, vector<2x64xf32>
    tpu.vector_store %arg13[%c8_114, %c64_115], %501 {strides = array<i32>} : memref<16x128xf32, #tpu.memory_space<vmem>>, vector<2x64xf32>,
    %cst_116 = arith.constant dense<0.000000e+00> : vector<2x256xf32>
    %504 = tpu.matmul %485, %338, %cst_116 {dimension_numbers = #tpu.dot_dimension_numbers<[1], [0], [0], [1], [0, 0, 1, 1], [], []>} : vector<2x64xf32>, vector<64x256xf32>, vector<2x256xf32> -> vector<2x256xf32>
    %505 = vector.extract_strided_slice %337 {offsets = [8, 0], sizes = [2, 256], strides = [1, 1]} : vector<16x512xf32> to vector<2x256xf32>
    %506 = arith.addf %504, %505 : vector<2x256xf32>
    %cst_117 = arith.constant dense<0.000000e+00> : vector<2x256xf32>
    %507 = tpu.matmul %501, %339, %cst_117 {dimension_numbers = #tpu.dot_dimension_numbers<[1], [0], [0], [1], [0, 0, 1, 1], [], []>} : vector<2x64xf32>, vector<64x256xf32>, vector<2x256xf32> -> vector<2x256xf32>
    %508 = vector.extract_strided_slice %337 {offsets = [6, 256], sizes = [2, 256], strides = [1, 1]} : vector<16x512xf32> to vector<2x256xf32>
    %509 = arith.addf %507, %508 : vector<2x256xf32>
    %510 = vector.extract_strided_slice %506 {offsets = [0, 0], sizes = [2, 192], strides = [1, 1]} : vector<2x256xf32> to vector<2x192xf32>
    %511 = arith.negf %510 : vector<2x192xf32>
    %512 = math.exp %511 : vector<2x192xf32>
    %cst_118 = arith.constant 1.000000e+00 : f32
    %513 = vector.broadcast %cst_118 : f32 to vector<2x192xf32>
    %514 = arith.addf %513, %512 : vector<2x192xf32>
    %515 = arith.divf %513, %514 : vector<2x192xf32>
    %516 = vector.extract_strided_slice %506 {offsets = [0, 192], sizes = [2, 64], strides = [1, 1]} : vector<2x256xf32> to vector<2x64xf32>
    %517 = math.tanh %516 : vector<2x64xf32>
    %518 = vector.extract_strided_slice %515 {offsets = [0, 0], sizes = [2, 64], strides = [1, 1]} : vector<2x192xf32> to vector<2x64xf32>
    %519 = vector.extract_strided_slice %515 {offsets = [0, 64], sizes = [2, 64], strides = [1, 1]} : vector<2x192xf32> to vector<2x64xf32>
    %520 = vector.extract_strided_slice %515 {offsets = [0, 128], sizes = [2, 64], strides = [1, 1]} : vector<2x192xf32> to vector<2x64xf32>
    %521 = arith.mulf %519, %483 : vector<2x64xf32>
    %522 = arith.mulf %518, %517 : vector<2x64xf32>
    %523 = arith.addf %521, %522 : vector<2x64xf32>
    %524 = math.tanh %523 : vector<2x64xf32>
    %525 = arith.mulf %520, %524 : vector<2x64xf32>
    %526 = vector.extract_strided_slice %509 {offsets = [0, 0], sizes = [2, 192], strides = [1, 1]} : vector<2x256xf32> to vector<2x192xf32>
    %527 = arith.negf %526 : vector<2x192xf32>
    %528 = math.exp %527 : vector<2x192xf32>
    %cst_119 = arith.constant 1.000000e+00 : f32
    %529 = vector.broadcast %cst_119 : f32 to vector<2x192xf32>
    %530 = arith.addf %529, %528 : vector<2x192xf32>
    %531 = arith.divf %529, %530 : vector<2x192xf32>
    %532 = vector.extract_strided_slice %509 {offsets = [0, 192], sizes = [2, 64], strides = [1, 1]} : vector<2x256xf32> to vector<2x64xf32>
    %533 = math.tanh %532 : vector<2x64xf32>
    %534 = vector.extract_strided_slice %531 {offsets = [0, 0], sizes = [2, 64], strides = [1, 1]} : vector<2x192xf32> to vector<2x64xf32>
    %535 = vector.extract_strided_slice %531 {offsets = [0, 64], sizes = [2, 64], strides = [1, 1]} : vector<2x192xf32> to vector<2x64xf32>
    %536 = vector.extract_strided_slice %531 {offsets = [0, 128], sizes = [2, 64], strides = [1, 1]} : vector<2x192xf32> to vector<2x64xf32>
    %537 = arith.mulf %535, %499 : vector<2x64xf32>
    %538 = arith.mulf %534, %533 : vector<2x64xf32>
    %539 = arith.addf %537, %538 : vector<2x64xf32>
    %540 = math.tanh %539 : vector<2x64xf32>
    %541 = arith.mulf %536, %540 : vector<2x64xf32>
    %c8_120 = arith.constant 8 : index
    %c0_121 = arith.constant 0 : index
    %542 = vector.load %arg13[%c8_120, %c0_121] : memref<16x128xf32, #tpu.memory_space<vmem>>, vector<2x64xf32>
    tpu.vector_store %arg13[%c8_120, %c0_121], %525 {strides = array<i32>} : memref<16x128xf32, #tpu.memory_space<vmem>>, vector<2x64xf32>,
    %c6_122 = arith.constant 6 : index
    %c64_123 = arith.constant 64 : index
    %543 = vector.load %arg13[%c6_122, %c64_123] : memref<16x128xf32, #tpu.memory_space<vmem>>, vector<2x64xf32>
    tpu.vector_store %arg13[%c6_122, %c64_123], %541 {strides = array<i32>} : memref<16x128xf32, #tpu.memory_space<vmem>>, vector<2x64xf32>,
    %cst_124 = arith.constant dense<0.000000e+00> : vector<2x256xf32>
    %544 = tpu.matmul %525, %338, %cst_124 {dimension_numbers = #tpu.dot_dimension_numbers<[1], [0], [0], [1], [0, 0, 1, 1], [], []>} : vector<2x64xf32>, vector<64x256xf32>, vector<2x256xf32> -> vector<2x256xf32>
    %545 = vector.extract_strided_slice %337 {offsets = [10, 0], sizes = [2, 256], strides = [1, 1]} : vector<16x512xf32> to vector<2x256xf32>
    %546 = arith.addf %544, %545 : vector<2x256xf32>
    %cst_125 = arith.constant dense<0.000000e+00> : vector<2x256xf32>
    %547 = tpu.matmul %541, %339, %cst_125 {dimension_numbers = #tpu.dot_dimension_numbers<[1], [0], [0], [1], [0, 0, 1, 1], [], []>} : vector<2x64xf32>, vector<64x256xf32>, vector<2x256xf32> -> vector<2x256xf32>
    %548 = vector.extract_strided_slice %337 {offsets = [4, 256], sizes = [2, 256], strides = [1, 1]} : vector<16x512xf32> to vector<2x256xf32>
    %549 = arith.addf %547, %548 : vector<2x256xf32>
    %550 = vector.extract_strided_slice %546 {offsets = [0, 0], sizes = [2, 192], strides = [1, 1]} : vector<2x256xf32> to vector<2x192xf32>
    %551 = arith.negf %550 : vector<2x192xf32>
    %552 = math.exp %551 : vector<2x192xf32>
    %cst_126 = arith.constant 1.000000e+00 : f32
    %553 = vector.broadcast %cst_126 : f32 to vector<2x192xf32>
    %554 = arith.addf %553, %552 : vector<2x192xf32>
    %555 = arith.divf %553, %554 : vector<2x192xf32>
    %556 = vector.extract_strided_slice %546 {offsets = [0, 192], sizes = [2, 64], strides = [1, 1]} : vector<2x256xf32> to vector<2x64xf32>
    %557 = math.tanh %556 : vector<2x64xf32>
    %558 = vector.extract_strided_slice %555 {offsets = [0, 0], sizes = [2, 64], strides = [1, 1]} : vector<2x192xf32> to vector<2x64xf32>
    %559 = vector.extract_strided_slice %555 {offsets = [0, 64], sizes = [2, 64], strides = [1, 1]} : vector<2x192xf32> to vector<2x64xf32>
    %560 = vector.extract_strided_slice %555 {offsets = [0, 128], sizes = [2, 64], strides = [1, 1]} : vector<2x192xf32> to vector<2x64xf32>
    %561 = arith.mulf %559, %523 : vector<2x64xf32>
    %562 = arith.mulf %558, %557 : vector<2x64xf32>
    %563 = arith.addf %561, %562 : vector<2x64xf32>
    %564 = math.tanh %563 : vector<2x64xf32>
    %565 = arith.mulf %560, %564 : vector<2x64xf32>
    %566 = vector.extract_strided_slice %549 {offsets = [0, 0], sizes = [2, 192], strides = [1, 1]} : vector<2x256xf32> to vector<2x192xf32>
    %567 = arith.negf %566 : vector<2x192xf32>
    %568 = math.exp %567 : vector<2x192xf32>
    %cst_127 = arith.constant 1.000000e+00 : f32
    %569 = vector.broadcast %cst_127 : f32 to vector<2x192xf32>
    %570 = arith.addf %569, %568 : vector<2x192xf32>
    %571 = arith.divf %569, %570 : vector<2x192xf32>
    %572 = vector.extract_strided_slice %549 {offsets = [0, 192], sizes = [2, 64], strides = [1, 1]} : vector<2x256xf32> to vector<2x64xf32>
    %573 = math.tanh %572 : vector<2x64xf32>
    %574 = vector.extract_strided_slice %571 {offsets = [0, 0], sizes = [2, 64], strides = [1, 1]} : vector<2x192xf32> to vector<2x64xf32>
    %575 = vector.extract_strided_slice %571 {offsets = [0, 64], sizes = [2, 64], strides = [1, 1]} : vector<2x192xf32> to vector<2x64xf32>
    %576 = vector.extract_strided_slice %571 {offsets = [0, 128], sizes = [2, 64], strides = [1, 1]} : vector<2x192xf32> to vector<2x64xf32>
    %577 = arith.mulf %575, %539 : vector<2x64xf32>
    %578 = arith.mulf %574, %573 : vector<2x64xf32>
    %579 = arith.addf %577, %578 : vector<2x64xf32>
    %580 = math.tanh %579 : vector<2x64xf32>
    %581 = arith.mulf %576, %580 : vector<2x64xf32>
    %c10_128 = arith.constant 10 : index
    %c0_129 = arith.constant 0 : index
    %582 = vector.load %arg13[%c10_128, %c0_129] : memref<16x128xf32, #tpu.memory_space<vmem>>, vector<2x64xf32>
    tpu.vector_store %arg13[%c10_128, %c0_129], %565 {strides = array<i32>} : memref<16x128xf32, #tpu.memory_space<vmem>>, vector<2x64xf32>,
    %c4_130 = arith.constant 4 : index
    %c64_131 = arith.constant 64 : index
    %583 = vector.load %arg13[%c4_130, %c64_131] : memref<16x128xf32, #tpu.memory_space<vmem>>, vector<2x64xf32>
    tpu.vector_store %arg13[%c4_130, %c64_131], %581 {strides = array<i32>} : memref<16x128xf32, #tpu.memory_space<vmem>>, vector<2x64xf32>,
    %cst_132 = arith.constant dense<0.000000e+00> : vector<2x256xf32>
    %584 = tpu.matmul %565, %338, %cst_132 {dimension_numbers = #tpu.dot_dimension_numbers<[1], [0], [0], [1], [0, 0, 1, 1], [], []>} : vector<2x64xf32>, vector<64x256xf32>, vector<2x256xf32> -> vector<2x256xf32>
    %585 = vector.extract_strided_slice %337 {offsets = [12, 0], sizes = [2, 256], strides = [1, 1]} : vector<16x512xf32> to vector<2x256xf32>
    %586 = arith.addf %584, %585 : vector<2x256xf32>
    %cst_133 = arith.constant dense<0.000000e+00> : vector<2x256xf32>
    %587 = tpu.matmul %581, %339, %cst_133 {dimension_numbers = #tpu.dot_dimension_numbers<[1], [0], [0], [1], [0, 0, 1, 1], [], []>} : vector<2x64xf32>, vector<64x256xf32>, vector<2x256xf32> -> vector<2x256xf32>
    %588 = vector.extract_strided_slice %337 {offsets = [2, 256], sizes = [2, 256], strides = [1, 1]} : vector<16x512xf32> to vector<2x256xf32>
    %589 = arith.addf %587, %588 : vector<2x256xf32>
    %590 = vector.extract_strided_slice %586 {offsets = [0, 0], sizes = [2, 192], strides = [1, 1]} : vector<2x256xf32> to vector<2x192xf32>
    %591 = arith.negf %590 : vector<2x192xf32>
    %592 = math.exp %591 : vector<2x192xf32>
    %cst_134 = arith.constant 1.000000e+00 : f32
    %593 = vector.broadcast %cst_134 : f32 to vector<2x192xf32>
    %594 = arith.addf %593, %592 : vector<2x192xf32>
    %595 = arith.divf %593, %594 : vector<2x192xf32>
    %596 = vector.extract_strided_slice %586 {offsets = [0, 192], sizes = [2, 64], strides = [1, 1]} : vector<2x256xf32> to vector<2x64xf32>
    %597 = math.tanh %596 : vector<2x64xf32>
    %598 = vector.extract_strided_slice %595 {offsets = [0, 0], sizes = [2, 64], strides = [1, 1]} : vector<2x192xf32> to vector<2x64xf32>
    %599 = vector.extract_strided_slice %595 {offsets = [0, 64], sizes = [2, 64], strides = [1, 1]} : vector<2x192xf32> to vector<2x64xf32>
    %600 = vector.extract_strided_slice %595 {offsets = [0, 128], sizes = [2, 64], strides = [1, 1]} : vector<2x192xf32> to vector<2x64xf32>
    %601 = arith.mulf %599, %563 : vector<2x64xf32>
    %602 = arith.mulf %598, %597 : vector<2x64xf32>
    %603 = arith.addf %601, %602 : vector<2x64xf32>
    %604 = math.tanh %603 : vector<2x64xf32>
    %605 = arith.mulf %600, %604 : vector<2x64xf32>
    %606 = vector.extract_strided_slice %589 {offsets = [0, 0], sizes = [2, 192], strides = [1, 1]} : vector<2x256xf32> to vector<2x192xf32>
    %607 = arith.negf %606 : vector<2x192xf32>
    %608 = math.exp %607 : vector<2x192xf32>
    %cst_135 = arith.constant 1.000000e+00 : f32
    %609 = vector.broadcast %cst_135 : f32 to vector<2x192xf32>
    %610 = arith.addf %609, %608 : vector<2x192xf32>
    %611 = arith.divf %609, %610 : vector<2x192xf32>
    %612 = vector.extract_strided_slice %589 {offsets = [0, 192], sizes = [2, 64], strides = [1, 1]} : vector<2x256xf32> to vector<2x64xf32>
    %613 = math.tanh %612 : vector<2x64xf32>
    %614 = vector.extract_strided_slice %611 {offsets = [0, 0], sizes = [2, 64], strides = [1, 1]} : vector<2x192xf32> to vector<2x64xf32>
    %615 = vector.extract_strided_slice %611 {offsets = [0, 64], sizes = [2, 64], strides = [1, 1]} : vector<2x192xf32> to vector<2x64xf32>
    %616 = vector.extract_strided_slice %611 {offsets = [0, 128], sizes = [2, 64], strides = [1, 1]} : vector<2x192xf32> to vector<2x64xf32>
    %617 = arith.mulf %615, %579 : vector<2x64xf32>
    %618 = arith.mulf %614, %613 : vector<2x64xf32>
    %619 = arith.addf %617, %618 : vector<2x64xf32>
    %620 = math.tanh %619 : vector<2x64xf32>
    %621 = arith.mulf %616, %620 : vector<2x64xf32>
    %c12_136 = arith.constant 12 : index
    %c0_137 = arith.constant 0 : index
    %622 = vector.load %arg13[%c12_136, %c0_137] : memref<16x128xf32, #tpu.memory_space<vmem>>, vector<2x64xf32>
    tpu.vector_store %arg13[%c12_136, %c0_137], %605 {strides = array<i32>} : memref<16x128xf32, #tpu.memory_space<vmem>>, vector<2x64xf32>,
    %c2_138 = arith.constant 2 : index
    %c64_139 = arith.constant 64 : index
    %623 = vector.load %arg13[%c2_138, %c64_139] : memref<16x128xf32, #tpu.memory_space<vmem>>, vector<2x64xf32>
    tpu.vector_store %arg13[%c2_138, %c64_139], %621 {strides = array<i32>} : memref<16x128xf32, #tpu.memory_space<vmem>>, vector<2x64xf32>,
    %cst_140 = arith.constant dense<0.000000e+00> : vector<2x256xf32>
    %624 = tpu.matmul %605, %338, %cst_140 {dimension_numbers = #tpu.dot_dimension_numbers<[1], [0], [0], [1], [0, 0, 1, 1], [], []>} : vector<2x64xf32>, vector<64x256xf32>, vector<2x256xf32> -> vector<2x256xf32>
    %625 = vector.extract_strided_slice %337 {offsets = [14, 0], sizes = [2, 256], strides = [1, 1]} : vector<16x512xf32> to vector<2x256xf32>
    %626 = arith.addf %624, %625 : vector<2x256xf32>
    %cst_141 = arith.constant dense<0.000000e+00> : vector<2x256xf32>
    %627 = tpu.matmul %621, %339, %cst_141 {dimension_numbers = #tpu.dot_dimension_numbers<[1], [0], [0], [1], [0, 0, 1, 1], [], []>} : vector<2x64xf32>, vector<64x256xf32>, vector<2x256xf32> -> vector<2x256xf32>
    %628 = vector.extract_strided_slice %337 {offsets = [0, 256], sizes = [2, 256], strides = [1, 1]} : vector<16x512xf32> to vector<2x256xf32>
    %629 = arith.addf %627, %628 : vector<2x256xf32>
    %630 = vector.extract_strided_slice %626 {offsets = [0, 0], sizes = [2, 192], strides = [1, 1]} : vector<2x256xf32> to vector<2x192xf32>
    %631 = arith.negf %630 : vector<2x192xf32>
    %632 = math.exp %631 : vector<2x192xf32>
    %cst_142 = arith.constant 1.000000e+00 : f32
    %633 = vector.broadcast %cst_142 : f32 to vector<2x192xf32>
    %634 = arith.addf %633, %632 : vector<2x192xf32>
    %635 = arith.divf %633, %634 : vector<2x192xf32>
    %636 = vector.extract_strided_slice %626 {offsets = [0, 192], sizes = [2, 64], strides = [1, 1]} : vector<2x256xf32> to vector<2x64xf32>
    %637 = math.tanh %636 : vector<2x64xf32>
    %638 = vector.extract_strided_slice %635 {offsets = [0, 0], sizes = [2, 64], strides = [1, 1]} : vector<2x192xf32> to vector<2x64xf32>
    %639 = vector.extract_strided_slice %635 {offsets = [0, 64], sizes = [2, 64], strides = [1, 1]} : vector<2x192xf32> to vector<2x64xf32>
    %640 = vector.extract_strided_slice %635 {offsets = [0, 128], sizes = [2, 64], strides = [1, 1]} : vector<2x192xf32> to vector<2x64xf32>
    %641 = arith.mulf %639, %603 : vector<2x64xf32>
    %642 = arith.mulf %638, %637 : vector<2x64xf32>
    %643 = arith.addf %641, %642 : vector<2x64xf32>
    %644 = math.tanh %643 : vector<2x64xf32>
    %645 = arith.mulf %640, %644 : vector<2x64xf32>
    %646 = vector.extract_strided_slice %629 {offsets = [0, 0], sizes = [2, 192], strides = [1, 1]} : vector<2x256xf32> to vector<2x192xf32>
    %647 = arith.negf %646 : vector<2x192xf32>
    %648 = math.exp %647 : vector<2x192xf32>
    %cst_143 = arith.constant 1.000000e+00 : f32
    %649 = vector.broadcast %cst_143 : f32 to vector<2x192xf32>
    %650 = arith.addf %649, %648 : vector<2x192xf32>
    %651 = arith.divf %649, %650 : vector<2x192xf32>
    %652 = vector.extract_strided_slice %629 {offsets = [0, 192], sizes = [2, 64], strides = [1, 1]} : vector<2x256xf32> to vector<2x64xf32>
    %653 = math.tanh %652 : vector<2x64xf32>
    %654 = vector.extract_strided_slice %651 {offsets = [0, 0], sizes = [2, 64], strides = [1, 1]} : vector<2x192xf32> to vector<2x64xf32>
    %655 = vector.extract_strided_slice %651 {offsets = [0, 64], sizes = [2, 64], strides = [1, 1]} : vector<2x192xf32> to vector<2x64xf32>
    %656 = vector.extract_strided_slice %651 {offsets = [0, 128], sizes = [2, 64], strides = [1, 1]} : vector<2x192xf32> to vector<2x64xf32>
    %657 = arith.mulf %655, %619 : vector<2x64xf32>
    %658 = arith.mulf %654, %653 : vector<2x64xf32>
    %659 = arith.addf %657, %658 : vector<2x64xf32>
    %660 = math.tanh %659 : vector<2x64xf32>
    %661 = arith.mulf %656, %660 : vector<2x64xf32>
    %c14_144 = arith.constant 14 : index
    %c0_145 = arith.constant 0 : index
    %662 = vector.load %arg13[%c14_144, %c0_145] : memref<16x128xf32, #tpu.memory_space<vmem>>, vector<2x64xf32>
    tpu.vector_store %arg13[%c14_144, %c0_145], %645 {strides = array<i32>} : memref<16x128xf32, #tpu.memory_space<vmem>>, vector<2x64xf32>,
    %c0_146 = arith.constant 0 : index
    %c64_147 = arith.constant 64 : index
    %663 = vector.load %arg13[%c0_146, %c64_147] : memref<16x128xf32, #tpu.memory_space<vmem>>, vector<2x64xf32>
    tpu.vector_store %arg13[%c0_146, %c64_147], %661 {strides = array<i32>} : memref<16x128xf32, #tpu.memory_space<vmem>>, vector<2x64xf32>,
    %c0_148 = arith.constant 0 : index
    %c0_149 = arith.constant 0 : index
    %664 = vector.load %arg13[%c0_148, %c0_149] : memref<16x128xf32, #tpu.memory_space<vmem>>, vector<16x128xf32>
    %c0_150 = arith.constant 0 : index
    %c0_151 = arith.constant 0 : index
    %665 = vector.load %arg9[%c0_150, %c0_151] : memref<128x2xf32, #tpu.memory_space<vmem>>, vector<128x2xf32>
    %cst_152 = arith.constant dense<0.000000e+00> : vector<16x2xf32>
    %666 = tpu.matmul %664, %665, %cst_152 {dimension_numbers = #tpu.dot_dimension_numbers<[1], [0], [0], [1], [0, 0, 1, 1], [], []>} : vector<16x128xf32>, vector<128x2xf32>, vector<16x2xf32> -> vector<16x2xf32>
    %c0_153 = arith.constant 0 : index
    %c0_154 = arith.constant 0 : index
    %667 = vector.load %arg10[%c0_153, %c0_154] : memref<1x2xf32, #tpu.memory_space<vmem>>, vector<1x2xf32>
    %668 = vector.broadcast %667 : vector<1x2xf32> to vector<16x2xf32>
    %669 = arith.addf %666, %668 : vector<16x2xf32>
    %670 = arith.negf %669 : vector<16x2xf32>
    %671 = math.exp %670 : vector<16x2xf32>
    %cst_155 = arith.constant 1.000000e+00 : f32
    %672 = vector.broadcast %cst_155 : f32 to vector<16x2xf32>
    %673 = arith.addf %672, %671 : vector<16x2xf32>
    %674 = arith.divf %672, %673 : vector<16x2xf32>
    %c0_156 = arith.constant 0 : index
    %c0_157 = arith.constant 0 : index
    %675 = vector.load %arg11[%c0_156, %c0_157] : memref<16x2xf32, #tpu.memory_space<vmem>>, vector<16x2xf32>
    tpu.vector_store %arg11[%c0_156, %c0_157], %674 {strides = array<i32>} : memref<16x2xf32, #tpu.memory_space<vmem>>, vector<16x2xf32>,
    return
  }
}

</mosaic_0001>

<bundles_post_ra>
// kernel: decoder_rnn_forward.1
= control target key start
LH: loop header
LB: loop body
LE: loop exit
PB: predicated region body
PF: predicated region fallthrough
CT: control target
= control target key end

     0   :  { %16 = vsyncpa [#allocation5], 0  ;;  %s6955_s0 = inlined_call_operand.hbm [shape: f32[16,64], index: 0, kind: input, shape index: {}]   ;;  %s6956_s1 = inlined_call_operand.hbm [shape: f32[64,512], index: 1, kind: input, shape index: {}]   ;;  %s6957_s2 = inlined_call_operand.hbm [shape: f32[64,256], index: 2, kind: input, shape index: {}]   ;;  %s6958_s3 = inlined_call_operand.hbm [shape: f32[64,256], index: 3, kind: input, shape index: {}]   ;;  %s6959_s4 = inlined_call_operand.hbm [shape: f32[1,512], index: 4, kind: input, shape index: {}]   ;;  %s6960_s5 = inlined_call_operand.hbm [shape: f32[128,512], index: 5, kind: input, shape index: {}]   ;;  %s6961_s6 = inlined_call_operand.hbm [shape: f32[64,256], index: 6, kind: input, shape index: {}]   ;;  %s6962_s7 = inlined_call_operand.hbm [shape: f32[64,256], index: 7, kind: input, shape index: {}]   ;;  %s6963_s8 = inlined_call_operand.hbm [shape: f32[1,512], index: 8, kind: input, shape index: {}]   ;;  %s6964_s9 = inlined_call_operand.hbm [shape: f32[128,2], index: 9, kind: input, shape index: {}]   ;;  %s6965_s10 = inlined_call_operand.hbm [shape: f32[1,2], index: 10, kind: input, shape index: {}]   ;;  %s6966_s11 = inlined_call_operand.hbm [shape: f32[16,2], index: 11, kind: output, shape index: {}]  }
   0x1   :  { %17 = vsyncpa [#allocation8], 0 }
   0x2   :  { %18 = vsyncpa [#allocation11], 0 }
   0x3   :  { %19 = vsyncpa [#allocation14], 0 }
   0x4   :  { %20 = vsyncpa [#allocation17], 0 }
   0x5   :  { %21 = vsyncpa [#allocation20], 0 }
   0x6   :  { %22 = vsyncpa [#allocation6], 0  ;;  %s5839_s17 = smov [#allocation7]   ;;  %s5561_s21 = scalar_lea.hbm %s6956_s1, 4096 }
   0x7   :  { %s40_s18 = sshll.u32 %s5839_s17, 4  ;;  %p5562_p0 = scmp.ne.s32.totalorder %s6956_s1, %s5561_s21  ;;  %s41_s18 = int_to_ptr.vmem [resolvable:$true] %s40_s18 }
   0x8   :  { %p5565_p1 = scmp.lt.u32.totalorder %s5561_s21, %s6956_s1 }
   0xa   :  { %p5567_p2 = pnand %p5565_p1, %p5562_p0 }
   0xc   :  { %5570 = shalt.err (!%p5567_p2)
}
   0xd   :  { %s5571_s26 = scalar_lea.vmem %s41_s18, 4096  ;;  %p5576_p4 = scmp.lt.s32.totalorder %s41_s18, %s41_s18 }
   0xe   :  { %p5572_p3 = scmp.ne.s32.totalorder %s41_s18, %s5571_s26  ;;  %p5577_p5 = scmp.lt.s32.totalorder %s5571_s26, %s5571_s26 }
  0x10   :  { %p5578_p6 = por %p5577_p5, %p5576_p4 }
  0x12   :  { %p5579_p7 = pnand %p5578_p6, %p5572_p3 }
  0x14   :  { %5582 = shalt.err (!%p5579_p7)
}
  0x15   :  { %s5840_s27 = smov 512   ;;  %s5841_s28 = smov 32  }
  0x16   :  { %46 = dma.hbm_to_vmem [thread:$0]  %s6956_s1, 4096, %s41_s18, [#allocation8], %s5840_s27, %s5840_s27, %s5841_s28  }
  0x17   :  { %s5842_s12 = smov [#allocation10]   ;;  %s5843_s14 = smov [#allocation13]  }
  0x18   :  { %s64_s13 = sshll.u32 %s5842_s12, 4  ;;  %s86_s15 = sshll.u32 %s5843_s14, 4  ;;  %s65_s13 = int_to_ptr.vmem [resolvable:$true] %s64_s13  ;;  %s87_s15 = int_to_ptr.vmem [resolvable:$true] %s86_s15 }
  0x19   :  { %s5583_s19 = scalar_lea.hbm %s6958_s3, 2048 }
  0x1a   :  { %p5584_p8 = scmp.ne.s32.totalorder %s6958_s3, %s5583_s19  ;;  %p5587_p9 = scmp.lt.u32.totalorder %s5583_s19, %s6958_s3 }
  0x1c   :  { %p5589_p10 = pnand %p5587_p9, %p5584_p8 }
  0x1e   :  { %5592 = shalt.err (!%p5589_p10)
}
  0x1f   :  { %s5593_s1 = scalar_lea.vmem %s65_s13, 2048  ;;  %p5598_p12 = scmp.lt.s32.totalorder %s65_s13, %s65_s13 }
  0x20   :  { %p5594_p11 = scmp.ne.s32.totalorder %s65_s13, %s5593_s1  ;;  %p5599_p13 = scmp.lt.s32.totalorder %s5593_s1, %s5593_s1 }
  0x22   :  { %p5600_p0 = por %p5599_p13, %p5598_p12 }
  0x24   :  { %p5601_p1 = pnand %p5600_p0, %p5594_p11 }
  0x26   :  { %5604 = shalt.err (!%p5601_p1)
}
  0x27   :  { %s5844_s18 = smov 256   ;;  %s5845_s24 = smov 16  }
  0x28   :  { %70 = dma.hbm_to_vmem [thread:$0]  %s6958_s3, 2048, %s65_s13, [#allocation11], %s5844_s18, %s5844_s18, %s5845_s24  }
  0x29   :  { %s5605_s12 = scalar_lea.hbm %s6960_s5, 8192 }
  0x2a   :  { %p5606_p2 = scmp.ne.s32.totalorder %s6960_s5, %s5605_s12  ;;  %p5609_p3 = scmp.lt.u32.totalorder %s5605_s12, %s6960_s5 }
  0x2c   :  { %p5611_p4 = pnand %p5609_p3, %p5606_p2 }
  0x2e   :  { %5614 = shalt.err (!%p5611_p4)
}
  0x2f   :  { %s5615_s20 = scalar_lea.vmem %s87_s15, 8192  ;;  %p5620_p6 = scmp.lt.s32.totalorder %s87_s15, %s87_s15 }
  0x30   :  { %p5616_p5 = scmp.ne.s32.totalorder %s87_s15, %s5615_s20  ;;  %p5621_p7 = scmp.lt.s32.totalorder %s5615_s20, %s5615_s20 }
  0x32   :  { %p5622_p8 = por %p5621_p7, %p5620_p6 }
  0x34   :  { %p5623_p9 = pnand %p5622_p8, %p5616_p5 }
  0x36   :  { %5626 = shalt.err (!%p5623_p9)
}
  0x37   :  { %92 = dma.hbm_to_vmem [thread:$0]  %s6960_s5, 8192, %s87_s15, [#allocation14], %s5840_s27, %s5840_s27, %s5841_s28  }
  0x38   :  { %s5846_s21 = smov [#allocation16]   ;;  %s5627_s25 = scalar_lea.hbm %s6962_s7, 2048 }
  0x39   :  { %s110_s22 = sshll.u32 %s5846_s21, 4  ;;  %p5628_p10 = scmp.ne.s32.totalorder %s6962_s7, %s5627_s25  ;;  %s111_s22 = int_to_ptr.vmem [resolvable:$true] %s110_s22 }
  0x3a   :  { %p5631_p11 = scmp.lt.u32.totalorder %s5627_s25, %s6962_s7 }
  0x3c   :  { %p5633_p12 = pnand %p5631_p11, %p5628_p10 }
  0x3e   :  { %5636 = shalt.err (!%p5633_p12)
}
  0x3f   :  { %s5637_s14 = scalar_lea.vmem %s111_s22, 2048  ;;  %p5642_p0 = scmp.lt.s32.totalorder %s111_s22, %s111_s22 }
  0x40   :  { %p5638_p13 = scmp.ne.s32.totalorder %s111_s22, %s5637_s14  ;;  %p5643_p1 = scmp.lt.s32.totalorder %s5637_s14, %s5637_s14 }
  0x42   :  { %p5644_p2 = por %p5643_p1, %p5642_p0 }
  0x44   :  { %p5645_p3 = pnand %p5644_p2, %p5638_p13 }
  0x46   :  { %5648 = shalt.err (!%p5645_p3)
}
  0x47   :  { %116 = dma.hbm_to_vmem [thread:$0]  %s6962_s7, 2048, %s111_s22, [#allocation17], %s5844_s18, %s5844_s18, %s5845_s24  }
  0x48   :  { %s5847_s28 = smov [#allocation19]   ;;  %s5848_s16 = smov [#allocation4]  }
  0x49   :  { %s132_s15 = sshll.u32 %s5847_s28, 4  ;;  %s28_s17 = sshll.u32 %s5848_s16, 4  ;;  %s133_s15 = int_to_ptr.vmem [resolvable:$true] %s132_s15  ;;  %s5979_s17 = int_to_ptr.vmem [resolvable:$true] %s28_s17 }
  0x4a   :  { %s5649_s3 = scalar_lea.hbm %s6964_s9, 2048 }
  0x4b   :  { %p5650_p4 = scmp.ne.s32.totalorder %s6964_s9, %s5649_s3  ;;  %p5653_p5 = scmp.lt.u32.totalorder %s5649_s3, %s6964_s9 }
  0x4d   :  { %p5655_p6 = pnand %p5653_p5, %p5650_p4 }
  0x4f   :  { %5658 = shalt.err (!%p5655_p6)
}
  0x50   :  { %s5659_s7 = scalar_lea.vmem %s133_s15, 2048  ;;  %p5664_p8 = scmp.lt.s32.totalorder %s133_s15, %s133_s15 }
  0x51   :  { %p5660_p7 = scmp.ne.s32.totalorder %s133_s15, %s5659_s7  ;;  %p5665_p9 = scmp.lt.s32.totalorder %s5659_s7, %s5659_s7 }
  0x53   :  { %p5666_p10 = por %p5665_p9, %p5664_p8 }
  0x55   :  { %p5667_p11 = pnand %p5666_p10, %p5660_p7 }
  0x57   :  { %5670 = shalt.err (!%p5667_p11)
}
  0x58   :  { %s5849_s22 = smov 128   ;;  %s5850_s25 = smov 8  }
  0x59   :  { %138 = dma.hbm_to_vmem [thread:$0]  %s6964_s9, 2048, %s133_s15, [#allocation20], %s5849_s22, %s5849_s22, %s5850_s25  }
  0x5a   :  { %s5671_s14 = scalar_lea.hbm %s6955_s0, 256 }
  0x5b   :  { %p5672_p12 = scmp.ne.s32.totalorder %s6955_s0, %s5671_s14  ;;  %p5675_p13 = scmp.lt.u32.totalorder %s5671_s14, %s6955_s0 }
  0x5d   :  { %p5677_p0 = pnand %p5675_p13, %p5672_p12 }
  0x5f   :  { %5680 = shalt.err (!%p5677_p0)
}
  0x60   :  { %s5681_s19 = scalar_lea.vmem %s5979_s17, 256  ;;  %p5686_p2 = scmp.lt.s32.totalorder %s5979_s17, %s5979_s17 }
  0x61   :  { %p5682_p1 = scmp.ne.s32.totalorder %s5979_s17, %s5681_s19  ;;  %p5687_p3 = scmp.lt.s32.totalorder %s5681_s19, %s5681_s19 }
  0x63   :  { %p5688_p4 = por %p5687_p3, %p5686_p2 }
  0x65   :  { %p5689_p5 = pnand %p5688_p4, %p5682_p1 }
  0x67   :  { %5692 = shalt.err (!%p5689_p5)
}
  0x68   :  { %34 = dma.hbm_to_vmem [thread:$0]  %s6955_s0, 256, %s5979_s17, [#allocation5], %s5849_s22, %s5849_s22, %s5850_s25  }
  0x69   :  { %s5851_s20 = smov [#allocation9]   ;;  %s5852_s13 = smov [#allocation12]  }
  0x6a   :  { %s52_s3 = sshll.u32 %s5851_s20, 4  ;;  %s77_s21 = sshll.u32 %s5852_s13, 4  ;;  %s53_s3 = int_to_ptr.vmem [resolvable:$true] %s52_s3  ;;  %s78_s21 = int_to_ptr.vmem [resolvable:$true] %s77_s21 }
  0x6b   :  { %s5693_s7 = scalar_lea.hbm %s6957_s2, 2048 }
  0x6c   :  { %p5694_p6 = scmp.ne.s32.totalorder %s6957_s2, %s5693_s7  ;;  %p5697_p7 = scmp.lt.u32.totalorder %s5693_s7, %s6957_s2 }
  0x6e   :  { %p5699_p8 = pnand %p5697_p7, %p5694_p6 }
  0x70   :  { %5702 = shalt.err (!%p5699_p8)
}
  0x71   :  { %s5703_s0 = scalar_lea.vmem %s53_s3, 2048  ;;  %p5708_p10 = scmp.lt.s32.totalorder %s53_s3, %s53_s3 }
  0x72   :  { %p5704_p9 = scmp.ne.s32.totalorder %s53_s3, %s5703_s0  ;;  %p5709_p11 = scmp.lt.s32.totalorder %s5703_s0, %s5703_s0 }
  0x74   :  { %p5710_p12 = por %p5709_p11, %p5708_p10 }
  0x76   :  { %p5711_p13 = pnand %p5710_p12, %p5704_p9 }
  0x78   :  { %5714 = shalt.err (!%p5711_p13)
}
  0x79   :  { %58 = dma.hbm_to_vmem [thread:$0]  %s6957_s2, 2048, %s53_s3, [#allocation8], %s5844_s18, %s5844_s18, %s5845_s24  }
  0x7a   :  { %s5715_s28 = scalar_lea.hbm %s6959_s4, 64 }
  0x7b   :  { %p5716_p0 = scmp.ne.s32.totalorder %s6959_s4, %s5715_s28  ;;  %p5719_p1 = scmp.lt.u32.totalorder %s5715_s28, %s6959_s4 }
  0x7d   :  { %p5721_p2 = pnand %p5719_p1, %p5716_p0 }
  0x7f   :  { %5724 = shalt.err (!%p5721_p2)
}
  0x80   :  { %s5725_s20 = scalar_lea.vmem %s78_s21, 64  ;;  %p5730_p4 = scmp.lt.s32.totalorder %s78_s21, %s78_s21 }
  0x81   :  { %p5726_p3 = scmp.ne.s32.totalorder %s78_s21, %s5725_s20  ;;  %p5731_p5 = scmp.lt.s32.totalorder %s5725_s20, %s5725_s20 }
  0x83   :  { %p5732_p6 = por %p5731_p5, %p5730_p4 }
  0x85   :  { %p5733_p7 = pnand %p5732_p6, %p5726_p3 }
  0x87   :  { %5736 = shalt.err (!%p5733_p7)
}
  0x88   :  { %80 = dma.hbm_to_vmem [thread:$0]  %s6959_s4, 64, %s78_s21, [#allocation11]  }
  0x89   :  { %s5853_s13 = smov [#allocation15]   ;;  %s5854_s1 = smov [#allocation18]  }
  0x8a   :  { %s98_s23 = sshll.u32 %s5853_s13, 4  ;;  %s123_s7 = sshll.u32 %s5854_s1, 4  ;;  %s99_s23 = int_to_ptr.vmem [resolvable:$true] %s98_s23  ;;  %s124_s7 = int_to_ptr.vmem [resolvable:$true] %s123_s7 }
  0x8b   :  { %s5737_s30 = scalar_lea.hbm %s6961_s6, 2048 }
  0x8c   :  { %p5738_p8 = scmp.ne.s32.totalorder %s6961_s6, %s5737_s30  ;;  %p5741_p9 = scmp.lt.u32.totalorder %s5737_s30, %s6961_s6 }
  0x8e   :  { %p5743_p10 = pnand %p5741_p9, %p5738_p8 }
  0x90   :  { %5746 = shalt.err (!%p5743_p10)
}
  0x91   :  { %s5747_s4 = scalar_lea.vmem %s99_s23, 2048  ;;  %p5752_p12 = scmp.lt.s32.totalorder %s99_s23, %s99_s23 }
  0x92   :  { %p5748_p11 = scmp.ne.s32.totalorder %s99_s23, %s5747_s4  ;;  %p5753_p13 = scmp.lt.s32.totalorder %s5747_s4, %s5747_s4 }
  0x94   :  { %p5754_p0 = por %p5753_p13, %p5752_p12 }
  0x96   :  { %p5755_p1 = pnand %p5754_p0, %p5748_p11 }
  0x98   :  { %5758 = shalt.err (!%p5755_p1)
}
  0x99   :  { %104 = dma.hbm_to_vmem [thread:$0]  %s6961_s6, 2048, %s99_s23, [#allocation14], %s5844_s18, %s5844_s18, %s5845_s24  }
  0x9a   :  { %s5759_s16 = scalar_lea.hbm %s6963_s8, 64 }
  0x9b   :  { %p5760_p2 = scmp.ne.s32.totalorder %s6963_s8, %s5759_s16  ;;  %p5763_p3 = scmp.lt.u32.totalorder %s5759_s16, %s6963_s8 }
  0x9d   :  { %p5765_p4 = pnand %p5763_p3, %p5760_p2 }
  0x9f   :  { %5768 = shalt.err (!%p5765_p4)
}
  0xa0   :  { %s5769_s2 = scalar_lea.vmem %s124_s7, 64  ;;  %p5774_p6 = scmp.lt.s32.totalorder %s124_s7, %s124_s7 }
  0xa1   :  { %p5770_p5 = scmp.ne.s32.totalorder %s124_s7, %s5769_s2  ;;  %p5775_p7 = scmp.lt.s32.totalorder %s5769_s2, %s5769_s2 }
  0xa3   :  { %p5776_p8 = por %p5775_p7, %p5774_p6 }
  0xa5   :  { %p5777_p9 = pnand %p5776_p8, %p5770_p5 }
  0xa7   :  { %5780 = shalt.err (!%p5777_p9)
}
  0xa8   :  { %126 = dma.hbm_to_vmem [thread:$0]  %s6963_s8, 64, %s124_s7, [#allocation17]  }
  0xa9   :  { %s5855_s24 = smov [#allocation21]   ;;  %s5781_s1 = scalar_lea.hbm %s6965_s10, 16 }
  0xaa   :  { %s145_s3 = sshll.u32 %s5855_s24, 4  ;;  %p5782_p10 = scmp.ne.s32.totalorder %s6965_s10, %s5781_s1  ;;  %s146_s3 = int_to_ptr.vmem [resolvable:$true] %s145_s3 }
  0xab   :  { %p5785_p11 = scmp.lt.u32.totalorder %s5781_s1, %s6965_s10 }
  0xad   :  { %p5787_p12 = pnand %p5785_p11, %p5782_p10 }
  0xaf   :  { %5790 = shalt.err (!%p5787_p12)
}
  0xb0   :  { %s5791_s0 = scalar_lea.vmem %s146_s3, 16  ;;  %s5795_s8 = scalar_lea.vmem %s146_s3, 32 }
  0xb1   :  { %p5792_p13 = scmp.ne.s32.totalorder %s146_s3, %s5791_s0  ;;  %p5796_p0 = scmp.lt.s32.totalorder %s146_s3, %s146_s3 }
  0xb2   :  { %p5797_p1 = scmp.lt.s32.totalorder %s5795_s8, %s5791_s0 }
  0xb4   :  { %p5798_p2 = por %p5797_p1, %p5796_p0 }
  0xb6   :  { %p5799_p3 = pnand %p5798_p2, %p5792_p13 }
  0xb8   :  { %5802 = shalt.err (!%p5799_p3)
}
  0xb9   :  { %148 = dma.hbm_to_vmem [thread:$0]  %s6965_s10, 16, %s146_s3, [#allocation20]  }
  0xba   :  { %5825 = dma.done.wait [#allocation5], 256  }
  0xbb   :  { %5826 = vsyncadd [#allocation5], 4294967040 }
  0xbc   :  { %5827 = dma.done.wait [#allocation8], 6144  }
  0xbd   :  { %5828 = vsyncadd [#allocation8], 4294961152 }
  0xbe   :  { %5829 = dma.done.wait [#allocation11], 2112  }
  0xbf   :  { %5830 = vsyncadd [#allocation11], 4294965184 }
  0xc0   :  { %5831 = dma.done.wait [#allocation14], 10240  }
  0xc1   :  { %5832 = vsyncadd [#allocation14], 4294957056 }
  0xc2   :  { %5833 = dma.done.wait [#allocation17], 2112  }
  0xc3   :  { %5834 = vsyncadd [#allocation17], 4294965184 }
  0xc4   :  { %5835 = dma.done.wait [#allocation20], 2064  }
  0xc5   :  { %5836 = vsyncadd [#allocation20], 4294965232  ;;  %v5856_v0 = vmov 0.0   ;;  %v185_v1 = vld [vmem:[#allocation7 + $0x8] sm:$0xff]  ;;  %v184_v3 = vld [vmem:[#allocation7] sm:$0xff]  ;;  %vm238_vm0 = vcmask 523264  }
  0xc6   :  { %309 = vmatprep.mubr.f32.mxu1 %v5856_v0  ;;  %498 = vmatprep.mubr.f32.mxu0 %v5856_v0  ;;  %v189_v2 = vld [vmem:[#allocation7 + $0x28] sm:$0xff]  ;;  %v188_v5 = vld [vmem:[#allocation7 + $0x20] sm:$0xff]  ;;  %v402_v7 = vld [vmem:[#allocation9 + $0x18] sm:$0xff]  ;;  %s5857_s10 = smov 64   ;;  %vm642_vm1 = vcmask 517120   ;;  %vm648_vm2 = vcmask 1041920  }
  0xc7   :  { %v4509_v4 = vpack.c.bf16 %v189_v2, %v185_v1  ;;  %v400_v6 = vld [vmem:[#allocation9 + $0x8] sm:$0xff]  ;;  %v4511_v8 = vpack.c.bf16 %v188_v5, %v184_v3  ;;  %v399_v10 = vld [vmem:[#allocation9] sm:$0xff]  ;;  %v401_v11 = vld [vmem:[#allocation9 + $0x10] sm:$0xff]  ;;  %s5858_s14 = smov [#allocation22]   ;;  %vm4332_vm3 = vcmask 15360  }
  0xc8   :  { %v6084_v9 = vpack.c.bf16 %v402_v7, %v400_v6  ;;  %v193_v12 = vld [vmem:[#allocation7 + $0x48] sm:$0xff]  ;;  %v6086_v13 = vpack.c.bf16 %v401_v11, %v399_v10  ;;  %v192_v15 = vld [vmem:[#allocation7 + $0x40] sm:$0xff]  ;;  %v406_v20 = vld [vmem:[#allocation9 + $0x38] sm:$0xff]  ;;  %s4340_s4 = sshll.u32 %s5858_s14, 4  ;;  %s4341_s4 = int_to_ptr.vmem [resolvable:$true] %s4340_s4 }
  0xc9   :  { %4510 = vmatprep.subr.bf16.mxu1 %v4509_v4  ;;  %v197_v14 = vld [vmem:[#allocation7 + $0x68] sm:$0xff]  ;;  %v196_v16 = vld [vmem:[#allocation7 + $0x60] sm:$0xff]  ;;  %v405_v23 = vld [vmem:[#allocation9 + $0x30] sm:$0xff]  ;;  %s5803_s21 = scalar_lea.vmem %s4341_s4, 256  ;;  %p5808_p5 = scmp.lt.s32.totalorder %s4341_s4, %s4341_s4 }
  0xca   :  { %4512 = vmatpush1.bf16.msra.mxu1 %v4511_v8  ;;  %4542 = vmatprep.subr.bf16.mxu0 %v6084_v9  ;;  %v4513_v17 = vpack.c.bf16 %v197_v14, %v193_v12  ;;  %v4515_v18 = vpack.c.bf16 %v196_v16, %v192_v15  ;;  %v404_v19 = vld [vmem:[#allocation9 + $0x28] sm:$0xff]  ;;  %v403_v21 = vld [vmem:[#allocation9 + $0x20] sm:$0xff]  ;;  %v410_v31 = vld [vmem:[#allocation9 + $0x58] sm:$0xff]  ;;  %p5804_p4 = scmp.ne.s32.totalorder %s4341_s4, %s5803_s21  ;;  %p5809_p6 = scmp.lt.s32.totalorder %s5803_s21, %s5803_s21 }
  0xcb   :  { %4544 = vmatpush1.bf16.msra.mxu0 %v6086_v13  ;;  %v6090_v22 = vpack.c.bf16 %v406_v20, %v404_v19  ;;  %v201_v24 = vld [vmem:[#allocation7 + $0x88] sm:$0xff]  ;;  %v6092_v26 = vpack.c.bf16 %v405_v23, %v403_v21  ;;  %v200_v28 = vld [vmem:[#allocation7 + $0x80] sm:$0xff]  ;;  %v409_v33 = vld [vmem:[#allocation9 + $0x50] sm:$0xff] }
  0xcc   :  { %v205_v25 = vld [vmem:[#allocation7 + $0xa8] sm:$0xff]  ;;  %4514 = vmatprep.subr.bf16.mxu1 %v4513_v17  ;;  %v204_v29 = vld [vmem:[#allocation7 + $0xa0] sm:$0xff]  ;;  %v414_v43 = vld [vmem:[#allocation9 + $0x78] sm:$0xff]  ;;  %p5810_p7 = por %p5809_p6, %p5808_p5 }
  0xcd   :  { %v4517_v27 = vpack.c.bf16 %v205_v25, %v201_v24  ;;  %v408_v30 = vld [vmem:[#allocation9 + $0x48] sm:$0xff]  ;;  %4546 = vmatprep.subr.bf16.mxu0 %v6090_v22  ;;  %v407_v32 = vld [vmem:[#allocation9 + $0x40] sm:$0xff]  ;;  %v4519_v34 = vpack.c.bf16 %v204_v29, %v200_v28  ;;  %v413_v46 = vld [vmem:[#allocation9 + $0x70] sm:$0xff] }
  0xce   :  { %4516 = vmatpush1.bf16.msra.mxu1 %v4515_v18  ;;  %v6095_v35 = vpack.c.bf16 %v410_v31, %v408_v30  ;;  %v209_v36 = vld [vmem:[#allocation7 + $0xc8] sm:$0xff]  ;;  %v208_v38 = vld [vmem:[#allocation7 + $0xc0] sm:$0xff]  ;;  %v6098_v39 = vpack.c.bf16 %v409_v33, %v407_v32  ;;  %v187_v47 = vld [vmem:[#allocation7 + $0x18] sm:$0xff]  ;;  %p5811_p8 = pnand %p5810_p7, %p5804_p4 }
  0xcf   :  { %v213_v37 = vld [vmem:[#allocation7 + $0xe8] sm:$0xff]  ;;  %4548 = vmatpush1.bf16.msra.mxu0 %v6092_v26  ;;  %4518 = vmatprep.subr.bf16.mxu1 %v4517_v27  ;;  %v212_v41 = vld [vmem:[#allocation7 + $0xe0] sm:$0xff]  ;;  %v191_v48 = vld [vmem:[#allocation7 + $0x38] sm:$0xff] }
  0xd0   :  { %v4521_v40 = vpack.c.bf16 %v213_v37, %v209_v36  ;;  %v412_v42 = vld [vmem:[#allocation9 + $0x68] sm:$0xff]  ;;  %4550 = vmatprep.subr.bf16.mxu0 %v6095_v35  ;;  %v411_v45 = vld [vmem:[#allocation9 + $0x60] sm:$0xff]  ;;  %v4523_v49 = vpack.c.bf16 %v212_v41, %v208_v38  ;;  %v4525_v51 = vpack.c.bf16 %v191_v48, %v187_v47  ;;  %v186_v52 = vld [vmem:[#allocation7 + $0x10] sm:$0xff] }
  0xd1   :  { %v6101_v44 = vpack.c.bf16 %v414_v43, %v412_v42  ;;  %v6104_v50 = vpack.c.bf16 %v413_v46, %v411_v45  ;;  %v190_v53 = vld [vmem:[#allocation7 + $0x30] sm:$0xff]  ;;  %v195_v54 = vld [vmem:[#allocation7 + $0x58] sm:$0xff]  ;;  %v416_v12 = vld [vmem:[#allocation10 + $0x8] sm:$0xff]  ;;  %v218_v42 = vlaneseq }
  0xd2   :  { %4520 = vmatpush1.bf16.msra.mxu1 %v4519_v34  ;;  %v199_v55 = vld [vmem:[#allocation7 + $0x78] sm:$0xff]  ;;  %v182_v56 = vld [vmem:[#allocation4] sm:$0xff]  ;;  %v4527_v57 = vpack.c.bf16 %v190_v53, %v186_v52  ;;  %v415_v17 = vld [vmem:[#allocation10] sm:$0xff] }
  0xd3   :  { %4552 = vmatpush1.bf16.msra.mxu0 %v6098_v39  ;;  %4522 = vmatprep.subr.bf16.mxu1 %v4521_v40  ;;  %v4529_v58 = vpack.c.bf16 %v199_v55, %v195_v54  ;;  %v194_v59 = vld [vmem:[#allocation7 + $0x50] sm:$0xff]  ;;  %v203_v61 = vld [vmem:[#allocation7 + $0x98] sm:$0xff]  ;;  %v420_v19 = vld [vmem:[#allocation10 + $0x28] sm:$0xff]  ;;  %v6162_v43 = vshrl.u32 %v218_v42, 7 }
  0xd4   :  { %4554 = vmatprep.subr.bf16.mxu0 %v6101_v44  ;;  %v198_v60 = vld [vmem:[#allocation7 + $0x70] sm:$0xff]  ;;  %v207_v62 = vld [vmem:[#allocation7 + $0xb8] sm:$0xff]  ;;  %v419_v24 = vld [vmem:[#allocation10 + $0x20] sm:$0xff] }
  0xd5   :  { %v4531_v63 = vpack.c.bf16 %v198_v60, %v194_v59  ;;  %v183_v1 = vld [vmem:[#allocation4 + $0x8] sm:$0xff]  ;;  %v4533_v2 = vpack.c.bf16 %v207_v62, %v203_v61  ;;  %v202_v3 = vld [vmem:[#allocation7 + $0x90] sm:$0xff]  ;;  %v424_v27 = vld [vmem:[#allocation10 + $0x48] sm:$0xff]  ;;  %v220_v45 = vsub.s32 0, %v6162_v43  ;;  %v224_v47 = vsub.s32 1, %v6162_v43 }
  0xd6   :  { %4524 = vmatpush1.bf16.msra.mxu1 %v4523_v49  ;;  %v206_v4 = vld [vmem:[#allocation7 + $0xb0] sm:$0xff]  ;;  %v211_v5 = vld [vmem:[#allocation7 + $0xd8] sm:$0xff]  ;;  %v423_v31 = vld [vmem:[#allocation10 + $0x40] sm:$0xff] }
  0xd7   :  { %4556 = vmatpush1.bf16.msra.mxu0 %v6104_v50  ;;  %4526 = vmatprep.subr.bf16.mxu1 %v4525_v51  ;;  %v215_v6 = vld [vmem:[#allocation7 + $0xf8] sm:$0xff]  ;;  %v4535_v7 = vpack.c.bf16 %v206_v4, %v202_v3  ;;  %v210_v10 = vld [vmem:[#allocation7 + $0xd0] sm:$0xff]  ;;  %v428_v33 = vld [vmem:[#allocation10 + $0x68] sm:$0xff] }
  0xd8   :  { %4574 = vmatprep.subr.bf16.mxu0 %v6084_v9  ;;  %v4537_v8 = vpack.c.bf16 %v215_v6, %v211_v5  ;;  %v214_v11 = vld [vmem:[#allocation7 + $0xf0] sm:$0xff]  ;;  %v418_v14 = vld [vmem:[#allocation10 + $0x18] sm:$0xff]  ;;  %v427_v38 = vld [vmem:[#allocation10 + $0x60] sm:$0xff] }
  0xd9   :  { %4357 = vmatmul.mubr.msk.f32.vlgmr.msra.gmra.mrb[0].mxu1 %vm238_vm0, %v182_v56  ;;  %v4539_v15 = vpack.c.bf16 %v214_v11, %v210_v10  ;;  %v6119_v16 = vpack.c.bf16 %v418_v14, %v416_v12  ;;  %v417_v18 = vld [vmem:[#allocation10 + $0x10] sm:$0xff]  ;;  %v422_v20 = vld [vmem:[#allocation10 + $0x38] sm:$0xff]  ;;  %v216_v46 = vld [vmem:[#allocation12] sm:$0xf] }
  0xda   :  { %4528 = vmatpush1.bf16.msra.mxu1 %v4527_v57  ;;  %499 = vmatmul.mubr.f32.vlgmr.msra.gmra.mrb[0].mxu0 %v5856_v0  ;;  %v6123_v21 = vpack.c.bf16 %v417_v18, %v415_v17  ;;  %v6126_v23 = vpack.c.bf16 %v422_v20, %v420_v19  ;;  %v421_v25 = vld [vmem:[#allocation10 + $0x30] sm:$0xff]  ;;  %v426_v28 = vld [vmem:[#allocation10 + $0x58] sm:$0xff]  ;;  %v221_v48 = vrot.slane %v216_v46, %v220_v45 }
  0xdb   :  { %4530 = vmatprep.subr.bf16.mxu1 %v4529_v58  ;;  %315 = vmatprep.mubr.f32.mxu1 %v5856_v0  ;;  %v6132_v29 = vpack.c.bf16 %v421_v25, %v419_v24  ;;  %v6136_v30 = vpack.c.bf16 %v426_v28, %v424_v27  ;;  %v425_v32 = vld [vmem:[#allocation10 + $0x50] sm:$0xff]  ;;  %v430_v34 = vld [vmem:[#allocation10 + $0x78] sm:$0xff]  ;;  %v225_v49 = vrot.slane %v216_v46, %v224_v47 }
  0xdc   :  { %4576 = vmatpush1.bf16.msra.mxu0 %v6086_v13  ;;  %723 = vmatprep.mubr.f32.mxu0 %v5856_v0  ;;  %v6140_v36 = vpack.c.bf16 %v425_v32, %v423_v31  ;;  %v6144_v37 = vpack.c.bf16 %v430_v34, %v428_v33  ;;  %v429_v40 = vld [vmem:[#allocation10 + $0x70] sm:$0xff] }
  0xdd   :  { %4358 = vmatmul.mubr.msk.f32.gmra.mrb[2].mxu1 %vm238_vm0, %v183_v1  ;;  %4578 = vmatprep.subr.bf16.mxu0 %v6090_v22  ;;  %v6147_v41 = vpack.c.bf16 %v429_v40, %v427_v38 }
  0xde   :  { %4532 = vmatpush1.bf16.msra.mxu1 %v4531_v63  ;;  %386 = vmatprep.mubr.f32.mxu1 %v5856_v0  ;;  %v228_v63 = vsub.s32 2, %v6162_v43 }
  0xdf   :  { %4534 = vmatprep.subr.bf16.mxu1 %v4533_v2 }
  0xe0   :  { %4580 = vmatpush1.bf16.msra.mxu0 %v6092_v26  ;;  %v229_v2 = vrot.slane %v216_v46, %v228_v63 }
  0xe1   :  { %4582 = vmatprep.subr.bf16.mxu0 %v6095_v35 }
  0xe2   :  { %4536 = vmatpush1.bf16.msra.mxu1 %v4535_v7 }
  0xe3   :  { %4538 = vmatprep.subr.bf16.mxu1 %v4537_v8 }
  0xe4   :  { %4584 = vmatpush1.bf16.msra.mxu0 %v6098_v39 }
  0xe5   :  { %4586 = vmatprep.subr.bf16.mxu0 %v6101_v44 }
  0xe6   :  { %4540 = vmatpush1.bf16.msra.mxu1 %v4539_v15 }
  0xe7   :  { %4558 = vmatprep.subr.bf16.mxu1 %v6119_v16 }
  0xe8   :  { %4588 = vmatpush1.bf16.msra.mxu0 %v6104_v50 }
  0xe9   :  { %4359 = vmatmul.mubr.msk.f32.vlgmr.msra.gmra.mrb[4].mxu1 %vm238_vm0, %v182_v56  ;;  %4606 = vmatprep.subr.bf16.mxu0 %v6084_v9 }
  0xea   :  { %4560 = vmatpush1.bf16.msra.mxu1 %v6123_v21  ;;  %392 = vmatprep.mubr.f32.mxu1 %v5856_v0 }
  0xeb   :  { %4562 = vmatprep.subr.bf16.mxu1 %v6126_v23 }
  0xed   :  { %4360 = vmatmul.mubr.msk.f32.gmra.mrb[6].mxu1 %vm238_vm0, %v183_v1  ;;  %v232_v1 = vsub.s32 3, %v6162_v43 }
  0xee   :  { %4564 = vmatpush1.bf16.msra.mxu1 %v6132_v29  ;;  %575 = vmatprep.mubr.f32.mxu1 %v5856_v0 }
  0xef   :  { %4566 = vmatprep.subr.bf16.mxu1 %v6136_v30  ;;  %v233_v3 = vrot.slane %v216_v46, %v232_v1 }
  0xf2   :  { %4568 = vmatpush1.bf16.msra.mxu1 %v6140_v36 }
  0xf3   :  { %4570 = vmatprep.subr.bf16.mxu1 %v6144_v37 }
  0xf6   :  { %4572 = vmatpush1.bf16.msra.mxu1 %v6147_v41 }
  0xf7   :  { %4590 = vmatprep.subr.bf16.mxu1 %v6119_v16 }
  0xf9   :  { %576 = vmatmul.mubr.f32.vlgmr.msra.gmra.mrb[8].mxu1 %v5856_v0 }
  0xfa   :  { %4592 = vmatpush1.bf16.msra.mxu1 %v6123_v21  ;;  %800 = vmatprep.mubr.f32.mxu1 %v5856_v0 }
  0xfb   :  { %4594 = vmatprep.subr.bf16.mxu1 %v6126_v23 }
  0xfe   :  { %4596 = vmatpush1.bf16.msra.mxu1 %v6132_v29 }
  0xff   :  { %4598 = vmatprep.subr.bf16.mxu1 %v6136_v30 }
 0x102   :  { %4600 = vmatpush1.bf16.msra.mxu1 %v6140_v36 }
 0x103   :  { %4602 = vmatprep.subr.bf16.mxu1 %v6144_v37 }
 0x106   :  { %4604 = vmatpush1.bf16.msra.mxu1 %v6147_v41 }
 0x107   :  { %4622 = vmatprep.subr.bf16.mxu1 %v6119_v16 }
 0x1ac   :  { %v311_v51 = vpop.f32.mrb[0].mxu1 }
 0x1ad   :  { %v6170_v52 = vadd.f32 %v311_v51, %v221_v48  ;;  %v313_v53 = vpop.f32.mrb[1].mxu1  ;;  %v500_v54 = vpop.f32.mrb[0].mxu0 }
 0x1ae   :  { %v6172_v55 = vadd.f32 %v313_v53, %v225_v49  ;;  %v502_v56 = vpop.f32.mrb[1].mxu0 }
 0x1af   :  { %v501_v57 = vadd.f32 %v500_v54, %v6170_v52 }
 0x1b0   :  { %v503_v58 = vadd.f32 %v502_v56, %v6172_v55  ;;  %v317_v59 = vpop.f32.mrb[2].mxu1 }
 0x1b1   :  { %v6176_v60 = vadd.f32 %v317_v59, %v221_v48  ;;  %v319_v61 = vpop.f32.mrb[3].mxu1  ;;  %v4361_v20 = vmul.f32 -1.442695, %v501_v57 }
 0x1b2   :  { %5169 = vtanh.f32 %v503_v58  ;;  %v6178_v62 = vadd.f32 %v319_v61, %v225_v49 }
 0x1bc   :  { %v5170_v4 = vpop.eup %5169  ;;  %v388_v5 = vpop.f32.mrb[4].mxu1 }
 0x1bd   :  { %v6186_v6 = vadd.f32 %v388_v5, %v229_v2  ;;  %v390_v7 = vpop.f32.mrb[5].mxu1  ;;  %597 = vrot.lane.b32.xlu1 %v5170_v4, %s5857_s10 }
 0x1be   :  { %v6189_v8 = vadd.f32 %v390_v7, %v233_v3 }
 0x1c0   :  { %v394_v10 = vpop.f32.mrb[6].mxu1 }
 0x1c1   :  { %v396_v11 = vpop.f32.mrb[7].mxu1  ;;  %v6195_v27 = vadd.f32 %v394_v10, %v229_v2 }
 0x1c2   :  { %v6191_v12 = vadd.f32 %v396_v11, %v233_v3  ;;  %v4362_v3 = vmul.f32 -1.442695, %v503_v58 }
 0x1c3   :  { %v507_v28 = vrot.slane %v6195_v27, 6 }
 0x1c4   :  { %v508_v14 = vrot.slane %v6191_v12, 6 }
 0x1cc   :  { %v577_v15 = vpop.f32.mrb[8].mxu1 }
 0x1cd   :  { %v579_v17 = vpop.f32.mrb[9].mxu1  ;;  %v578_v31 = vadd.f32 %v577_v15, %v507_v28 }
 0x1ce   :  { %v580_v18 = vadd.f32 %v579_v17, %v508_v14 }
 0x1cf   :  { %v4363_v32 = vmul.f32 -1.442695, %v578_v31 }
 0x1d0   :  { %5171 = vtanh.f32 %v580_v18  ;;  %v4364_v7 = vmul.f32 -1.442695, %v580_v18 }
 0x1d1   :  { %5173 = vpow2.f32 %v4361_v20  ;;  %v652_v20 = vrot.slane %v6170_v52, 2 }
 0x1da   :  { %v5172_v19 = vpop.eup %5171 }
 0x1db   :  { %627 = vrot.lane.b32.xlu0 %v5172_v19, %s5857_s10  ;;  %v5174_v24 = vpop.eup %5173 }
 0x1dc   :  { %v588_v25 = vadd.f32 1.0, %v5174_v24 }
 0x1de   :  { %5175 = vrcp.f32 %v588_v25  ;;  %v653_v25 = vrot.slane %v6172_v55, 2 }
 0x1df   :  { %5177 = vpow2.f32 %v4363_v32 }
 0x1e8   :  { %v5176_v33 = vpop.eup %5175 }
 0x1e9   :  { %v5178_v40 = vpop.eup %5177  ;;  %v595_v51 = vmul.f32 0.0, %v5176_v33 }
 0x1ea   :  { %v618_v42 = vadd.f32 1.0, %v5178_v40 }
 0x1ec   :  { %5179 = vrcp.f32 %v618_v42 }
 0x1f6   :  { %v5180_v46 = vpop.eup %5179 }
 0x1f7   :  { %v625_v57 = vmul.f32 0.0, %v5180_v46 }
 0x22f   :  { %v598_v34 = vpop.permute.xlu1 %597 }
 0x230   :  { %v600_v38 = vmul.f32 %v5176_v33, %v598_v34  ;;  %v731_v34 = vrot.slane %v6191_v12, 4 }
 0x232   :  { %602 = vrot.lane.b32.xlu1 %v600_v38, %s5857_s10 }
 0x24d   :  { %v628_v48 = vpop.permute.xlu0 %627 }
 0x24e   :  { %v630_v49 = vmul.f32 %v5180_v46, %v628_v48  ;;  %v730_v48 = vrot.slane %v6195_v27, 4 }
 0x250   :  { %632 = vrot.lane.b32.xlu0 %v630_v49, %s5857_s10 }
 0x2a4   :  { %v603_v53 = vpop.permute.xlu1 %602 }
 0x2a5   :  { %v6200_v54 = vadd.f32 %v603_v53, %v595_v51 }
 0x2a7   :  { %5181 = vtanh.f32 %v6200_v54 }
 0x2b1   :  { %v5182_v56 = vpop.eup %5181 }
 0x2b2   :  { %608 = vrot.lane.b32.xlu1 %v5182_v56, %s5857_s10 }
 0x2c2   :  { %v633_v59 = vpop.permute.xlu0 %632 }
 0x2c3   :  { %v6204_v61 = vadd.f32 %v633_v59, %v625_v57 }
 0x2c5   :  { %5183 = vtanh.f32 %v6204_v61 }
 0x2c6   :  { %5185 = vpow2.f32 %v4362_v3 }
 0x2cf   :  { %v5184_v2 = vpop.eup %5183 }
 0x2d0   :  { %638 = vrot.lane.b32.xlu0 %v5184_v2, %s5857_s10  ;;  %v5186_v4 = vpop.eup %5185 }
 0x2d1   :  { %v589_v5 = vadd.f32 1.0, %v5186_v4 }
 0x2d3   :  { %5187 = vrcp.f32 %v589_v5 }
 0x2d4   :  { %5189 = vpow2.f32 %v4364_v7 }
 0x2dd   :  { %v5188_v10 = vpop.eup %5187 }
 0x2de   :  { %v5190_v58 = vpop.eup %5189 }
 0x2df   :  { %v619_v15 = vadd.f32 1.0, %v5190_v58 }
 0x2e1   :  { %5191 = vrcp.f32 %v619_v15 }
 0x2eb   :  { %v5192_v17 = vpop.eup %5191 }
 0x324   :  { %v609_v11 = vpop.permute.xlu1 %608 }
 0x325   :  { %v611_v14 = vmul.f32 %v5188_v10, %v609_v11 }
 0x327   :  { %643 = vst.msk [vmem:[#allocation2] sm:$0x3] %vm642_vm1, %v611_v14  ;;  %4365 = vmatmul.mubr.msk.f32.vlgmr.msra.gmra.mrb[2].mxu0 %vm238_vm0, %v611_v14 }
 0x328   :  { %4608 = vmatpush1.bf16.msra.mxu0 %v6086_v13  ;;  %944 = vmatprep.mubr.f32.mxu0 %v5856_v0 }
 0x329   :  { %4610 = vmatprep.subr.bf16.mxu0 %v6090_v22 }
 0x32c   :  { %4612 = vmatpush1.bf16.msra.mxu0 %v6092_v26 }
 0x32d   :  { %4614 = vmatprep.subr.bf16.mxu0 %v6095_v35 }
 0x330   :  { %4616 = vmatpush1.bf16.msra.mxu0 %v6098_v39 }
 0x331   :  { %4618 = vmatprep.subr.bf16.mxu0 %v6101_v44 }
 0x334   :  { %4620 = vmatpush1.bf16.msra.mxu0 %v6104_v50 }
 0x335   :  { %4638 = vmatprep.subr.bf16.mxu0 %v6084_v9 }
 0x342   :  { %v639_v18 = vpop.permute.xlu0 %638 }
 0x343   :  { %v6219_v19 = vmul.f32 %v5192_v17, %v639_v18 }
 0x345   :  { %4366 = vmatmul.mubr.msk.f32.vlgmr.msra.gmra.mrb[10].mxu1 %vm238_vm0, %v6219_v19 }
 0x346   :  { %4624 = vmatpush1.bf16.msra.mxu1 %v6123_v21  ;;  %1021 = vmatprep.mubr.f32.mxu1 %v5856_v0 }
 0x347   :  { %4626 = vmatprep.subr.bf16.mxu1 %v6126_v23 }
 0x34a   :  { %4628 = vmatpush1.bf16.msra.mxu1 %v6132_v29 }
 0x34b   :  { %4630 = vmatprep.subr.bf16.mxu1 %v6136_v30 }
 0x34e   :  { %4632 = vmatpush1.bf16.msra.mxu1 %v6140_v36 }
 0x34f   :  { %4634 = vmatprep.subr.bf16.mxu1 %v6144_v37 }
 0x352   :  { %4636 = vmatpush1.bf16.msra.mxu1 %v6147_v41 }
 0x353   :  { %4654 = vmatprep.subr.bf16.mxu1 %v6119_v16 }
 0x3fa   :  { %v725_v24 = vpop.f32.mrb[2].mxu0 }
 0x3fb   :  { %v726_v28 = vadd.f32 %v725_v24, %v652_v20  ;;  %v727_v31 = vpop.f32.mrb[3].mxu0 }
 0x3fc   :  { %v728_v32 = vadd.f32 %v727_v31, %v653_v25 }
 0x3fd   :  { %v4367_v53 = vmul.f32 -1.442695, %v726_v28 }
 0x418   :  { %v802_v33 = vpop.f32.mrb[10].mxu1 }
 0x419   :  { %v804_v38 = vpop.f32.mrb[11].mxu1  ;;  %v803_v49 = vadd.f32 %v802_v33, %v730_v48 }
 0x41a   :  { %v805_v40 = vadd.f32 %v804_v38, %v731_v34 }
 0x41b   :  { %v4369_v51 = vmul.f32 -1.442695, %v803_v49 }
 0x41c   :  { %5193 = vtanh.f32 %v805_v40  ;;  %v4370_v28 = vmul.f32 -1.442695, %v805_v40 }
 0x41d   :  { %5195 = vtanh.f32 %v728_v32 }
 0x41e   :  { %5197 = vpow2.f32 %v4369_v51  ;;  %v952_v51 = vrot.slane %v6191_v12, 2 }
 0x41f   :  { %5199 = vpow2.f32 %v4367_v53 }
 0x426   :  { %v5194_v42 = vpop.eup %5193 }
 0x427   :  { %852 = vrot.lane.b32.xlu0 %v5194_v42, %s5857_s10  ;;  %v5196_v46 = vpop.eup %5195 }
 0x428   :  { %v5198_v56 = vpop.eup %5197 }
 0x429   :  { %v843_v57 = vadd.f32 1.0, %v5198_v56  ;;  %v5200_v59 = vpop.eup %5199 }
 0x42a   :  { %v813_v2 = vadd.f32 1.0, %v5200_v59 }
 0x42b   :  { %822 = vrot.lane.b32.xlu0 %v5196_v46, %s5857_s10  ;;  %5201 = vrcp.f32 %v843_v57  ;;  %v873_v57 = vrot.slane %v6170_v52, 4 }
 0x42c   :  { %5203 = vrcp.f32 %v813_v2  ;;  %v874_v2 = vrot.slane %v6172_v55, 4 }
 0x435   :  { %v5202_v3 = vpop.eup %5201 }
 0x436   :  { %v5204_v7 = vpop.eup %5203  ;;  %v850_v14 = vmul.f32 %v5202_v3, %v6204_v61  ;;  %v4368_v61 = vmul.f32 -1.442695, %v728_v32 }
 0x437   :  { %v820_v17 = vmul.f32 %v5204_v7, %v6200_v54 }
 0x499   :  { %v853_v4 = vpop.permute.xlu0 %852 }
 0x49a   :  { %v855_v5 = vmul.f32 %v5202_v3, %v853_v4 }
 0x49c   :  { %857 = vrot.lane.b32.xlu1 %v855_v5, %s5857_s10 }
 0x49d   :  { %v823_v10 = vpop.permute.xlu0 %822 }
 0x49e   :  { %v825_v11 = vmul.f32 %v5204_v7, %v823_v10 }
 0x4a0   :  { %827 = vrot.lane.b32.xlu1 %v825_v11, %s5857_s10  ;;  %v951_v11 = vrot.slane %v6195_v27, 2 }
 0x50e   :  { %v858_v58 = vpop.permute.xlu1 %857 }
 0x50f   :  { %v6241_v15 = vadd.f32 %v858_v58, %v850_v14 }
 0x511   :  { %5205 = vtanh.f32 %v6241_v15 }
 0x512   :  { %v828_v18 = vpop.permute.xlu1 %827 }
 0x513   :  { %v6245_v20 = vadd.f32 %v828_v18, %v820_v17 }
 0x515   :  { %5207 = vtanh.f32 %v6245_v20 }
 0x516   :  { %5209 = vpow2.f32 %v4370_v28 }
 0x517   :  { %5211 = vpow2.f32 %v4368_v61 }
 0x51b   :  { %v5206_v24 = vpop.eup %5205 }
 0x51c   :  { %863 = vrot.lane.b32.xlu0 %v5206_v24, %s5857_s10 }
 0x51f   :  { %v5208_v25 = vpop.eup %5207 }
 0x520   :  { %833 = vrot.lane.b32.xlu1 %v5208_v25, %s5857_s10  ;;  %v5210_v31 = vpop.eup %5209 }
 0x521   :  { %v844_v33 = vadd.f32 1.0, %v5210_v31  ;;  %v5212_v34 = vpop.eup %5211 }
 0x522   :  { %v814_v38 = vadd.f32 1.0, %v5212_v34 }
 0x523   :  { %5213 = vrcp.f32 %v844_v33 }
 0x524   :  { %5215 = vrcp.f32 %v814_v38 }
 0x52d   :  { %v5214_v54 = vpop.eup %5213 }
 0x52e   :  { %v5216_v48 = vpop.eup %5215 }
 0x58e   :  { %v864_v42 = vpop.permute.xlu0 %863 }
 0x58f   :  { %v6250_v46 = vmul.f32 %v5214_v54, %v864_v42 }
 0x591   :  { %4372 = vmatmul.mubr.msk.f32.vlgmr.msra.gmra.mrb[12].mxu1 %vm238_vm0, %v6250_v46 }
 0x592   :  { %v834_v49 = vpop.permute.xlu1 %833  ;;  %4656 = vmatpush1.bf16.msra.mxu1 %v6123_v21  ;;  %1238 = vmatprep.mubr.f32.mxu1 %v5856_v0 }
 0x593   :  { %v836_v32 = vmul.f32 %v5216_v48, %v834_v49  ;;  %4658 = vmatprep.subr.bf16.mxu1 %v6126_v23 }
 0x595   :  { %867 = vst.msk [vmem:[#allocation2 + $0x2] sm:$0x3] %vm642_vm1, %v836_v32  ;;  %4371 = vmatmul.mubr.msk.f32.vlgmr.msra.gmra.mrb[4].mxu0 %vm238_vm0, %v836_v32 }
 0x596   :  { %4640 = vmatpush1.bf16.msra.mxu0 %v6086_v13  ;;  %4660 = vmatpush1.bf16.msra.mxu1 %v6132_v29 }
 0x597   :  { %4642 = vmatprep.subr.bf16.mxu0 %v6090_v22  ;;  %4662 = vmatprep.subr.bf16.mxu1 %v6136_v30 }
 0x598   :  { %1165 = vmatprep.mubr.f32.mxu0 %v5856_v0 }
 0x59a   :  { %4644 = vmatpush1.bf16.msra.mxu0 %v6092_v26  ;;  %4664 = vmatpush1.bf16.msra.mxu1 %v6140_v36 }
 0x59b   :  { %4646 = vmatprep.subr.bf16.mxu0 %v6095_v35  ;;  %4666 = vmatprep.subr.bf16.mxu1 %v6144_v37 }
 0x59e   :  { %4648 = vmatpush1.bf16.msra.mxu0 %v6098_v39  ;;  %4668 = vmatpush1.bf16.msra.mxu1 %v6147_v41 }
 0x59f   :  { %4650 = vmatprep.subr.bf16.mxu0 %v6101_v44  ;;  %4686 = vmatprep.subr.bf16.mxu1 %v6119_v16 }
 0x5a2   :  { %4652 = vmatpush1.bf16.msra.mxu0 %v6104_v50 }
 0x5a3   :  { %4670 = vmatprep.subr.bf16.mxu0 %v6084_v9 }
 0x664   :  { %v1023_v40 = vpop.f32.mrb[12].mxu1 }
 0x665   :  { %v1025_v53 = vpop.f32.mrb[13].mxu1  ;;  %v1024_v14 = vadd.f32 %v1023_v40, %v951_v11 }
 0x666   :  { %v1026_v56 = vadd.f32 %v1025_v53, %v952_v51 }
 0x667   :  { %v4375_v58 = vmul.f32 -1.442695, %v1024_v14 }
 0x668   :  { %5217 = vtanh.f32 %v1026_v56  ;;  %v946_v59 = vpop.f32.mrb[4].mxu0 }
 0x669   :  { %v947_v3 = vadd.f32 %v946_v59, %v873_v57  ;;  %v948_v4 = vpop.f32.mrb[5].mxu0  ;;  %v4376_v59 = vmul.f32 -1.442695, %v1026_v56 }
 0x66a   :  { %v949_v5 = vadd.f32 %v948_v4, %v874_v2 }
 0x66b   :  { %v4373_v17 = vmul.f32 -1.442695, %v947_v3 }
 0x66c   :  { %5219 = vtanh.f32 %v949_v5 }
 0x66d   :  { %5221 = vpow2.f32 %v4375_v58 }
 0x66e   :  { %5223 = vpow2.f32 %v4373_v17 }
 0x672   :  { %v5218_v7 = vpop.eup %5217 }
 0x673   :  { %1073 = vrot.lane.b32.xlu0 %v5218_v7, %s5857_s10 }
 0x676   :  { %v5220_v10 = vpop.eup %5219 }
 0x677   :  { %1043 = vrot.lane.b32.xlu0 %v5220_v10, %s5857_s10  ;;  %v5222_v18 = vpop.eup %5221 }
 0x678   :  { %v1064_v24 = vadd.f32 1.0, %v5222_v18  ;;  %v5224_v25 = vpop.eup %5223 }
 0x679   :  { %v1034_v28 = vadd.f32 1.0, %v5224_v25 }
 0x67a   :  { %5225 = vrcp.f32 %v1064_v24  ;;  %v1094_v24 = vrot.slane %v6170_v52, 6 }
 0x67b   :  { %5227 = vrcp.f32 %v1034_v28  ;;  %v1095_v28 = vrot.slane %v6172_v55, 6 }
 0x684   :  { %v5226_v61 = vpop.eup %5225 }
 0x685   :  { %v5228_v34 = vpop.eup %5227  ;;  %v1071_v42 = vmul.f32 %v5226_v61, %v6241_v15  ;;  %v4374_v15 = vmul.f32 -1.442695, %v949_v5 }
 0x686   :  { %v1041_v32 = vmul.f32 %v5228_v34, %v6245_v20 }
 0x6e5   :  { %v1074_v31 = vpop.permute.xlu0 %1073 }
 0x6e6   :  { %v1076_v33 = vmul.f32 %v5226_v61, %v1074_v31 }
 0x6e8   :  { %1078 = vrot.lane.b32.xlu1 %v1076_v33, %s5857_s10 }
 0x6e9   :  { %v1044_v38 = vpop.permute.xlu0 %1043 }
 0x6ea   :  { %v1046_v54 = vmul.f32 %v5228_v34, %v1044_v38 }
 0x6ec   :  { %1048 = vrot.lane.b32.xlu1 %v1046_v54, %s5857_s10 }
 0x75a   :  { %v1079_v48 = vpop.permute.xlu1 %1078 }
 0x75b   :  { %v6283_v49 = vadd.f32 %v1079_v48, %v1071_v42 }
 0x75d   :  { %5229 = vtanh.f32 %v6283_v49 }
 0x75e   :  { %v1049_v40 = vpop.permute.xlu1 %1048 }
 0x75f   :  { %v6287_v51 = vadd.f32 %v1049_v40, %v1041_v32 }
 0x761   :  { %5231 = vtanh.f32 %v6287_v51 }
 0x762   :  { %5233 = vpow2.f32 %v4376_v59 }
 0x763   :  { %5235 = vpow2.f32 %v4374_v15 }
 0x767   :  { %v5230_v53 = vpop.eup %5229 }
 0x768   :  { %1084 = vrot.lane.b32.xlu0 %v5230_v53, %s5857_s10 }
 0x76b   :  { %v5232_v57 = vpop.eup %5231 }
 0x76c   :  { %1054 = vrot.lane.b32.xlu1 %v5232_v57, %s5857_s10  ;;  %v5234_v2 = vpop.eup %5233 }
 0x76d   :  { %v1065_v3 = vadd.f32 1.0, %v5234_v2  ;;  %v5236_v4 = vpop.eup %5235 }
 0x76e   :  { %v1035_v20 = vadd.f32 1.0, %v5236_v4 }
 0x76f   :  { %5237 = vrcp.f32 %v1065_v3 }
 0x770   :  { %5239 = vrcp.f32 %v1035_v20 }
 0x779   :  { %v5238_v7 = vpop.eup %5237 }
 0x77a   :  { %v5240_v14 = vpop.eup %5239 }
 0x7da   :  { %v1085_v10 = vpop.permute.xlu0 %1084 }
 0x7db   :  { %v6292_v11 = vmul.f32 %v5238_v7, %v1085_v10 }
 0x7dd   :  { %4378 = vmatmul.mubr.msk.f32.vlgmr.msra.gmra.mrb[14].mxu1 %vm238_vm0, %v6292_v11 }
 0x7de   :  { %v1055_v58 = vpop.permute.xlu1 %1054  ;;  %4688 = vmatpush1.bf16.msra.mxu1 %v6123_v21  ;;  %1457 = vmatprep.mubr.f32.mxu1 %v5856_v0 }
 0x7df   :  { %v1057_v56 = vmul.f32 %v5240_v14, %v1055_v58  ;;  %4690 = vmatprep.subr.bf16.mxu1 %v6126_v23 }
 0x7e1   :  { %1088 = vst.msk [vmem:[#allocation2 + $0x4] sm:$0x3] %vm642_vm1, %v1057_v56  ;;  %4377 = vmatmul.mubr.msk.f32.vlgmr.msra.gmra.mrb[6].mxu0 %vm238_vm0, %v1057_v56 }
 0x7e2   :  { %4672 = vmatpush1.bf16.msra.mxu0 %v6086_v13  ;;  %4692 = vmatpush1.bf16.msra.mxu1 %v6132_v29 }
 0x7e3   :  { %4674 = vmatprep.subr.bf16.mxu0 %v6090_v22  ;;  %4694 = vmatprep.subr.bf16.mxu1 %v6136_v30 }
 0x7e4   :  { %1378 = vmatprep.mubr.f32.mxu0 %v5856_v0 }
 0x7e6   :  { %4676 = vmatpush1.bf16.msra.mxu0 %v6092_v26  ;;  %4696 = vmatpush1.bf16.msra.mxu1 %v6140_v36 }
 0x7e7   :  { %4678 = vmatprep.subr.bf16.mxu0 %v6095_v35  ;;  %4698 = vmatprep.subr.bf16.mxu1 %v6144_v37 }
 0x7ea   :  { %4680 = vmatpush1.bf16.msra.mxu0 %v6098_v39  ;;  %4700 = vmatpush1.bf16.msra.mxu1 %v6147_v41 }
 0x7eb   :  { %4682 = vmatprep.subr.bf16.mxu0 %v6101_v44  ;;  %4718 = vmatprep.subr.bf16.mxu1 %v6119_v16 }
 0x7ee   :  { %4684 = vmatpush1.bf16.msra.mxu0 %v6104_v50 }
 0x7ef   :  { %4702 = vmatprep.subr.bf16.mxu0 %v6084_v9 }
 0x8b0   :  { %v1240_v5 = vpop.f32.mrb[14].mxu1 }
 0x8b1   :  { %v1242_v17 = vpop.f32.mrb[15].mxu1  ;;  %v1241_v54 = vadd.f32 %v1240_v5, %v6195_v27 }
 0x8b2   :  { %v1243_v18 = vadd.f32 %v1242_v17, %v6191_v12 }
 0x8b3   :  { %v4381_v42 = vmul.f32 -1.442695, %v1241_v54 }
 0x8b4   :  { %5241 = vtanh.f32 %v1243_v18  ;;  %v1167_v25 = vpop.f32.mrb[6].mxu0  ;;  %v4382_v56 = vmul.f32 -1.442695, %v1243_v18 }
 0x8b5   :  { %v1168_v61 = vadd.f32 %v1167_v25, %v1094_v24  ;;  %v1169_v31 = vpop.f32.mrb[7].mxu0 }
 0x8b6   :  { %v1170_v33 = vadd.f32 %v1169_v31, %v1095_v28 }
 0x8b7   :  { %v4379_v12 = vmul.f32 -1.442695, %v1168_v61 }
 0x8b8   :  { %5243 = vtanh.f32 %v1170_v33 }
 0x8b9   :  { %5245 = vpow2.f32 %v4381_v42 }
 0x8ba   :  { %5247 = vpow2.f32 %v4379_v12 }
 0x8be   :  { %v5242_v34 = vpop.eup %5241 }
 0x8bf   :  { %1290 = vrot.lane.b32.xlu0 %v5242_v34, %s5857_s10 }
 0x8c2   :  { %v5244_v38 = vpop.eup %5243 }
 0x8c3   :  { %1260 = vrot.lane.b32.xlu0 %v5244_v38, %s5857_s10  ;;  %v5246_v52 = vpop.eup %5245  ;;  %v1388_v38 = vrot.slane %v6189_v8, 6 }
 0x8c4   :  { %v1281_v48 = vadd.f32 1.0, %v5246_v52  ;;  %v5248_v32 = vpop.eup %5247 }
 0x8c5   :  { %v1251_v55 = vadd.f32 1.0, %v5248_v32 }
 0x8c6   :  { %5249 = vrcp.f32 %v1281_v48 }
 0x8c7   :  { %5251 = vrcp.f32 %v1251_v55 }
 0x8d0   :  { %v5250_v40 = vpop.eup %5249 }
 0x8d1   :  { %v5252_v59 = vpop.eup %5251  ;;  %v1288_v27 = vmul.f32 %v5250_v40, %v6283_v49  ;;  %v4380_v49 = vmul.f32 -1.442695, %v1170_v33 }
 0x8d2   :  { %v1258_v20 = vmul.f32 %v5252_v59, %v6287_v51 }
 0x931   :  { %v1291_v53 = vpop.permute.xlu0 %1290 }
 0x932   :  { %v1293_v57 = vmul.f32 %v5250_v40, %v1291_v53  ;;  %v1387_v40 = vrot.slane %v6186_v6, 6 }
 0x934   :  { %1295 = vrot.lane.b32.xlu1 %v1293_v57, %s5857_s10 }
 0x935   :  { %v1261_v15 = vpop.permute.xlu0 %1260 }
 0x936   :  { %v1263_v2 = vmul.f32 %v5252_v59, %v1261_v15 }
 0x938   :  { %1265 = vrot.lane.b32.xlu1 %v1263_v2, %s5857_s10 }
 0x9a6   :  { %v1296_v3 = vpop.permute.xlu1 %1295 }
 0x9a7   :  { %v6325_v4 = vadd.f32 %v1296_v3, %v1288_v27 }
 0x9a9   :  { %5253 = vtanh.f32 %v6325_v4 }
 0x9aa   :  { %v1266_v7 = vpop.permute.xlu1 %1265 }
 0x9ab   :  { %v6329_v10 = vadd.f32 %v1266_v7, %v1258_v20 }
 0x9ad   :  { %5255 = vtanh.f32 %v6329_v10 }
 0x9ae   :  { %5257 = vpow2.f32 %v4382_v56 }
 0x9af   :  { %5259 = vpow2.f32 %v4380_v49 }
 0x9b3   :  { %v5254_v14 = vpop.eup %5253 }
 0x9b4   :  { %1301 = vrot.lane.b32.xlu0 %v5254_v14, %s5857_s10 }
 0x9b7   :  { %v5256_v58 = vpop.eup %5255 }
 0x9b8   :  { %1271 = vrot.lane.b32.xlu1 %v5256_v58, %s5857_s10  ;;  %v5258_v5 = vpop.eup %5257 }
 0x9b9   :  { %v1282_v17 = vadd.f32 1.0, %v5258_v5  ;;  %v5260_v24 = vpop.eup %5259 }
 0x9ba   :  { %v1252_v51 = vadd.f32 1.0, %v5260_v24 }
 0x9bb   :  { %5261 = vrcp.f32 %v1282_v17 }
 0x9bc   :  { %5263 = vrcp.f32 %v1252_v51 }
 0x9c5   :  { %v5262_v25 = vpop.eup %5261 }
 0x9c6   :  { %v5264_v31 = vpop.eup %5263 }
 0xa26   :  { %v1302_v28 = vpop.permute.xlu0 %1301 }
 0xa27   :  { %v6334_v61 = vmul.f32 %v5262_v25, %v1302_v28 }
 0xa29   :  { %4384 = vmatmul.mubr.msk.f32.vlgmr.msra.gmra.mrb[16].mxu1 %vm238_vm0, %v6334_v61 }
 0xa2a   :  { %v1272_v34 = vpop.permute.xlu1 %1271  ;;  %4720 = vmatpush1.bf16.msra.mxu1 %v6123_v21  ;;  %1680 = vmatprep.mubr.f32.mxu1 %v5856_v0 }
 0xa2b   :  { %v1274_v18 = vmul.f32 %v5264_v31, %v1272_v34  ;;  %4722 = vmatprep.subr.bf16.mxu1 %v6126_v23 }
 0xa2d   :  { %1305 = vst.msk [vmem:[#allocation2 + $0x6] sm:$0x3] %vm642_vm1, %v1274_v18  ;;  %4383 = vmatmul.mubr.msk.f32.vlgmr.msra.gmra.mrb[8].mxu0 %vm238_vm0, %v1274_v18 }
 0xa2e   :  { %4704 = vmatpush1.bf16.msra.mxu0 %v6086_v13  ;;  %4724 = vmatpush1.bf16.msra.mxu1 %v6132_v29 }
 0xa2f   :  { %4706 = vmatprep.subr.bf16.mxu0 %v6090_v22  ;;  %4726 = vmatprep.subr.bf16.mxu1 %v6136_v30 }
 0xa30   :  { %1603 = vmatprep.mubr.f32.mxu0 %v5856_v0 }
 0xa32   :  { %4708 = vmatpush1.bf16.msra.mxu0 %v6092_v26  ;;  %4728 = vmatpush1.bf16.msra.mxu1 %v6140_v36 }
 0xa33   :  { %4710 = vmatprep.subr.bf16.mxu0 %v6095_v35  ;;  %4730 = vmatprep.subr.bf16.mxu1 %v6144_v37 }
 0xa36   :  { %4712 = vmatpush1.bf16.msra.mxu0 %v6098_v39  ;;  %4732 = vmatpush1.bf16.msra.mxu1 %v6147_v41 }
 0xa37   :  { %4714 = vmatprep.subr.bf16.mxu0 %v6101_v44  ;;  %4750 = vmatprep.subr.bf16.mxu1 %v6119_v16 }
 0xa3a   :  { %4716 = vmatpush1.bf16.msra.mxu0 %v6104_v50 }
 0xa3b   :  { %4734 = vmatprep.subr.bf16.mxu0 %v6084_v9 }
 0xafc   :  { %v1459_v33 = vpop.f32.mrb[16].mxu1 }
 0xafd   :  { %v1461_v54 = vpop.f32.mrb[17].mxu1  ;;  %v1460_v53 = vadd.f32 %v1459_v33, %v1387_v40 }
 0xafe   :  { %v1462_v42 = vadd.f32 %v1461_v54, %v1388_v38 }
 0xaff   :  { %v4387_v57 = vmul.f32 -1.442695, %v1460_v53 }
 0xb00   :  { %5265 = vtanh.f32 %v1462_v42  ;;  %v1380_v12 = vpop.f32.mrb[8].mxu0  ;;  %v4388_v33 = vmul.f32 -1.442695, %v1462_v42 }
 0xb01   :  { %v1382_v52 = vpop.f32.mrb[9].mxu0  ;;  %v1381_v59 = vadd.f32 %v1380_v12, %v6176_v60 }
 0xb02   :  { %v1383_v48 = vadd.f32 %v1382_v52, %v6178_v62 }
 0xb03   :  { %v4385_v15 = vmul.f32 -1.442695, %v1381_v59 }
 0xb04   :  { %5267 = vtanh.f32 %v1383_v48 }
 0xb05   :  { %5269 = vpow2.f32 %v4387_v57  ;;  %v1611_v57 = vrot.slane %v6189_v8, 4 }
 0xb06   :  { %5271 = vpow2.f32 %v4385_v15 }
 0xb0a   :  { %v5266_v32 = vpop.eup %5265 }
 0xb0b   :  { %1509 = vrot.lane.b32.xlu0 %v5266_v32, %s5857_s10 }
 0xb0e   :  { %v5268_v55 = vpop.eup %5267 }
 0xb0f   :  { %1479 = vrot.lane.b32.xlu0 %v5268_v55, %s5857_s10  ;;  %v5270_v2 = vpop.eup %5269 }
 0xb10   :  { %v1500_v27 = vadd.f32 1.0, %v5270_v2  ;;  %v5272_v3 = vpop.eup %5271 }
 0xb11   :  { %v1470_v20 = vadd.f32 1.0, %v5272_v3 }
 0xb12   :  { %5273 = vrcp.f32 %v1500_v27  ;;  %v1533_v27 = vrot.slane %v6178_v62, 2 }
 0xb13   :  { %5275 = vrcp.f32 %v1470_v20 }
 0xb1c   :  { %v5274_v7 = vpop.eup %5273 }
 0xb1d   :  { %v5276_v56 = vpop.eup %5275  ;;  %v1507_v17 = vmul.f32 %v5274_v7, %v6325_v4  ;;  %v4386_v4 = vmul.f32 -1.442695, %v1383_v48 }
 0xb1e   :  { %v1477_v25 = vmul.f32 %v5276_v56, %v6329_v10 }
 0xb7d   :  { %v1510_v14 = vpop.permute.xlu0 %1509 }
 0xb7e   :  { %v1512_v58 = vmul.f32 %v5274_v7, %v1510_v14 }
 0xb80   :  { %1514 = vrot.lane.b32.xlu1 %v1512_v58, %s5857_s10  ;;  %v1532_v58 = vrot.slane %v6176_v60, 2 }
 0xb81   :  { %v1480_v49 = vpop.permute.xlu0 %1479 }
 0xb82   :  { %v1482_v5 = vmul.f32 %v5276_v56, %v1480_v49 }
 0xb84   :  { %1484 = vrot.lane.b32.xlu1 %v1482_v5, %s5857_s10 }
 0xbf2   :  { %v1515_v24 = vpop.permute.xlu1 %1514 }
 0xbf3   :  { %v6367_v51 = vadd.f32 %v1515_v24, %v1507_v17 }
 0xbf5   :  { %5277 = vtanh.f32 %v6367_v51 }
 0xbf6   :  { %v1485_v28 = vpop.permute.xlu1 %1484 }
 0xbf7   :  { %v6371_v31 = vadd.f32 %v1485_v28, %v1477_v25 }
 0xbf9   :  { %5279 = vtanh.f32 %v6371_v31 }
 0xbfa   :  { %5281 = vpow2.f32 %v4388_v33 }
 0xbfb   :  { %5283 = vpow2.f32 %v4386_v4 }
 0xbff   :  { %v5278_v34 = vpop.eup %5277 }
 0xc00   :  { %1520 = vrot.lane.b32.xlu0 %v5278_v34, %s5857_s10 }
 0xc03   :  { %v5280_v18 = vpop.eup %5279 }
 0xc04   :  { %1490 = vrot.lane.b32.xlu1 %v5280_v18, %s5857_s10  ;;  %v5282_v38 = vpop.eup %5281 }
 0xc05   :  { %v1501_v54 = vadd.f32 1.0, %v5282_v38  ;;  %v5284_v12 = vpop.eup %5283 }
 0xc06   :  { %v1471_v10 = vadd.f32 1.0, %v5284_v12 }
 0xc07   :  { %5285 = vrcp.f32 %v1501_v54 }
 0xc08   :  { %5287 = vrcp.f32 %v1471_v10 }
 0xc11   :  { %v5286_v52 = vpop.eup %5285 }
 0xc12   :  { %v5288_v40 = vpop.eup %5287 }
 0xc72   :  { %v1521_v32 = vpop.permute.xlu0 %1520 }
 0xc73   :  { %v6376_v55 = vmul.f32 %v5286_v52, %v1521_v32 }
 0xc75   :  { %4390 = vmatmul.mubr.msk.f32.vlgmr.msra.gmra.mrb[18].mxu1 %vm238_vm0, %v6376_v55 }
 0xc76   :  { %v1491_v53 = vpop.permute.xlu1 %1490  ;;  %4752 = vmatpush1.bf16.msra.mxu1 %v6123_v21  ;;  %1901 = vmatprep.mubr.f32.mxu1 %v5856_v0 }
 0xc77   :  { %v6382_v42 = vmul.f32 %v5288_v40, %v1491_v53  ;;  %4754 = vmatprep.subr.bf16.mxu1 %v6126_v23 }
 0xc79   :  { %4389 = vmatmul.mubr.msk.f32.vlgmr.msra.gmra.mrb[10].mxu0 %vm238_vm0, %v6382_v42 }
 0xc7a   :  { %4736 = vmatpush1.bf16.msra.mxu0 %v6086_v13  ;;  %4756 = vmatpush1.bf16.msra.mxu1 %v6132_v29 }
 0xc7b   :  { %4738 = vmatprep.subr.bf16.mxu0 %v6090_v22  ;;  %4758 = vmatprep.subr.bf16.mxu1 %v6136_v30 }
 0xc7c   :  { %1824 = vmatprep.mubr.f32.mxu0 %v5856_v0 }
 0xc7e   :  { %4740 = vmatpush1.bf16.msra.mxu0 %v6092_v26  ;;  %4760 = vmatpush1.bf16.msra.mxu1 %v6140_v36 }
 0xc7f   :  { %4742 = vmatprep.subr.bf16.mxu0 %v6095_v35  ;;  %4762 = vmatprep.subr.bf16.mxu1 %v6144_v37 }
 0xc82   :  { %4744 = vmatpush1.bf16.msra.mxu0 %v6098_v39  ;;  %4764 = vmatpush1.bf16.msra.mxu1 %v6147_v41 }
 0xc83   :  { %4746 = vmatprep.subr.bf16.mxu0 %v6101_v44  ;;  %4782 = vmatprep.subr.bf16.mxu1 %v6119_v16 }
 0xc86   :  { %4748 = vmatpush1.bf16.msra.mxu0 %v6104_v50 }
 0xc87   :  { %4766 = vmatprep.subr.bf16.mxu0 %v6084_v9  ;;  %v1610_v9 = vrot.slane %v6186_v6, 4 }
 0xd48   :  { %v1682_v48 = vpop.f32.mrb[18].mxu1 }
 0xd49   :  { %v1684_v59 = vpop.f32.mrb[19].mxu1  ;;  %v1683_v14 = vadd.f32 %v1682_v48, %v1610_v9 }
 0xd4a   :  { %v1685_v15 = vadd.f32 %v1684_v59, %v1611_v57 }
 0xd4b   :  { %v4393_v56 = vmul.f32 -1.442695, %v1683_v14 }
 0xd4c   :  { %5289 = vtanh.f32 %v1685_v15  ;;  %v1605_v2 = vpop.f32.mrb[10].mxu0  ;;  %v4394_v59 = vmul.f32 -1.442695, %v1685_v15 }
 0xd4d   :  { %v1607_v3 = vpop.f32.mrb[11].mxu0  ;;  %v1606_v49 = vadd.f32 %v1605_v2, %v1532_v58 }
 0xd4e   :  { %v1608_v20 = vadd.f32 %v1607_v3, %v1533_v27 }
 0xd4f   :  { %v4391_v5 = vmul.f32 -1.442695, %v1606_v49 }
 0xd50   :  { %5291 = vtanh.f32 %v1608_v20 }
 0xd51   :  { %5293 = vpow2.f32 %v4393_v56 }
 0xd52   :  { %5295 = vpow2.f32 %v4391_v5 }
 0xd56   :  { %v5290_v7 = vpop.eup %5289 }
 0xd57   :  { %1732 = vrot.lane.b32.xlu0 %v5290_v7, %s5857_s10 }
 0xd5a   :  { %v5292_v16 = vpop.eup %5291 }
 0xd5b   :  { %1702 = vrot.lane.b32.xlu0 %v5292_v16, %s5857_s10  ;;  %v5294_v17 = vpop.eup %5293 }
 0xd5c   :  { %v1723_v24 = vadd.f32 1.0, %v5294_v17  ;;  %v5296_v25 = vpop.eup %5295 }
 0xd5d   :  { %v1693_v28 = vadd.f32 1.0, %v5296_v25 }
 0xd5e   :  { %5297 = vrcp.f32 %v1723_v24 }
 0xd5f   :  { %5299 = vrcp.f32 %v1693_v28 }
 0xd68   :  { %v5298_v34 = vpop.eup %5297 }
 0xd69   :  { %v5300_v4 = vpop.eup %5299  ;;  %v1730_v12 = vmul.f32 %v5298_v34, %v6367_v51  ;;  %v4392_v51 = vmul.f32 -1.442695, %v1608_v20 }
 0xd6a   :  { %v1700_v32 = vmul.f32 %v5300_v4, %v6371_v31 }
 0xdc9   :  { %v1733_v18 = vpop.permute.xlu0 %1732 }
 0xdca   :  { %v1735_v33 = vmul.f32 %v5298_v34, %v1733_v18 }
 0xdcc   :  { %1737 = vrot.lane.b32.xlu1 %v1735_v33, %s5857_s10 }
 0xdcd   :  { %v1703_v38 = vpop.permute.xlu0 %1702 }
 0xdce   :  { %v1705_v54 = vmul.f32 %v5300_v4, %v1703_v38 }
 0xdd0   :  { %1707 = vrot.lane.b32.xlu1 %v1705_v54, %s5857_s10 }
 0xe3e   :  { %v1738_v10 = vpop.permute.xlu1 %1737 }
 0xe3f   :  { %v6411_v52 = vadd.f32 %v1738_v10, %v1730_v12 }
 0xe41   :  { %5301 = vtanh.f32 %v6411_v52 }
 0xe42   :  { %v1708_v40 = vpop.permute.xlu1 %1707 }
 0xe43   :  { %v6415_v53 = vadd.f32 %v1708_v40, %v1700_v32 }
 0xe45   :  { %5303 = vtanh.f32 %v6415_v53 }
 0xe46   :  { %5305 = vpow2.f32 %v4394_v59 }
 0xe47   :  { %5307 = vpow2.f32 %v4392_v51 }
 0xe4b   :  { %v5302_v48 = vpop.eup %5301 }
 0xe4c   :  { %1743 = vrot.lane.b32.xlu0 %v5302_v48, %s5857_s10 }
 0xe4f   :  { %v5304_v57 = vpop.eup %5303 }
 0xe50   :  { %1713 = vrot.lane.b32.xlu1 %v5304_v57, %s5857_s10  ;;  %v5306_v2 = vpop.eup %5305 }
 0xe51   :  { %v1724_v27 = vadd.f32 1.0, %v5306_v2  ;;  %v5308_v3 = vpop.eup %5307 }
 0xe52   :  { %v1694_v31 = vadd.f32 1.0, %v5308_v3 }
 0xe53   :  { %5309 = vrcp.f32 %v1724_v27 }
 0xe54   :  { %5311 = vrcp.f32 %v1694_v31 }
 0xe5d   :  { %v5310_v7 = vpop.eup %5309 }
 0xe5e   :  { %v5312_v14 = vpop.eup %5311 }
 0xebe   :  { %v1744_v16 = vpop.permute.xlu0 %1743 }
 0xebf   :  { %v6420_v9 = vmul.f32 %v5310_v7, %v1744_v16 }
 0xec1   :  { %4396 = vmatmul.mubr.msk.f32.vlgmr.msra.gmra.mrb[20].mxu1 %vm238_vm0, %v6420_v9 }
 0xec2   :  { %v1714_v58 = vpop.permute.xlu1 %1713  ;;  %4784 = vmatpush1.bf16.msra.mxu1 %v6123_v21  ;;  %2118 = vmatprep.mubr.f32.mxu1 %v5856_v0 }
 0xec3   :  { %v6426_v15 = vmul.f32 %v5312_v14, %v1714_v58  ;;  %4786 = vmatprep.subr.bf16.mxu1 %v6126_v23 }
 0xec5   :  { %4395 = vmatmul.mubr.msk.f32.vlgmr.msra.gmra.mrb[12].mxu0 %vm238_vm0, %v6426_v15 }
 0xec6   :  { %4768 = vmatpush1.bf16.msra.mxu0 %v6086_v13  ;;  %4788 = vmatpush1.bf16.msra.mxu1 %v6132_v29  ;;  %v1754_v29 = vrot.slane %v6178_v62, 4 }
 0xec7   :  { %4770 = vmatprep.subr.bf16.mxu0 %v6090_v22  ;;  %4790 = vmatprep.subr.bf16.mxu1 %v6136_v30  ;;  %v1832_v22 = vrot.slane %v6189_v8, 2 }
 0xec8   :  { %2045 = vmatprep.mubr.f32.mxu0 %v5856_v0 }
 0xeca   :  { %4772 = vmatpush1.bf16.msra.mxu0 %v6092_v26  ;;  %4792 = vmatpush1.bf16.msra.mxu1 %v6140_v36 }
 0xecb   :  { %4774 = vmatprep.subr.bf16.mxu0 %v6095_v35  ;;  %4794 = vmatprep.subr.bf16.mxu1 %v6144_v37  ;;  %v1753_v37 = vrot.slane %v6176_v60, 4 }
 0xece   :  { %4776 = vmatpush1.bf16.msra.mxu0 %v6098_v39  ;;  %4796 = vmatpush1.bf16.msra.mxu1 %v6147_v41 }
 0xecf   :  { %4778 = vmatprep.subr.bf16.mxu0 %v6101_v44  ;;  %v1831_v44 = vrot.slane %v6186_v6, 2 }
 0xed2   :  { %4780 = vmatpush1.bf16.msra.mxu0 %v6104_v50 }
 0xf94   :  { %v1903_v13 = vpop.f32.mrb[20].mxu1 }
 0xf95   :  { %v1905_v21 = vpop.f32.mrb[21].mxu1  ;;  %v1904_v50 = vadd.f32 %v1903_v13, %v1831_v44 }
 0xf96   :  { %v1906_v23 = vadd.f32 %v1905_v21, %v1832_v22 }
 0xf97   :  { %v4399_v41 = vmul.f32 -1.442695, %v1904_v50 }
 0xf98   :  { %5313 = vtanh.f32 %v1906_v23  ;;  %v1826_v26 = vpop.f32.mrb[12].mxu0  ;;  %v4400_v59 = vmul.f32 -1.442695, %v1906_v23 }
 0xf99   :  { %v1828_v35 = vpop.f32.mrb[13].mxu0  ;;  %v1827_v20 = vadd.f32 %v1826_v26, %v1753_v37  ;;  %v1975_v26 = vrot.slane %v6178_v62, 6 }
 0xf9a   :  { %v1829_v30 = vadd.f32 %v1828_v35, %v1754_v29 }
 0xf9b   :  { %v4397_v56 = vmul.f32 -1.442695, %v1827_v20 }
 0xf9c   :  { %5315 = vtanh.f32 %v1829_v30 }
 0xf9d   :  { %5317 = vpow2.f32 %v4399_v41 }
 0xf9e   :  { %5319 = vpow2.f32 %v4397_v56 }
 0xfa2   :  { %v5314_v36 = vpop.eup %5313 }
 0xfa3   :  { %1953 = vrot.lane.b32.xlu0 %v5314_v36, %s5857_s10 }
 0xfa6   :  { %v5316_v39 = vpop.eup %5315 }
 0xfa7   :  { %1923 = vrot.lane.b32.xlu0 %v5316_v39, %s5857_s10  ;;  %v5318_v49 = vpop.eup %5317 }
 0xfa8   :  { %v1944_v5 = vadd.f32 1.0, %v5318_v49  ;;  %v5320_v17 = vpop.eup %5319 }
 0xfa9   :  { %v1914_v24 = vadd.f32 1.0, %v5320_v17 }
 0xfaa   :  { %5321 = vrcp.f32 %v1944_v5 }
 0xfab   :  { %5323 = vrcp.f32 %v1914_v24 }
 0xfb4   :  { %v5322_v25 = vpop.eup %5321 }
 0xfb5   :  { %v5324_v18 = vpop.eup %5323  ;;  %v1951_v38 = vmul.f32 %v5322_v25, %v6411_v52  ;;  %v4398_v52 = vmul.f32 -1.442695, %v1829_v30 }
 0xfb6   :  { %v1921_v10 = vmul.f32 %v5324_v18, %v6415_v53 }
0x1015   :  { %v1954_v28 = vpop.permute.xlu0 %1953 }
0x1016   :  { %v1956_v34 = vmul.f32 %v5322_v25, %v1954_v28 }
0x1018   :  { %1958 = vrot.lane.b32.xlu1 %v1956_v34, %s5857_s10 }
0x1019   :  { %v1924_v33 = vpop.permute.xlu0 %1923 }
0x101a   :  { %v1926_v4 = vmul.f32 %v5324_v18, %v1924_v33 }
0x101c   :  { %1928 = vrot.lane.b32.xlu1 %v1926_v4, %s5857_s10 }
0x108a   :  { %v1959_v54 = vpop.permute.xlu1 %1958 }
0x108b   :  { %v6453_v12 = vadd.f32 %v1959_v54, %v1951_v38 }
0x108d   :  { %5325 = vtanh.f32 %v6453_v12 }
0x108e   :  { %v1929_v32 = vpop.permute.xlu1 %1928 }
0x108f   :  { %v6457_v40 = vadd.f32 %v1929_v32, %v1921_v10  ;;  %v2196_v32 = vld [vmem:[#allocation13 + $0x18] sm:$0xff] }
0x1091   :  { %5327 = vtanh.f32 %v6457_v40 }
0x1092   :  { %5329 = vpow2.f32 %v4400_v59  ;;  %v2193_v59 = vld [vmem:[#allocation13] sm:$0xff] }
0x1093   :  { %5331 = vpow2.f32 %v4398_v52 }
0x1097   :  { %v5326_v48 = vpop.eup %5325 }
0x1098   :  { %1964 = vrot.lane.b32.xlu0 %v5326_v48, %s5857_s10 }
0x109b   :  { %v5328_v57 = vpop.eup %5327 }
0x109c   :  { %1934 = vrot.lane.b32.xlu1 %v5328_v57, %s5857_s10  ;;  %v5330_v51 = vpop.eup %5329  ;;  %v2200_v57 = vld [vmem:[#allocation13 + $0x38] sm:$0xff] }
0x109d   :  { %v1945_v2 = vadd.f32 1.0, %v5330_v51  ;;  %v5332_v27 = vpop.eup %5331  ;;  %v4829_v52 = vpack.c.bf16 %v2200_v57, %v2196_v32  ;;  %v2225_v57 = vld [vmem:[#allocation13 + $0x100] sm:$0xff] }
0x109e   :  { %v1915_v53 = vadd.f32 1.0, %v5332_v27  ;;  %v2199_v27 = vld [vmem:[#allocation13 + $0x30] sm:$0xff] }
0x109f   :  { %5333 = vrcp.f32 %v1945_v2  ;;  %v2195_v2 = vld [vmem:[#allocation13 + $0x10] sm:$0xff]  ;;  %4830 = vmatprep.subr.bf16.mxu1 %v4829_v52 }
0x10a0   :  { %5335 = vrcp.f32 %v1915_v53  ;;  %v2202_v53 = vld [vmem:[#allocation13 + $0x48] sm:$0xff] }
0x10a9   :  { %v5334_v3 = vpop.eup %5333 }
0x10aa   :  { %v5336_v16 = vpop.eup %5335 }
0x110a   :  { %v1965_v31 = vpop.permute.xlu0 %1964 }
0x110b   :  { %v1967_v7 = vmul.f32 %v5334_v3, %v1965_v31  ;;  %v4831_v31 = vpack.c.bf16 %v2199_v27, %v2195_v2  ;;  %v2234_v2 = vld [vmem:[#allocation13 + $0x148] sm:$0xff] }
0x110c   :  { %v2238_v27 = vld [vmem:[#allocation13 + $0x168] sm:$0xff] }
0x110d   :  { %4402 = vmatmul.mubr.msk.f32.vlgmr.msra.gmra.mrb[22].mxu1 %vm238_vm0, %v1967_v7 }
0x110e   :  { %v1935_v14 = vpop.permute.xlu1 %1934  ;;  %2420 = vmatprep.mubr.f32.mxu1 %v5856_v0  ;;  %4832 = vmatpush1.bf16.msra.mxu1 %v4831_v31 }
0x110f   :  { %v6464_v58 = vmul.f32 %v5336_v16, %v1935_v14  ;;  %v2204_v16 = vld [vmem:[#allocation13 + $0x58] sm:$0xff] }
0x1110   :  { %v2208_v14 = vld [vmem:[#allocation13 + $0x78] sm:$0xff] }
0x1111   :  { %4401 = vmatmul.mubr.msk.f32.vlgmr.msra.gmra.mrb[14].mxu0 %vm238_vm0, %v6464_v58 }
0x1112   :  { %2343 = vmatprep.mubr.f32.mxu0 %v5856_v0 }
0x11e0   :  { %v2120_v13 = vpop.f32.mrb[22].mxu1 }
0x11e1   :  { %v2122_v22 = vpop.f32.mrb[23].mxu1  ;;  %v2121_v39 = vadd.f32 %v2120_v13, %v6186_v6 }
0x11e2   :  { %v6470_v21 = vadd.f32 %v2122_v22, %v6189_v8  ;;  %v1974_v8 = vrot.slane %v6176_v60, 6  ;;  %v4833_v22 = vpack.c.bf16 %v2208_v14, %v2204_v16  ;;  %v2233_v16 = vld [vmem:[#allocation13 + $0x140] sm:$0xff] }
0x11e3   :  { %v4405_v44 = vmul.f32 -1.442695, %v2121_v39  ;;  %v2210_v39 = vld [vmem:[#allocation13 + $0x88] sm:$0xff]  ;;  %v2237_v14 = vld [vmem:[#allocation13 + $0x160] sm:$0xff] }
0x11e4   :  { %5337 = vtanh.f32 %v6470_v21  ;;  %v2047_v23 = vpop.f32.mrb[14].mxu0  ;;  %4834 = vmatprep.subr.bf16.mxu1 %v4833_v22 }
0x11e5   :  { %v2049_v29 = vpop.f32.mrb[15].mxu0  ;;  %v2048_v50 = vadd.f32 %v2047_v23, %v1974_v8  ;;  %v2201_v23 = vld [vmem:[#allocation13 + $0x40] sm:$0xff]  ;;  %v2214_v8 = vld [vmem:[#allocation13 + $0xa8] sm:$0xff] }
0x11e6   :  { %v6474_v35 = vadd.f32 %v2049_v29, %v1975_v26  ;;  %v2205_v26 = vld [vmem:[#allocation13 + $0x60] sm:$0xff]  ;;  %v2203_v29 = vld [vmem:[#allocation13 + $0x50] sm:$0xff] }
0x11e7   :  { %v4403_v37 = vmul.f32 -1.442695, %v2048_v50  ;;  %v4805_v50 = vpack.c.bf16 %v2214_v8, %v2210_v39  ;;  %v4819_v39 = vpack.c.bf16 %v2237_v14, %v2233_v16  ;;  %v2433_v16 = vld [vmem:[#allocation15] sm:$0xff] }
0x11e8   :  { %5339 = vtanh.f32 %v6474_v35  ;;  %v2449_v14 = vld [vmem:[#allocation16] sm:$0xff] }
0x11e9   :  { %5341 = vpow2.f32 %v4405_v44 }
0x11ea   :  { %5343 = vpow2.f32 %v4403_v37  ;;  %v2212_v37 = vld [vmem:[#allocation13 + $0x98] sm:$0xff] }
0x11ee   :  { %v5338_v30 = vpop.eup %5337 }
0x11ef   :  { %2170 = vrot.lane.b32.xlu0 %v5338_v30, %s5857_s10  ;;  %v4803_v30 = vpack.c.bf16 %v2205_v26, %v2201_v23  ;;  %v2239_v23 = vld [vmem:[#allocation13 + $0x170] sm:$0xff]  ;;  %v2242_v26 = vld [vmem:[#allocation13 + $0x188] sm:$0xff] }
0x11f2   :  { %v5340_v36 = vpop.eup %5339 }
0x11f3   :  { %2140 = vrot.lane.b32.xlu0 %v5340_v36, %s5857_s10  ;;  %v5342_v62 = vpop.eup %5341  ;;  %v2207_v36 = vld [vmem:[#allocation13 + $0x70] sm:$0xff] }
0x11f4   :  { %v2161_v41 = vadd.f32 1.0, %v5342_v62  ;;  %v5344_v20 = vpop.eup %5343  ;;  %v4835_v44 = vpack.c.bf16 %v2207_v36, %v2203_v29  ;;  %v2216_v62 = vld [vmem:[#allocation13 + $0xb8] sm:$0xff]  ;;  %v2246_v29 = vld [vmem:[#allocation13 + $0x1a8] sm:$0xff] }
0x11f5   :  { %v2131_v56 = vadd.f32 1.0, %v5344_v20  ;;  %v2213_v20 = vld [vmem:[#allocation13 + $0xa0] sm:$0xff]  ;;  %v2248_v36 = vld [vmem:[#allocation13 + $0x1b8] sm:$0xff] }
0x11f6   :  { %5345 = vrcp.f32 %v2161_v41  ;;  %v4837_v41 = vpack.c.bf16 %v2216_v62, %v2212_v37  ;;  %4836 = vmatpush1.bf16.msra.mxu1 %v4835_v44  ;;  %v4821_v44 = vpack.c.bf16 %v2246_v29, %v2242_v26  ;;  %v4406_v37 = vmul.f32 -1.442695, %v6470_v21  ;;  %v2440_v26 = vld [vmem:[#allocation15 + $0x38] sm:$0xff] }
0x11f7   :  { %5347 = vrcp.f32 %v2131_v56  ;;  %v2211_v56 = vld [vmem:[#allocation13 + $0x90] sm:$0xff]  ;;  %v4404_v62 = vmul.f32 -1.442695, %v6474_v35  ;;  %v2249_v35 = vld [vmem:[#allocation13 + $0x1c0] sm:$0xff]  ;;  %v2456_v29 = vld [vmem:[#allocation16 + $0x38] sm:$0xff] }
0x11f8   :  { %4838 = vmatprep.subr.bf16.mxu1 %v4837_v41 }
0x1200   :  { %v5346_v49 = vpop.eup %5345 }
0x1201   :  { %v5348_v24 = vpop.eup %5347  ;;  %v2168_v60 = vmul.f32 %v5346_v49, %v6453_v12  ;;  %v2198_v12 = vld [vmem:[#allocation13 + $0x28] sm:$0xff] }
0x1202   :  { %v2138_v18 = vmul.f32 %v5348_v24, %v6457_v40  ;;  %v2197_v40 = vld [vmem:[#allocation13 + $0x20] sm:$0xff] }
0x1203   :  { %v4799_v51 = vpack.c.bf16 %v2197_v40, %v2193_v59  ;;  %v2229_v59 = vld [vmem:[#allocation13 + $0x120] sm:$0xff]  ;;  %v2227_v40 = vld [vmem:[#allocation13 + $0x110] sm:$0xff] }
0x1261   :  { %v2171_v5 = vpop.permute.xlu0 %2170 }
0x1262   :  { %v2173_v17 = vmul.f32 %v5346_v49, %v2171_v5  ;;  %v2215_v49 = vld [vmem:[#allocation13 + $0xb0] sm:$0xff]  ;;  %v2218_v5 = vld [vmem:[#allocation13 + $0xc8] sm:$0xff] }
0x1264   :  { %2175 = vrot.lane.b32.xlu1 %v2173_v17, %s5857_s10  ;;  %v2222_v17 = vld [vmem:[#allocation13 + $0xe8] sm:$0xff] }
0x1265   :  { %v2141_v6 = vpop.permute.xlu0 %2140 }
0x1266   :  { %v2143_v25 = vmul.f32 %v5348_v24, %v2141_v6  ;;  %v2220_v24 = vld [vmem:[#allocation13 + $0xd8] sm:$0xff] }
0x1268   :  { %2145 = vrot.lane.b32.xlu1 %v2143_v25, %s5857_s10  ;;  %v2224_v25 = vld [vmem:[#allocation13 + $0xf8] sm:$0xff] }
0x126c   :  { %1526 = vrot.lane.b32.xlu1 %v6376_v55, %s5857_s10  ;;  %v2194_v55 = vld [vmem:[#allocation13 + $0x8] sm:$0xff] }
0x126d   :  { %v4797_v48 = vpack.c.bf16 %v2198_v12, %v2194_v55  ;;  %v2232_v55 = vld [vmem:[#allocation13 + $0x138] sm:$0xff] }
0x126f   :  { %4798 = vmatprep.subr.bf16.mxu0 %v4797_v48 }
0x1270   :  { %1970 = vrot.lane.b32.xlu1 %v1967_v7, %s5857_s10  ;;  %v2206_v7 = vld [vmem:[#allocation13 + $0x68] sm:$0xff]  ;;  %4800 = vmatpush1.bf16.msra.mxu0 %v4799_v51  ;;  %v2231_v51 = vld [vmem:[#allocation13 + $0x130] sm:$0xff] }
0x1271   :  { %v4801_v13 = vpack.c.bf16 %v2206_v7, %v2202_v53  ;;  %v2236_v53 = vld [vmem:[#allocation13 + $0x158] sm:$0xff]  ;;  %v4847_v31 = vpack.c.bf16 %v2231_v51, %v2227_v40  ;;  %v4817_v7 = vpack.c.bf16 %v2238_v27, %v2234_v2 }
0x1273   :  { %4802 = vmatprep.subr.bf16.mxu0 %v4801_v13  ;;  %v2235_v13 = vld [vmem:[#allocation13 + $0x150] sm:$0xff] }
0x1274   :  { %4804 = vmatpush1.bf16.msra.mxu0 %v4803_v30  ;;  %v2244_v30 = vld [vmem:[#allocation13 + $0x198] sm:$0xff]  ;;  %v4851_v8 = vpack.c.bf16 %v2239_v23, %v2235_v13  ;;  %v2451_v13 = vld [vmem:[#allocation16 + $0x10] sm:$0xff] }
0x1275   :  { %4806 = vmatprep.subr.bf16.mxu0 %v4805_v50  ;;  %v4853_v50 = vpack.c.bf16 %v2248_v36, %v2244_v30  ;;  %v6523_v30 = vpack.c.bf16 %v2451_v13, %v2449_v14  ;;  %v2439_v36 = vld [vmem:[#allocation15 + $0x30] sm:$0xff] }
0x12d6   :  { %v2176_v28 = vpop.permute.xlu1 %2175 }
0x12d7   :  { %v2178_v34 = vadd.f32 %v2176_v28, %v2168_v60  ;;  %v4839_v60 = vpack.c.bf16 %v2215_v49, %v2211_v56  ;;  %v4809_v28 = vpack.c.bf16 %v2222_v17, %v2218_v5  ;;  %v2241_v56 = vld [vmem:[#allocation13 + $0x180] sm:$0xff]  ;;  %v2243_v5 = vld [vmem:[#allocation13 + $0x190] sm:$0xff] }
0x12d8   :  { %v2245_v49 = vld [vmem:[#allocation13 + $0x1a0] sm:$0xff] }
0x12d9   :  { %5349 = vtanh.f32 %v2178_v34  ;;  %v2217_v34 = vld [vmem:[#allocation13 + $0xc0] sm:$0xff]  ;;  %4840 = vmatpush1.bf16.msra.mxu1 %v4839_v60  ;;  %v4823_v17 = vpack.c.bf16 %v2245_v49, %v2241_v56  ;;  %v2250_v60 = vld [vmem:[#allocation13 + $0x1c8] sm:$0xff]  ;;  %v2460_v56 = vld [vmem:[#allocation16 + $0x58] sm:$0xff] }
0x12da   :  { %v2146_v33 = vpop.permute.xlu1 %2145 }
0x12db   :  { %v2148_v4 = vadd.f32 %v2146_v33, %v2138_v18  ;;  %v2221_v18 = vld [vmem:[#allocation13 + $0xe0] sm:$0xff]  ;;  %v2219_v33 = vld [vmem:[#allocation13 + $0xd0] sm:$0xff] }
0x12dc   :  { %v4811_v12 = vpack.c.bf16 %v2221_v18, %v2217_v34  ;;  %v2252_v34 = vld [vmem:[#allocation13 + $0x1d8] sm:$0xff] }
0x12dd   :  { %5351 = vtanh.f32 %v2148_v4  ;;  %v4841_v4 = vpack.c.bf16 %v2224_v25, %v2220_v24  ;;  %v2247_v24 = vld [vmem:[#allocation13 + $0x1b0] sm:$0xff]  ;;  %v2256_v18 = vld [vmem:[#allocation13 + $0x1f8] sm:$0xff] }
0x12de   :  { %v1527_v38 = vpop.permute.xlu1 %1526  ;;  %5353 = vpow2.f32 %v4406_v37  ;;  %v2442_v37 = vld [vmem:[#allocation15 + $0x48] sm:$0xff] }
0x12df   :  { %1529 = vst.msk [vmem:[#allocation2 + $0x6] sm:$0x3] %vm648_vm2, %v1527_v38  ;;  %v2223_v38 = vld [vmem:[#allocation13 + $0xf0] sm:$0xff]  ;;  %4842 = vmatprep.subr.bf16.mxu1 %v4841_v4  ;;  %5355 = vpow2.f32 %v4404_v62  ;;  %v4857_v4 = vpack.c.bf16 %v2256_v18, %v2252_v34  ;;  %v2444_v62 = vld [vmem:[#allocation15 + $0x58] sm:$0xff] }
0x12e0   :  { %v4843_v32 = vpack.c.bf16 %v2223_v38, %v2219_v33  ;;  %v2253_v33 = vld [vmem:[#allocation13 + $0x1e0] sm:$0xff]  ;;  %v2448_v34 = vld [vmem:[#allocation15 + $0x78] sm:$0xff] }
0x12e1   :  { %v4827_v38 = vpack.c.bf16 %v2253_v33, %v2249_v35  ;;  %v2464_v18 = vld [vmem:[#allocation16 + $0x78] sm:$0xff] }
0x12e2   :  { %v1971_v54 = vpop.permute.xlu1 %1970  ;;  %4844 = vmatpush1.bf16.msra.mxu1 %v4843_v32  ;;  %v2450_v32 = vld [vmem:[#allocation16 + $0x8] sm:$0xff] }
0x12e3   :  { %v5350_v10 = vpop.eup %5349  ;;  %1973 = vst.msk [vmem:[#allocation2 + $0x2] sm:$0x3] %vm648_vm2, %v1971_v54  ;;  %v2226_v54 = vld [vmem:[#allocation13 + $0x108] sm:$0xff] }
0x12e4   :  { %2181 = vrot.lane.b32.xlu0 %v5350_v10, %s5857_s10  ;;  %v2230_v10 = vld [vmem:[#allocation13 + $0x128] sm:$0xff] }
0x12e5   :  { %v4813_v48 = vpack.c.bf16 %v2230_v10, %v2226_v54  ;;  %v2251_v54 = vld [vmem:[#allocation13 + $0x1d0] sm:$0xff] }
0x12e6   :  { %v2255_v10 = vld [vmem:[#allocation13 + $0x1f0] sm:$0xff] }
0x12e7   :  { %v5352_v3 = vpop.eup %5351 }
0x12e8   :  { %1749 = vrot.lane.b32.xlu0 %v6420_v9, %s5857_s10  ;;  %2151 = vrot.lane.b32.xlu1 %v5352_v3, %s5857_s10  ;;  %v2209_v9 = vld [vmem:[#allocation13 + $0x80] sm:$0xff]  ;;  %v2240_v3 = vld [vmem:[#allocation13 + $0x178] sm:$0xff] }
0x12e9   :  { %v4807_v6 = vpack.c.bf16 %v2213_v20, %v2209_v9  ;;  %v4849_v22 = vpack.c.bf16 %v2240_v3, %v2236_v53  ;;  %v5354_v9 = vpop.eup %5353 }
0x12ea   :  { %v2162_v41 = vadd.f32 1.0, %v5354_v9  ;;  %v5356_v20 = vpop.eup %5355 }
0x12eb   :  { %4808 = vmatpush1.bf16.msra.mxu0 %v4807_v6  ;;  %v4855_v6 = vpack.c.bf16 %v2247_v24, %v2243_v5  ;;  %v2132_v25 = vadd.f32 1.0, %v5356_v20  ;;  %v2458_v20 = vld [vmem:[#allocation16 + $0x48] sm:$0xff]  ;;  %v6540_v24 = vpack.c.bf16 %v2444_v62, %v2442_v37 }
0x12ec   :  { %869 = vrot.lane.b32.xlu1 %v6250_v46, %s5857_s10  ;;  %v2228_v46 = vld [vmem:[#allocation13 + $0x118] sm:$0xff]  ;;  %4810 = vmatprep.subr.bf16.mxu0 %v4809_v28  ;;  %5357 = vrcp.f32 %v2162_v41  ;;  %v2254_v28 = vld [vmem:[#allocation13 + $0x1e8] sm:$0xff] }
0x12ed   :  { %v4845_v52 = vpack.c.bf16 %v2232_v55, %v2228_v46  ;;  %v4825_v21 = vpack.c.bf16 %v2254_v28, %v2250_v60  ;;  %v4859_v46 = vpack.c.bf16 %v2255_v10, %v2251_v54  ;;  %5359 = vrcp.f32 %v2132_v25  ;;  %v2434_v55 = vld [vmem:[#allocation15 + $0x8] sm:$0xff]  ;;  %v2443_v25 = vld [vmem:[#allocation15 + $0x50] sm:$0xff]  ;;  %v2457_v60 = vld [vmem:[#allocation16 + $0x40] sm:$0xff] }
0x12ee   :  { %v2446_v28 = vld [vmem:[#allocation15 + $0x68] sm:$0xff]  ;;  %v2461_v54 = vld [vmem:[#allocation16 + $0x60] sm:$0xff]  ;;  %v2463_v10 = vld [vmem:[#allocation16 + $0x70] sm:$0xff] }
0x12ef   :  { %4812 = vmatpush1.bf16.msra.mxu0 %v4811_v12  ;;  %4846 = vmatprep.subr.bf16.mxu1 %v4845_v52  ;;  %v2436_v12 = vld [vmem:[#allocation15 + $0x18] sm:$0xff] }
0x12f0   :  { %1307 = vrot.lane.b32.xlu1 %v6334_v61, %s5857_s10  ;;  %v4815_v61 = vpack.c.bf16 %v2229_v59, %v2225_v57  ;;  %4814 = vmatprep.subr.bf16.mxu0 %v4813_v48  ;;  %v6500_v48 = vpack.c.bf16 %v2436_v12, %v2434_v55  ;;  %v2452_v57 = vld [vmem:[#allocation16 + $0x18] sm:$0xff] }
0x12f1   :  { %4848 = vmatpush1.bf16.msra.mxu1 %v4847_v31  ;;  %v6502_v59 = vpack.c.bf16 %v2452_v57, %v2450_v32  ;;  %v6562_v57 = vpack.c.bf16 %v2463_v10, %v2461_v54 }
0x12f2   :  { %4850 = vmatprep.subr.bf16.mxu1 %v4849_v22  ;;  %v2438_v22 = vld [vmem:[#allocation15 + $0x28] sm:$0xff] }
0x12f3   :  { %4816 = vmatpush1.bf16.msra.mxu0 %v4815_v61 }
0x12f4   :  { %4818 = vmatprep.subr.bf16.mxu0 %v4817_v7 }
0x12f5   :  { %4852 = vmatpush1.bf16.msra.mxu1 %v4851_v8  ;;  %v6525_v8 = vpack.c.bf16 %v2440_v26, %v2438_v22 }
0x12f6   :  { %4854 = vmatprep.subr.bf16.mxu1 %v4853_v50  ;;  %v5358_v40 = vpop.eup %5357  ;;  %v2455_v50 = vld [vmem:[#allocation16 + $0x30] sm:$0xff] }
0x12f7   :  { %4820 = vmatpush1.bf16.msra.mxu0 %v4819_v39  ;;  %v5360_v2 = vpop.eup %5359  ;;  %v2453_v39 = vld [vmem:[#allocation16 + $0x20] sm:$0xff] }
0x12f8   :  { %4822 = vmatprep.subr.bf16.mxu0 %v4821_v44  ;;  %v6536_v5 = vpack.c.bf16 %v2455_v50, %v2453_v39 }
0x12f9   :  { %4856 = vmatpush1.bf16.msra.mxu1 %v4855_v6  ;;  %v6542_v6 = vpack.c.bf16 %v2460_v56, %v2458_v20 }
0x12fa   :  { %4858 = vmatprep.subr.bf16.mxu1 %v4857_v4  ;;  %v2445_v4 = vld [vmem:[#allocation15 + $0x60] sm:$0xff] }
0x12fb   :  { %4824 = vmatpush1.bf16.msra.mxu0 %v4823_v17  ;;  %v2441_v17 = vld [vmem:[#allocation15 + $0x40] sm:$0xff] }
0x12fc   :  { %4826 = vmatprep.subr.bf16.mxu0 %v4825_v21  ;;  %v2462_v21 = vld [vmem:[#allocation16 + $0x68] sm:$0xff]  ;;  %v6548_v35 = vpack.c.bf16 %v2443_v25, %v2441_v17 }
0x12fd   :  { %4860 = vmatpush1.bf16.msra.mxu1 %v4859_v46  ;;  %v6554_v46 = vpack.c.bf16 %v2448_v34, %v2446_v28  ;;  %v6556_v55 = vpack.c.bf16 %v2464_v18, %v2462_v21 }
0x12fe   :  { %4878 = vmatprep.subr.bf16.mxu1 %v6502_v59 }
0x12ff   :  { %4828 = vmatpush1.bf16.msra.mxu0 %v4827_v38  ;;  %v2447_v38 = vld [vmem:[#allocation15 + $0x70] sm:$0xff] }
0x1300   :  { %4862 = vmatprep.subr.bf16.mxu0 %v6500_v48  ;;  %v6560_v32 = vpack.c.bf16 %v2447_v38, %v2445_v4 }
0x1356   :  { %v2182_v52 = vpop.permute.xlu0 %2181 }
0x1357   :  { %v2184_v51 = vmul.f32 %v5358_v40, %v2182_v52  ;;  %v2257_v40 = vld [vmem:[#allocation18] sm:$0xf] }
0x1358   :  { %v2270_v52 = vrot.slane %v2257_v40, %v228_v63 }
0x1359   :  { %2187 = vrot.lane.b32.xlu0 %v2184_v51, %s5857_s10  ;;  %v2274_v51 = vrot.slane %v2257_v40, %v232_v1 }
0x135a   :  { %v1750_v27 = vpop.permute.xlu0 %1749  ;;  %v2152_v53 = vpop.permute.xlu1 %2151 }
0x135b   :  { %1752 = vst.msk [vmem:[#allocation2 + $0x4] sm:$0x3] %vm648_vm2, %v1750_v27  ;;  %v2154_v3 = vmul.f32 %v5360_v2, %v2152_v53 }
0x135d   :  { %645 = vrot.lane.b32.xlu0 %v6219_v19, %s5857_s10  ;;  %v2435_v19 = vld [vmem:[#allocation15 + $0x10] sm:$0xff] }
0x135e   :  { %v870_v61 = vpop.permute.xlu1 %869 }
0x135f   :  { %872 = vst.msk [vmem:[#allocation2 + $0xc] sm:$0x3] %vm648_vm2, %v870_v61 }
0x1360   :  { %1968 = vst.msk [vmem:[#allocation2 + $0xc] sm:$0x3] %vm642_vm1, %v6464_v58  ;;  %v2454_v58 = vld [vmem:[#allocation16 + $0x28] sm:$0xff] }
0x1361   :  { %1090 = vrot.lane.b32.xlu0 %v6292_v11, %s5857_s10  ;;  %v6521_v11 = vpack.c.bf16 %v2435_v19, %v2433_v16  ;;  %v6527_v44 = vpack.c.bf16 %v2456_v29, %v2454_v58  ;;  %v2266_v16 = vrot.slane %v2257_v40, %v224_v47 }
0x1362   :  { %v1308_v31 = vpop.permute.xlu1 %1307 }
0x1363   :  { %1310 = vst.msk [vmem:[#allocation2 + $0x8] sm:$0x3] %vm648_vm2, %v1308_v31 }
0x1364   :  { %1524 = vst.msk [vmem:[#allocation2 + $0x8] sm:$0x3] %vm642_vm1, %v6382_v42  ;;  %v2437_v42 = vld [vmem:[#allocation15 + $0x20] sm:$0xff] }
0x1365   :  { %v6534_v49 = vpack.c.bf16 %v2439_v36, %v2437_v42 }
0x13cb   :  { %v2188_v7 = vpop.permute.xlu0 %2187 }
0x13cc   :  { %2190 = vst.msk [vmem:[#allocation2] sm:$0x3] %vm648_vm2, %v2188_v7  ;;  %v2262_v7 = vrot.slane %v2257_v40, %v220_v45 }
0x13cf   :  { %v646_v23 = vpop.permute.xlu0 %645 }
0x13d0   :  { %649 = vst.msk [vmem:[#allocation2 + $0xe] sm:$0x3] %vm648_vm2, %v646_v23 }
0x13d1   :  { %2185 = vst.msk [vmem:[#allocation2 + $0xe] sm:$0x3] %vm642_vm1, %v2154_v3 }
0x13d3   :  { %v1091_v9 = vpop.permute.xlu0 %1090  ;;  %v2191_v41 = vld [vmem:[#allocation2] sm:$0xff] }
0x13d4   :  { %1093 = vst.msk [vmem:[#allocation2 + $0xa] sm:$0x3] %vm648_vm2, %v1091_v9  ;;  %2344 = vmatmul.mubr.f32.vlgmr.msra.gmra.mrb[16].mxu0 %v2191_v41  ;;  %2421 = vmatmul.mubr.f32.vlgmr.msra.gmra.mrb[24].mxu1 %v2191_v41 }
0x13d5   :  { %1747 = vst.msk [vmem:[#allocation2 + $0xa] sm:$0x3] %vm642_vm1, %v6426_v15  ;;  %4864 = vmatpush1.bf16.msra.mxu0 %v6521_v11  ;;  %4880 = vmatpush1.bf16.msra.mxu1 %v6523_v30  ;;  %v2459_v15 = vld [vmem:[#allocation16 + $0x50] sm:$0xff] }
0x13d6   :  { %4866 = vmatprep.subr.bf16.mxu0 %v6525_v8  ;;  %4882 = vmatprep.subr.bf16.mxu1 %v6527_v44  ;;  %v6550_v33 = vpack.c.bf16 %v2459_v15, %v2457_v60 }
0x13d7   :  { %2349 = vmatprep.mubr.f32.mxu0 %v5856_v0  ;;  %2426 = vmatprep.mubr.f32.mxu1 %v5856_v0 }
0x13d9   :  { %4868 = vmatpush1.bf16.msra.mxu0 %v6534_v49  ;;  %4884 = vmatpush1.bf16.msra.mxu1 %v6536_v5 }
0x13da   :  { %4870 = vmatprep.subr.bf16.mxu0 %v6540_v24  ;;  %4886 = vmatprep.subr.bf16.mxu1 %v6542_v6 }
0x13dc   :  { %v2192_v12 = vld [vmem:[#allocation2 + $0x8] sm:$0xff] }
0x13dd   :  { %4872 = vmatpush1.bf16.msra.mxu0 %v6548_v35  ;;  %4888 = vmatpush1.bf16.msra.mxu1 %v6550_v33 }
0x13de   :  { %2350 = vmatmul.mubr.f32.gmra.mrb[18].mxu0 %v2192_v12  ;;  %2427 = vmatmul.mubr.f32.gmra.mrb[26].mxu1 %v2192_v12 }
0x13df   :  { %4874 = vmatprep.subr.bf16.mxu0 %v6554_v46  ;;  %4890 = vmatprep.subr.bf16.mxu1 %v6556_v55 }
0x13e0   :  { %2529 = vmatprep.mubr.f32.mxu0 %v5856_v0  ;;  %2606 = vmatprep.mubr.f32.mxu1 %v5856_v0 }
0x13e1   :  { %4876 = vmatpush1.bf16.msra.mxu0 %v6560_v32  ;;  %4892 = vmatpush1.bf16.msra.mxu1 %v6562_v57 }
0x13e2   :  { %4894 = vmatprep.subr.bf16.mxu0 %v6500_v48  ;;  %4910 = vmatprep.subr.bf16.mxu1 %v6502_v59 }
0x13e4   :  { %2530 = vmatmul.mubr.f32.vlgmr.msra.gmra.mrb[20].mxu0 %v5856_v0  ;;  %2607 = vmatmul.mubr.f32.vlgmr.msra.gmra.mrb[28].mxu1 %v5856_v0 }
0x13e5   :  { %4896 = vmatpush1.bf16.msra.mxu0 %v6521_v11  ;;  %4912 = vmatpush1.bf16.msra.mxu1 %v6523_v30 }
0x13e6   :  { %4898 = vmatprep.subr.bf16.mxu0 %v6525_v8  ;;  %4914 = vmatprep.subr.bf16.mxu1 %v6527_v44 }
0x13e7   :  { %2752 = vmatprep.mubr.f32.mxu0 %v5856_v0  ;;  %2829 = vmatprep.mubr.f32.mxu1 %v5856_v0 }
0x13e9   :  { %4900 = vmatpush1.bf16.msra.mxu0 %v6534_v49  ;;  %4916 = vmatpush1.bf16.msra.mxu1 %v6536_v5 }
0x13ea   :  { %4902 = vmatprep.subr.bf16.mxu0 %v6540_v24  ;;  %4918 = vmatprep.subr.bf16.mxu1 %v6542_v6 }
0x13ed   :  { %4904 = vmatpush1.bf16.msra.mxu0 %v6548_v35  ;;  %4920 = vmatpush1.bf16.msra.mxu1 %v6550_v33 }
0x13ee   :  { %4906 = vmatprep.subr.bf16.mxu0 %v6554_v46  ;;  %4922 = vmatprep.subr.bf16.mxu1 %v6556_v55 }
0x13f1   :  { %4924 = vmatpush1.bf16.msra.mxu1 %v6562_v57  ;;  %4908 = vmatpush1.bf16.msra.mxu0 %v6560_v32 }
0x13f2   :  { %4926 = vmatprep.subr.bf16.mxu0 %v6500_v48  ;;  %4942 = vmatprep.subr.bf16.mxu1 %v6502_v59 }
0x14a7   :  { %v2345_v2 = vpop.f32.mrb[16].mxu0  ;;  %v2422_v27 = vpop.f32.mrb[24].mxu1 }
0x14a8   :  { %v6596_v53 = vadd.f32 %v2422_v27, %v2270_v52  ;;  %v2347_v3 = vpop.f32.mrb[17].mxu0  ;;  %v2424_v61 = vpop.f32.mrb[25].mxu1  ;;  %v6608_v23 = vadd.f32 %v2345_v2, %v2262_v7 }
0x14a9   :  { %v6598_v31 = vadd.f32 %v2424_v61, %v2274_v51  ;;  %v6612_v58 = vadd.f32 %v2347_v3, %v2266_v16 }
0x14b1   :  { %v2351_v19 = vpop.f32.mrb[18].mxu0  ;;  %v2428_v14 = vpop.f32.mrb[26].mxu1 }
0x14b2   :  { %v6604_v63 = vadd.f32 %v2351_v19, %v2262_v7  ;;  %v2353_v13 = vpop.f32.mrb[19].mxu0  ;;  %v2430_v1 = vpop.f32.mrb[27].mxu1  ;;  %v6619_v9 = vadd.f32 %v2428_v14, %v2270_v52 }
0x14b3   :  { %v6606_v22 = vadd.f32 %v2353_v13, %v2266_v16  ;;  %v6610_v26 = vadd.f32 %v2430_v1, %v2274_v51 }
0x14b4   :  { %v2538_v41 = vrot.slane %v6619_v9, 6 }
0x14b5   :  { %v2539_v39 = vrot.slane %v6610_v26, 6 }
0x14b7   :  { %v2531_v29 = vpop.f32.mrb[20].mxu0  ;;  %v2608_v42 = vpop.f32.mrb[28].mxu1 }
0x14b8   :  { %v2532_v45 = vadd.f32 %v2531_v29, %v6608_v23  ;;  %v2533_v43 = vpop.f32.mrb[21].mxu0  ;;  %v2610_v47 = vpop.f32.mrb[29].mxu1  ;;  %v2609_v56 = vadd.f32 %v2608_v42, %v2538_v41 }
0x14b9   :  { %v2534_v36 = vadd.f32 %v2533_v43, %v6612_v58  ;;  %v2611_v50 = vadd.f32 %v2610_v47, %v2539_v39 }
0x14ba   :  { %v4407_v20 = vmul.f32 -1.442695, %v2532_v45  ;;  %v4409_v17 = vmul.f32 -1.442695, %v2609_v56  ;;  %v2760_v56 = vrot.slane %v6610_v26, 4 }
0x14bb   :  { %5361 = vtanh.f32 %v2534_v36  ;;  %v4408_v61 = vmul.f32 -1.442695, %v2534_v36  ;;  %v4410_v7 = vmul.f32 -1.442695, %v2611_v50  ;;  %v2681_v36 = vrot.slane %v6608_v23, 2 }
0x14bc   :  { %5363 = vtanh.f32 %v2611_v50  ;;  %v2682_v50 = vrot.slane %v6612_v58, 2 }
0x14bd   :  { %5365 = vpow2.f32 %v4407_v20 }
0x14be   :  { %5367 = vpow2.f32 %v4409_v17 }
0x14c5   :  { %v5362_v37 = vpop.eup %5361 }
0x14c6   :  { %2628 = vrot.lane.b32.xlu1 %v5362_v37, %s5857_s10  ;;  %v5364_v62 = vpop.eup %5363 }
0x14c7   :  { %2658 = vrot.lane.b32.xlu0 %v5364_v62, %s5857_s10  ;;  %v5366_v25 = vpop.eup %5365 }
0x14c8   :  { %v2619_v60 = vadd.f32 1.0, %v5366_v25  ;;  %v5368_v15 = vpop.eup %5367 }
0x14c9   :  { %v2649_v28 = vadd.f32 1.0, %v5368_v15 }
0x14ca   :  { %5369 = vrcp.f32 %v2619_v60 }
0x14cb   :  { %5371 = vrcp.f32 %v2649_v28  ;;  %v2759_v28 = vrot.slane %v6619_v9, 4 }
0x14d4   :  { %v5370_v34 = vpop.eup %5369 }
0x14d5   :  { %v5372_v4 = vpop.eup %5371  ;;  %v2626_v10 = vmul.f32 0.0, %v5370_v34 }
0x14d6   :  { %v2656_v52 = vmul.f32 0.0, %v5372_v4 }
0x1538   :  { %v2629_v21 = vpop.permute.xlu1 %2628 }
0x1539   :  { %v2631_v18 = vmul.f32 %v5370_v34, %v2629_v21  ;;  %v2659_v38 = vpop.permute.xlu0 %2658 }
0x153a   :  { %v2661_v54 = vmul.f32 %v5372_v4, %v2659_v38 }
0x153b   :  { %2633 = vrot.lane.b32.xlu1 %v2631_v18, %s5857_s10 }
0x153c   :  { %2663 = vrot.lane.b32.xlu0 %v2661_v54, %s5857_s10 }
0x15ad   :  { %v2634_v12 = vpop.permute.xlu1 %2633 }
0x15ae   :  { %v6624_v40 = vadd.f32 %v2634_v12, %v2626_v10  ;;  %v2664_v51 = vpop.permute.xlu0 %2663 }
0x15af   :  { %v6627_v2 = vadd.f32 %v2664_v51, %v2656_v52 }
0x15b0   :  { %5373 = vtanh.f32 %v6624_v40 }
0x15b1   :  { %5375 = vtanh.f32 %v6627_v2 }
0x15b2   :  { %5377 = vpow2.f32 %v4408_v61 }
0x15b3   :  { %5379 = vpow2.f32 %v4410_v7 }
0x15ba   :  { %v5374_v27 = vpop.eup %5373 }
0x15bb   :  { %2639 = vrot.lane.b32.xlu1 %v5374_v27, %s5857_s10  ;;  %v5376_v3 = vpop.eup %5375 }
0x15bc   :  { %2669 = vrot.lane.b32.xlu0 %v5376_v3, %s5857_s10  ;;  %v5378_v16 = vpop.eup %5377 }
0x15bd   :  { %v2620_v19 = vadd.f32 1.0, %v5378_v16  ;;  %v5380_v14 = vpop.eup %5379 }
0x15be   :  { %v2650_v13 = vadd.f32 1.0, %v5380_v14 }
0x15bf   :  { %5381 = vrcp.f32 %v2620_v19 }
0x15c0   :  { %5383 = vrcp.f32 %v2650_v13 }
0x15c9   :  { %v5382_v1 = vpop.eup %5381 }
0x15ca   :  { %v5384_v45 = vpop.eup %5383 }
0x162d   :  { %v2640_v29 = vpop.permute.xlu1 %2639 }
0x162e   :  { %v2642_v42 = vmul.f32 %v5382_v1, %v2640_v29  ;;  %v2670_v43 = vpop.permute.xlu0 %2669 }
0x162f   :  { %v6637_v47 = vmul.f32 %v5384_v45, %v2670_v43 }
0x1630   :  { %2673 = vst.msk [vmem:[#allocation3] sm:$0x3] %vm642_vm1, %v2642_v42  ;;  %4411 = vmatmul.mubr.msk.f32.vlgmr.msra.gmra.mrb[22].mxu0 %vm238_vm0, %v2642_v42 }
0x1631   :  { %4928 = vmatpush1.bf16.msra.mxu0 %v6521_v11  ;;  %2973 = vmatprep.mubr.f32.mxu0 %v5856_v0 }
0x1632   :  { %4930 = vmatprep.subr.bf16.mxu0 %v6525_v8  ;;  %4412 = vmatmul.mubr.msk.f32.vlgmr.msra.gmra.mrb[30].mxu1 %vm238_vm0, %v6637_v47 }
0x1633   :  { %4944 = vmatpush1.bf16.msra.mxu1 %v6523_v30  ;;  %3050 = vmatprep.mubr.f32.mxu1 %v5856_v0 }
0x1634   :  { %4946 = vmatprep.subr.bf16.mxu1 %v6527_v44 }
0x1635   :  { %4932 = vmatpush1.bf16.msra.mxu0 %v6534_v49 }
0x1636   :  { %4934 = vmatprep.subr.bf16.mxu0 %v6540_v24 }
0x1637   :  { %4948 = vmatpush1.bf16.msra.mxu1 %v6536_v5 }
0x1638   :  { %4950 = vmatprep.subr.bf16.mxu1 %v6542_v6 }
0x1639   :  { %4936 = vmatpush1.bf16.msra.mxu0 %v6548_v35 }
0x163a   :  { %4938 = vmatprep.subr.bf16.mxu0 %v6554_v46 }
0x163b   :  { %4952 = vmatpush1.bf16.msra.mxu1 %v6550_v33 }
0x163c   :  { %4954 = vmatprep.subr.bf16.mxu1 %v6556_v55 }
0x163d   :  { %4940 = vmatpush1.bf16.msra.mxu0 %v6560_v32 }
0x163e   :  { %4958 = vmatprep.subr.bf16.mxu0 %v6500_v48 }
0x163f   :  { %4956 = vmatpush1.bf16.msra.mxu1 %v6562_v57 }
0x1640   :  { %4974 = vmatprep.subr.bf16.mxu1 %v6502_v59 }
0x1703   :  { %v2754_v39 = vpop.f32.mrb[22].mxu0 }
0x1704   :  { %v2755_v37 = vadd.f32 %v2754_v39, %v2681_v36  ;;  %v2756_v62 = vpop.f32.mrb[23].mxu0 }
0x1705   :  { %v2757_v41 = vadd.f32 %v2756_v62, %v2682_v50  ;;  %v2831_v20 = vpop.f32.mrb[30].mxu1 }
0x1706   :  { %v2833_v17 = vpop.f32.mrb[31].mxu1  ;;  %v4413_v34 = vmul.f32 -1.442695, %v2755_v37  ;;  %v2832_v21 = vadd.f32 %v2831_v20, %v2759_v28 }
0x1707   :  { %5385 = vtanh.f32 %v2757_v41  ;;  %v2834_v25 = vadd.f32 %v2833_v17, %v2760_v56  ;;  %v4414_v45 = vmul.f32 -1.442695, %v2757_v41  ;;  %v2902_v17 = vrot.slane %v6608_v23, 4 }
0x1708   :  { %v4415_v18 = vmul.f32 -1.442695, %v2832_v21 }
0x1709   :  { %5387 = vtanh.f32 %v2834_v25 }
0x170a   :  { %5389 = vpow2.f32 %v4413_v34 }
0x170b   :  { %5391 = vpow2.f32 %v4415_v18  ;;  %v2981_v18 = vrot.slane %v6610_v26, 2 }
0x1711   :  { %v5386_v60 = vpop.eup %5385 }
0x1712   :  { %2851 = vrot.lane.b32.xlu1 %v5386_v60, %s5857_s10  ;;  %v2903_v60 = vrot.slane %v6612_v58, 4 }
0x1713   :  { %v5388_v15 = vpop.eup %5387 }
0x1714   :  { %2881 = vrot.lane.b32.xlu0 %v5388_v15, %s5857_s10  ;;  %v5390_v4 = vpop.eup %5389 }
0x1715   :  { %v2842_v38 = vadd.f32 1.0, %v5390_v4  ;;  %v5392_v54 = vpop.eup %5391 }
0x1716   :  { %v2872_v10 = vadd.f32 1.0, %v5392_v54 }
0x1717   :  { %5393 = vrcp.f32 %v2842_v38 }
0x1718   :  { %5395 = vrcp.f32 %v2872_v10 }
0x1721   :  { %v5394_v12 = vpop.eup %5393 }
0x1722   :  { %v5396_v27 = vpop.eup %5395  ;;  %v2849_v7 = vmul.f32 %v5394_v12, %v6624_v40  ;;  %v4416_v40 = vmul.f32 -1.442695, %v2834_v25 }
0x1723   :  { %v2879_v14 = vmul.f32 %v5396_v27, %v6627_v2 }
0x1784   :  { %v2852_v52 = vpop.permute.xlu1 %2851 }
0x1785   :  { %v2854_v51 = vmul.f32 %v5394_v12, %v2852_v52  ;;  %v2980_v12 = vrot.slane %v6619_v9, 2 }
0x1786   :  { %v2882_v3 = vpop.permute.xlu0 %2881 }
0x1787   :  { %2856 = vrot.lane.b32.xlu1 %v2854_v51, %s5857_s10  ;;  %v2884_v61 = vmul.f32 %v5396_v27, %v2882_v3 }
0x1789   :  { %2886 = vrot.lane.b32.xlu0 %v2884_v61, %s5857_s10 }
0x17f9   :  { %v2857_v16 = vpop.permute.xlu1 %2856 }
0x17fa   :  { %v6665_v19 = vadd.f32 %v2857_v16, %v2849_v7 }
0x17fb   :  { %v2887_v13 = vpop.permute.xlu0 %2886 }
0x17fc   :  { %5397 = vtanh.f32 %v6665_v19  ;;  %v6669_v1 = vadd.f32 %v2887_v13, %v2879_v14 }
0x17fe   :  { %5399 = vtanh.f32 %v6669_v1 }
0x17ff   :  { %5401 = vpow2.f32 %v4414_v45 }
0x1800   :  { %5403 = vpow2.f32 %v4416_v40 }
0x1806   :  { %v5398_v29 = vpop.eup %5397 }
0x1807   :  { %2862 = vrot.lane.b32.xlu1 %v5398_v29, %s5857_s10 }
0x1808   :  { %v5400_v42 = vpop.eup %5399 }
0x1809   :  { %2892 = vrot.lane.b32.xlu0 %v5400_v42, %s5857_s10  ;;  %v5402_v43 = vpop.eup %5401 }
0x180a   :  { %v2843_v36 = vadd.f32 1.0, %v5402_v43  ;;  %v5404_v39 = vpop.eup %5403 }
0x180b   :  { %v2873_v2 = vadd.f32 1.0, %v5404_v39 }
0x180c   :  { %5405 = vrcp.f32 %v2843_v36 }
0x180d   :  { %5407 = vrcp.f32 %v2873_v2 }
0x1816   :  { %v5406_v50 = vpop.eup %5405 }
0x1817   :  { %v5408_v41 = vpop.eup %5407 }
0x1879   :  { %v2863_v37 = vpop.permute.xlu1 %2862 }
0x187a   :  { %v2865_v62 = vmul.f32 %v5406_v50, %v2863_v37 }
0x187b   :  { %v2893_v20 = vpop.permute.xlu0 %2892 }
0x187c   :  { %2896 = vst.msk [vmem:[#allocation3 + $0x2] sm:$0x3] %vm642_vm1, %v2865_v62  ;;  %4417 = vmatmul.mubr.msk.f32.vlgmr.msra.gmra.mrb[24].mxu0 %vm238_vm0, %v2865_v62  ;;  %v6679_v56 = vmul.f32 %v5408_v41, %v2893_v20 }
0x187d   :  { %4960 = vmatpush1.bf16.msra.mxu0 %v6521_v11  ;;  %3194 = vmatprep.mubr.f32.mxu0 %v5856_v0 }
0x187e   :  { %4962 = vmatprep.subr.bf16.mxu0 %v6525_v8  ;;  %4418 = vmatmul.mubr.msk.f32.vlgmr.msra.gmra.mrb[32].mxu1 %vm238_vm0, %v6679_v56 }
0x187f   :  { %4976 = vmatpush1.bf16.msra.mxu1 %v6523_v30  ;;  %3267 = vmatprep.mubr.f32.mxu1 %v5856_v0 }
0x1880   :  { %4978 = vmatprep.subr.bf16.mxu1 %v6527_v44 }
0x1881   :  { %4964 = vmatpush1.bf16.msra.mxu0 %v6534_v49 }
0x1882   :  { %4966 = vmatprep.subr.bf16.mxu0 %v6540_v24 }
0x1883   :  { %4980 = vmatpush1.bf16.msra.mxu1 %v6536_v5 }
0x1884   :  { %4982 = vmatprep.subr.bf16.mxu1 %v6542_v6 }
0x1885   :  { %4968 = vmatpush1.bf16.msra.mxu0 %v6548_v35 }
0x1886   :  { %4970 = vmatprep.subr.bf16.mxu0 %v6554_v46 }
0x1887   :  { %4984 = vmatpush1.bf16.msra.mxu1 %v6550_v33 }
0x1888   :  { %4986 = vmatprep.subr.bf16.mxu1 %v6556_v55 }
0x1889   :  { %4972 = vmatpush1.bf16.msra.mxu0 %v6560_v32 }
0x188a   :  { %4990 = vmatprep.subr.bf16.mxu0 %v6500_v48 }
0x188b   :  { %4988 = vmatpush1.bf16.msra.mxu1 %v6562_v57 }
0x188c   :  { %5006 = vmatprep.subr.bf16.mxu1 %v6502_v59 }
0x194f   :  { %v2975_v25 = vpop.f32.mrb[24].mxu0 }
0x1950   :  { %v2976_v15 = vadd.f32 %v2975_v25, %v2902_v17  ;;  %v2977_v28 = vpop.f32.mrb[25].mxu0 }
0x1951   :  { %v2978_v34 = vadd.f32 %v2977_v28, %v2903_v60  ;;  %v3052_v21 = vpop.f32.mrb[32].mxu1 }
0x1952   :  { %v3054_v4 = vpop.f32.mrb[33].mxu1  ;;  %v4419_v52 = vmul.f32 -1.442695, %v2976_v15  ;;  %v3053_v51 = vadd.f32 %v3052_v21, %v2980_v12 }
0x1953   :  { %5409 = vtanh.f32 %v2978_v34  ;;  %v3055_v38 = vadd.f32 %v3054_v4, %v2981_v18  ;;  %v4420_v20 = vmul.f32 -1.442695, %v2978_v34 }
0x1954   :  { %v4421_v27 = vmul.f32 -1.442695, %v3053_v51 }
0x1955   :  { %5411 = vtanh.f32 %v3055_v38 }
0x1956   :  { %5413 = vpow2.f32 %v4419_v52 }
0x1957   :  { %5415 = vpow2.f32 %v4421_v27 }
0x195d   :  { %v5410_v54 = vpop.eup %5409 }
0x195e   :  { %3072 = vrot.lane.b32.xlu1 %v5410_v54, %s5857_s10 }
0x195f   :  { %v5412_v10 = vpop.eup %5411 }
0x1960   :  { %3102 = vrot.lane.b32.xlu0 %v5412_v10, %s5857_s10  ;;  %v5414_v3 = vpop.eup %5413  ;;  %v3124_v10 = vrot.slane %v6612_v58, 6 }
0x1961   :  { %v3063_v61 = vadd.f32 1.0, %v5414_v3  ;;  %v5416_v7 = vpop.eup %5415 }
0x1962   :  { %v3093_v16 = vadd.f32 1.0, %v5416_v7 }
0x1963   :  { %5417 = vrcp.f32 %v3063_v61 }
0x1964   :  { %5419 = vrcp.f32 %v3093_v16 }
0x196d   :  { %v5418_v14 = vpop.eup %5417 }
0x196e   :  { %v5420_v42 = vpop.eup %5419  ;;  %v3070_v43 = vmul.f32 %v5418_v14, %v6665_v19  ;;  %v4422_v19 = vmul.f32 -1.442695, %v3055_v38  ;;  %v3123_v38 = vrot.slane %v6608_v23, 6 }
0x196f   :  { %v3100_v2 = vmul.f32 %v5420_v42, %v6669_v1 }
0x19d0   :  { %v3073_v13 = vpop.permute.xlu1 %3072 }
0x19d1   :  { %v3075_v29 = vmul.f32 %v5418_v14, %v3073_v13 }
0x19d2   :  { %v3103_v45 = vpop.permute.xlu0 %3102 }
0x19d3   :  { %3077 = vrot.lane.b32.xlu1 %v3075_v29, %s5857_s10  ;;  %v3105_v40 = vmul.f32 %v5420_v42, %v3103_v45 }
0x19d5   :  { %3107 = vrot.lane.b32.xlu0 %v3105_v40, %s5857_s10 }
0x1a45   :  { %v3078_v36 = vpop.permute.xlu1 %3077 }
0x1a46   :  { %v6707_v39 = vadd.f32 %v3078_v36, %v3070_v43 }
0x1a47   :  { %v3108_v50 = vpop.permute.xlu0 %3107 }
0x1a48   :  { %5421 = vtanh.f32 %v6707_v39  ;;  %v6711_v37 = vadd.f32 %v3108_v50, %v3100_v2 }
0x1a4a   :  { %5423 = vtanh.f32 %v6711_v37 }
0x1a4b   :  { %5425 = vpow2.f32 %v4420_v20 }
0x1a4c   :  { %5427 = vpow2.f32 %v4422_v19 }
0x1a52   :  { %v5422_v62 = vpop.eup %5421 }
0x1a53   :  { %3083 = vrot.lane.b32.xlu1 %v5422_v62, %s5857_s10 }
0x1a54   :  { %v5424_v41 = vpop.eup %5423 }
0x1a55   :  { %3113 = vrot.lane.b32.xlu0 %v5424_v41, %s5857_s10  ;;  %v5426_v17 = vpop.eup %5425 }
0x1a56   :  { %v3064_v25 = vadd.f32 1.0, %v5426_v17  ;;  %v5428_v60 = vpop.eup %5427 }
0x1a57   :  { %v3094_v1 = vadd.f32 1.0, %v5428_v60 }
0x1a58   :  { %5429 = vrcp.f32 %v3064_v25 }
0x1a59   :  { %5431 = vrcp.f32 %v3094_v1 }
0x1a62   :  { %v5430_v15 = vpop.eup %5429 }
0x1a63   :  { %v5432_v34 = vpop.eup %5431 }
0x1ac5   :  { %v3084_v28 = vpop.permute.xlu1 %3083 }
0x1ac6   :  { %v3086_v21 = vmul.f32 %v5430_v15, %v3084_v28 }
0x1ac7   :  { %v3114_v18 = vpop.permute.xlu0 %3113 }
0x1ac8   :  { %3117 = vst.msk [vmem:[#allocation3 + $0x4] sm:$0x3] %vm642_vm1, %v3086_v21  ;;  %4423 = vmatmul.mubr.msk.f32.vlgmr.msra.gmra.mrb[26].mxu0 %vm238_vm0, %v3086_v21  ;;  %v6721_v4 = vmul.f32 %v5432_v34, %v3114_v18 }
0x1ac9   :  { %4992 = vmatpush1.bf16.msra.mxu0 %v6521_v11  ;;  %3407 = vmatprep.mubr.f32.mxu0 %v5856_v0 }
0x1aca   :  { %4994 = vmatprep.subr.bf16.mxu0 %v6525_v8  ;;  %4424 = vmatmul.mubr.msk.f32.vlgmr.msra.gmra.mrb[34].mxu1 %vm238_vm0, %v6721_v4 }
0x1acb   :  { %5008 = vmatpush1.bf16.msra.mxu1 %v6523_v30  ;;  %3486 = vmatprep.mubr.f32.mxu1 %v5856_v0 }
0x1acc   :  { %5010 = vmatprep.subr.bf16.mxu1 %v6527_v44 }
0x1acd   :  { %4996 = vmatpush1.bf16.msra.mxu0 %v6534_v49 }
0x1ace   :  { %4998 = vmatprep.subr.bf16.mxu0 %v6540_v24 }
0x1acf   :  { %5012 = vmatpush1.bf16.msra.mxu1 %v6536_v5 }
0x1ad0   :  { %5014 = vmatprep.subr.bf16.mxu1 %v6542_v6 }
0x1ad1   :  { %5000 = vmatpush1.bf16.msra.mxu0 %v6548_v35 }
0x1ad2   :  { %5002 = vmatprep.subr.bf16.mxu0 %v6554_v46 }
0x1ad3   :  { %5016 = vmatpush1.bf16.msra.mxu1 %v6550_v33 }
0x1ad4   :  { %5018 = vmatprep.subr.bf16.mxu1 %v6556_v55 }
0x1ad5   :  { %5004 = vmatpush1.bf16.msra.mxu0 %v6560_v32 }
0x1ad6   :  { %5022 = vmatprep.subr.bf16.mxu0 %v6500_v48 }
0x1ad7   :  { %5020 = vmatpush1.bf16.msra.mxu1 %v6562_v57 }
0x1ad8   :  { %5038 = vmatprep.subr.bf16.mxu1 %v6502_v59 }
0x1b9b   :  { %v3196_v54 = vpop.f32.mrb[26].mxu0 }
0x1b9c   :  { %v3197_v12 = vadd.f32 %v3196_v54, %v3123_v38  ;;  %v3198_v52 = vpop.f32.mrb[27].mxu0 }
0x1b9d   :  { %v3199_v51 = vadd.f32 %v3198_v52, %v3124_v10  ;;  %v3269_v27 = vpop.f32.mrb[34].mxu1 }
0x1b9e   :  { %v3271_v3 = vpop.f32.mrb[35].mxu1  ;;  %v4425_v14 = vmul.f32 -1.442695, %v3197_v12  ;;  %v3270_v23 = vadd.f32 %v3269_v27, %v6619_v9 }
0x1b9f   :  { %5433 = vtanh.f32 %v3199_v51  ;;  %v3272_v61 = vadd.f32 %v3271_v3, %v6610_v26  ;;  %v4426_v1 = vmul.f32 -1.442695, %v3199_v51 }
0x1ba0   :  { %v4427_v58 = vmul.f32 -1.442695, %v3270_v23 }
0x1ba1   :  { %5435 = vtanh.f32 %v3272_v61 }
0x1ba2   :  { %5437 = vpow2.f32 %v4425_v14 }
0x1ba3   :  { %5439 = vpow2.f32 %v4427_v58 }
0x1ba9   :  { %v5434_v7 = vpop.eup %5433 }
0x1baa   :  { %3289 = vrot.lane.b32.xlu1 %v5434_v7, %s5857_s10 }
0x1bab   :  { %v5436_v16 = vpop.eup %5435 }
0x1bac   :  { %3319 = vrot.lane.b32.xlu0 %v5436_v16, %s5857_s10  ;;  %v5438_v13 = vpop.eup %5437 }
0x1bad   :  { %v3280_v29 = vadd.f32 1.0, %v5438_v13  ;;  %v5440_v42 = vpop.eup %5439  ;;  %v3416_v13 = vrot.slane %v6596_v53, 6 }
0x1bae   :  { %v3310_v45 = vadd.f32 1.0, %v5440_v42 }
0x1baf   :  { %5441 = vrcp.f32 %v3280_v29 }
0x1bb0   :  { %5443 = vrcp.f32 %v3310_v45 }
0x1bb9   :  { %v5442_v26 = vpop.eup %5441 }
0x1bba   :  { %v5444_v36 = vpop.eup %5443  ;;  %v3287_v9 = vmul.f32 %v5442_v26, %v6707_v39  ;;  %v4428_v39 = vmul.f32 -1.442695, %v3272_v61  ;;  %v3417_v61 = vrot.slane %v6598_v31, 6 }
0x1bbb   :  { %v3317_v20 = vmul.f32 %v5444_v36, %v6711_v37 }
0x1c1c   :  { %v3290_v40 = vpop.permute.xlu1 %3289 }
0x1c1d   :  { %v3292_v43 = vmul.f32 %v5442_v26, %v3290_v40 }
0x1c1e   :  { %v3320_v2 = vpop.permute.xlu0 %3319 }
0x1c1f   :  { %3294 = vrot.lane.b32.xlu1 %v3292_v43, %s5857_s10  ;;  %v3322_v50 = vmul.f32 %v5444_v36, %v3320_v2 }
0x1c21   :  { %3324 = vrot.lane.b32.xlu0 %v3322_v50, %s5857_s10 }
0x1c91   :  { %v3295_v62 = vpop.permute.xlu1 %3294 }
0x1c92   :  { %v6749_v41 = vadd.f32 %v3295_v62, %v3287_v9 }
0x1c93   :  { %v3325_v19 = vpop.permute.xlu0 %3324 }
0x1c94   :  { %5445 = vtanh.f32 %v6749_v41  ;;  %v6753_v17 = vadd.f32 %v3325_v19, %v3317_v20 }
0x1c96   :  { %5447 = vtanh.f32 %v6753_v17 }
0x1c97   :  { %5449 = vpow2.f32 %v4426_v1 }
0x1c98   :  { %5451 = vpow2.f32 %v4428_v39 }
0x1c9e   :  { %v5446_v25 = vpop.eup %5445 }
0x1c9f   :  { %3300 = vrot.lane.b32.xlu1 %v5446_v25, %s5857_s10 }
0x1ca0   :  { %v5448_v60 = vpop.eup %5447 }
0x1ca1   :  { %3330 = vrot.lane.b32.xlu0 %v5448_v60, %s5857_s10  ;;  %v5450_v15 = vpop.eup %5449 }
0x1ca2   :  { %v3281_v28 = vadd.f32 1.0, %v5450_v15  ;;  %v5452_v21 = vpop.eup %5451 }
0x1ca3   :  { %v3311_v37 = vadd.f32 1.0, %v5452_v21 }
0x1ca4   :  { %5453 = vrcp.f32 %v3281_v28 }
0x1ca5   :  { %5455 = vrcp.f32 %v3311_v37 }
0x1cae   :  { %v5454_v34 = vpop.eup %5453 }
0x1caf   :  { %v5456_v54 = vpop.eup %5455 }
0x1d11   :  { %v3301_v18 = vpop.permute.xlu1 %3300 }
0x1d12   :  { %v3303_v38 = vmul.f32 %v5454_v34, %v3301_v18 }
0x1d13   :  { %v3331_v10 = vpop.permute.xlu0 %3330 }
0x1d14   :  { %3334 = vst.msk [vmem:[#allocation3 + $0x6] sm:$0x3] %vm642_vm1, %v3303_v38  ;;  %4429 = vmatmul.mubr.msk.f32.vlgmr.msra.gmra.mrb[28].mxu0 %vm238_vm0, %v3303_v38  ;;  %v6763_v12 = vmul.f32 %v5456_v54, %v3331_v10 }
0x1d15   :  { %5024 = vmatpush1.bf16.msra.mxu0 %v6521_v11  ;;  %3632 = vmatprep.mubr.f32.mxu0 %v5856_v0 }
0x1d16   :  { %5026 = vmatprep.subr.bf16.mxu0 %v6525_v8  ;;  %4430 = vmatmul.mubr.msk.f32.vlgmr.msra.gmra.mrb[36].mxu1 %vm238_vm0, %v6763_v12 }
0x1d17   :  { %5040 = vmatpush1.bf16.msra.mxu1 %v6523_v30  ;;  %3709 = vmatprep.mubr.f32.mxu1 %v5856_v0 }
0x1d18   :  { %5042 = vmatprep.subr.bf16.mxu1 %v6527_v44 }
0x1d19   :  { %5028 = vmatpush1.bf16.msra.mxu0 %v6534_v49 }
0x1d1a   :  { %5030 = vmatprep.subr.bf16.mxu0 %v6540_v24 }
0x1d1b   :  { %5044 = vmatpush1.bf16.msra.mxu1 %v6536_v5 }
0x1d1c   :  { %5046 = vmatprep.subr.bf16.mxu1 %v6542_v6 }
0x1d1d   :  { %5032 = vmatpush1.bf16.msra.mxu0 %v6548_v35 }
0x1d1e   :  { %5034 = vmatprep.subr.bf16.mxu0 %v6554_v46 }
0x1d1f   :  { %5048 = vmatpush1.bf16.msra.mxu1 %v6550_v33 }
0x1d20   :  { %5050 = vmatprep.subr.bf16.mxu1 %v6556_v55 }
0x1d21   :  { %5036 = vmatpush1.bf16.msra.mxu0 %v6560_v32 }
0x1d22   :  { %5054 = vmatprep.subr.bf16.mxu0 %v6500_v48 }
0x1d23   :  { %5052 = vmatpush1.bf16.msra.mxu1 %v6562_v57 }
0x1d24   :  { %5070 = vmatprep.subr.bf16.mxu1 %v6502_v59 }
0x1de7   :  { %v3409_v52 = vpop.f32.mrb[28].mxu0 }
0x1de8   :  { %v3411_v51 = vpop.f32.mrb[29].mxu0  ;;  %v3410_v58 = vadd.f32 %v3409_v52, %v6604_v63 }
0x1de9   :  { %v3412_v27 = vadd.f32 %v3411_v51, %v6606_v22  ;;  %v3488_v3 = vpop.f32.mrb[36].mxu1 }
0x1dea   :  { %v3490_v7 = vpop.f32.mrb[37].mxu1  ;;  %v4431_v29 = vmul.f32 -1.442695, %v3410_v58  ;;  %v3489_v42 = vadd.f32 %v3488_v3, %v3416_v13  ;;  %v3640_v13 = vrot.slane %v6598_v31, 4 }
0x1deb   :  { %5457 = vtanh.f32 %v3412_v27  ;;  %v3491_v16 = vadd.f32 %v3490_v7, %v3417_v61  ;;  %v4432_v34 = vmul.f32 -1.442695, %v3412_v27 }
0x1dec   :  { %v4433_v45 = vmul.f32 -1.442695, %v3489_v42 }
0x1ded   :  { %5459 = vtanh.f32 %v3491_v16 }
0x1dee   :  { %5461 = vpow2.f32 %v4431_v29 }
0x1def   :  { %5463 = vpow2.f32 %v4433_v45 }
0x1df5   :  { %v5458_v14 = vpop.eup %5457 }
0x1df6   :  { %3508 = vrot.lane.b32.xlu1 %v5458_v14, %s5857_s10 }
0x1df7   :  { %v5460_v23 = vpop.eup %5459 }
0x1df8   :  { %3538 = vrot.lane.b32.xlu0 %v5460_v23, %s5857_s10  ;;  %v5462_v26 = vpop.eup %5461 }
0x1df9   :  { %v3499_v40 = vadd.f32 1.0, %v5462_v26  ;;  %v5464_v43 = vpop.eup %5463 }
0x1dfa   :  { %v3529_v36 = vadd.f32 1.0, %v5464_v43 }
0x1dfb   :  { %5465 = vrcp.f32 %v3499_v40  ;;  %v3639_v40 = vrot.slane %v6596_v53, 4 }
0x1dfc   :  { %5467 = vrcp.f32 %v3529_v36 }
0x1e05   :  { %v5466_v2 = vpop.eup %5465 }
0x1e06   :  { %v5468_v62 = vpop.eup %5467  ;;  %v3506_v25 = vmul.f32 %v5466_v2, %v6749_v41  ;;  %v4434_v41 = vmul.f32 -1.442695, %v3491_v16  ;;  %v3562_v16 = vrot.slane %v6606_v22, 2 }
0x1e07   :  { %v3536_v39 = vmul.f32 %v5468_v62, %v6753_v17 }
0x1e68   :  { %v3509_v50 = vpop.permute.xlu1 %3508 }
0x1e69   :  { %v3511_v9 = vmul.f32 %v5466_v2, %v3509_v50 }
0x1e6a   :  { %v3539_v20 = vpop.permute.xlu0 %3538 }
0x1e6b   :  { %3513 = vrot.lane.b32.xlu1 %v3511_v9, %s5857_s10  ;;  %v3541_v19 = vmul.f32 %v5468_v62, %v3539_v20 }
0x1e6d   :  { %3543 = vrot.lane.b32.xlu0 %v3541_v19, %s5857_s10 }
0x1edd   :  { %v3514_v60 = vpop.permute.xlu1 %3513 }
0x1ede   :  { %v6791_v1 = vadd.f32 %v3514_v60, %v3506_v25 }
0x1edf   :  { %v3544_v15 = vpop.permute.xlu0 %3543 }
0x1ee0   :  { %5469 = vtanh.f32 %v6791_v1  ;;  %v6795_v28 = vadd.f32 %v3544_v15, %v3536_v39 }
0x1ee2   :  { %5471 = vtanh.f32 %v6795_v28 }
0x1ee3   :  { %5473 = vpow2.f32 %v4432_v34 }
0x1ee4   :  { %5475 = vpow2.f32 %v4434_v41 }
0x1eea   :  { %v5470_v21 = vpop.eup %5469 }
0x1eeb   :  { %3519 = vrot.lane.b32.xlu1 %v5470_v21, %s5857_s10 }
0x1eec   :  { %v5472_v37 = vpop.eup %5471 }
0x1eed   :  { %3549 = vrot.lane.b32.xlu0 %v5472_v37, %s5857_s10  ;;  %v5474_v18 = vpop.eup %5473 }
0x1eee   :  { %v3500_v38 = vadd.f32 1.0, %v5474_v18  ;;  %v5476_v54 = vpop.eup %5475 }
0x1eef   :  { %v3530_v17 = vadd.f32 1.0, %v5476_v54 }
0x1ef0   :  { %5477 = vrcp.f32 %v3500_v38 }
0x1ef1   :  { %5479 = vrcp.f32 %v3530_v17 }
0x1efa   :  { %v5478_v10 = vpop.eup %5477 }
0x1efb   :  { %v5480_v27 = vpop.eup %5479 }
0x1f5d   :  { %v3520_v52 = vpop.permute.xlu1 %3519 }
0x1f5e   :  { %v6800_v51 = vmul.f32 %v5478_v10, %v3520_v52 }
0x1f5f   :  { %v3550_v3 = vpop.permute.xlu0 %3549 }
0x1f60   :  { %4435 = vmatmul.mubr.msk.f32.vlgmr.msra.gmra.mrb[30].mxu0 %vm238_vm0, %v6800_v51  ;;  %v6807_v61 = vmul.f32 %v5480_v27, %v3550_v3 }
0x1f61   :  { %5056 = vmatpush1.bf16.msra.mxu0 %v6521_v11  ;;  %3853 = vmatprep.mubr.f32.mxu0 %v5856_v0 }
0x1f62   :  { %5058 = vmatprep.subr.bf16.mxu0 %v6525_v8  ;;  %4436 = vmatmul.mubr.msk.f32.vlgmr.msra.gmra.mrb[38].mxu1 %vm238_vm0, %v6807_v61 }
0x1f63   :  { %5072 = vmatpush1.bf16.msra.mxu1 %v6523_v30  ;;  %3930 = vmatprep.mubr.f32.mxu1 %v5856_v0 }
0x1f64   :  { %5074 = vmatprep.subr.bf16.mxu1 %v6527_v44 }
0x1f65   :  { %5060 = vmatpush1.bf16.msra.mxu0 %v6534_v49 }
0x1f66   :  { %5062 = vmatprep.subr.bf16.mxu0 %v6540_v24 }
0x1f67   :  { %5076 = vmatpush1.bf16.msra.mxu1 %v6536_v5 }
0x1f68   :  { %5078 = vmatprep.subr.bf16.mxu1 %v6542_v6 }
0x1f69   :  { %5064 = vmatpush1.bf16.msra.mxu0 %v6548_v35 }
0x1f6a   :  { %5066 = vmatprep.subr.bf16.mxu0 %v6554_v46 }
0x1f6b   :  { %5080 = vmatpush1.bf16.msra.mxu1 %v6550_v33 }
0x1f6c   :  { %5082 = vmatprep.subr.bf16.mxu1 %v6556_v55 }
0x1f6d   :  { %5068 = vmatpush1.bf16.msra.mxu0 %v6560_v32 }
0x1f6e   :  { %5086 = vmatprep.subr.bf16.mxu0 %v6500_v48 }
0x1f6f   :  { %5084 = vmatpush1.bf16.msra.mxu1 %v6562_v57 }
0x1f70   :  { %5102 = vmatprep.subr.bf16.mxu1 %v6502_v59  ;;  %v3561_v59 = vrot.slane %v6604_v63, 2 }
0x2033   :  { %v3634_v7 = vpop.f32.mrb[30].mxu0 }
0x2034   :  { %v3636_v14 = vpop.f32.mrb[31].mxu0  ;;  %v3635_v26 = vadd.f32 %v3634_v7, %v3561_v59 }
0x2035   :  { %v3637_v23 = vadd.f32 %v3636_v14, %v3562_v16  ;;  %v3711_v58 = vpop.f32.mrb[38].mxu1 }
0x2036   :  { %v3713_v29 = vpop.f32.mrb[39].mxu1  ;;  %v4437_v43 = vmul.f32 -1.442695, %v3635_v26  ;;  %v3712_v36 = vadd.f32 %v3711_v58, %v3639_v40 }
0x2037   :  { %5481 = vtanh.f32 %v3637_v23  ;;  %v3714_v42 = vadd.f32 %v3713_v29, %v3640_v13  ;;  %v4438_v52 = vmul.f32 -1.442695, %v3637_v23 }
0x2038   :  { %v4439_v2 = vmul.f32 -1.442695, %v3712_v36 }
0x2039   :  { %5483 = vtanh.f32 %v3714_v42 }
0x203a   :  { %5485 = vpow2.f32 %v4437_v43 }
0x203b   :  { %5487 = vpow2.f32 %v4439_v2 }
0x2041   :  { %v5482_v45 = vpop.eup %5481 }
0x2042   :  { %3731 = vrot.lane.b32.xlu1 %v5482_v45, %s5857_s10 }
0x2043   :  { %v5484_v48 = vpop.eup %5483 }
0x2044   :  { %3761 = vrot.lane.b32.xlu0 %v5484_v48, %s5857_s10  ;;  %v5486_v50 = vpop.eup %5485 }
0x2045   :  { %v3722_v9 = vadd.f32 1.0, %v5486_v50  ;;  %v5488_v62 = vpop.eup %5487 }
0x2046   :  { %v3752_v20 = vadd.f32 1.0, %v5488_v62 }
0x2047   :  { %5489 = vrcp.f32 %v3722_v9 }
0x2048   :  { %5491 = vrcp.f32 %v3752_v20 }
0x2051   :  { %v5490_v19 = vpop.eup %5489 }
0x2052   :  { %v5492_v39 = vpop.eup %5491  ;;  %v3729_v37 = vmul.f32 %v5490_v19, %v6791_v1  ;;  %v4440_v1 = vmul.f32 -1.442695, %v3714_v42 }
0x2053   :  { %v3759_v18 = vmul.f32 %v5492_v39, %v6795_v28 }
0x20b4   :  { %v3732_v25 = vpop.permute.xlu1 %3731 }
0x20b5   :  { %v3734_v60 = vmul.f32 %v5490_v19, %v3732_v25 }
0x20b6   :  { %v3762_v15 = vpop.permute.xlu0 %3761 }
0x20b7   :  { %3736 = vrot.lane.b32.xlu1 %v3734_v60, %s5857_s10  ;;  %v3764_v21 = vmul.f32 %v5492_v39, %v3762_v15 }
0x20b9   :  { %3766 = vrot.lane.b32.xlu0 %v3764_v21, %s5857_s10 }
0x2129   :  { %v3737_v34 = vpop.permute.xlu1 %3736 }
0x212a   :  { %v6835_v41 = vadd.f32 %v3737_v34, %v3729_v37 }
0x212b   :  { %v3767_v38 = vpop.permute.xlu0 %3766 }
0x212c   :  { %5493 = vtanh.f32 %v6835_v41  ;;  %v6839_v54 = vadd.f32 %v3767_v38, %v3759_v18 }
0x212e   :  { %5495 = vtanh.f32 %v6839_v54 }
0x212f   :  { %5497 = vpow2.f32 %v4438_v52 }
0x2130   :  { %5499 = vpow2.f32 %v4440_v1 }
0x2136   :  { %v5494_v17 = vpop.eup %5493 }
0x2137   :  { %3742 = vrot.lane.b32.xlu1 %v5494_v17, %s5857_s10 }
0x2138   :  { %v5496_v10 = vpop.eup %5495 }
0x2139   :  { %3772 = vrot.lane.b32.xlu0 %v5496_v10, %s5857_s10  ;;  %v5498_v27 = vpop.eup %5497 }
0x213a   :  { %v3723_v3 = vadd.f32 1.0, %v5498_v27  ;;  %v5500_v7 = vpop.eup %5499 }
0x213b   :  { %v3753_v28 = vadd.f32 1.0, %v5500_v7 }
0x213c   :  { %5501 = vrcp.f32 %v3723_v3 }
0x213d   :  { %5503 = vrcp.f32 %v3753_v28  ;;  %v4004_v28 = vrot.slane %v6606_v22, 6 }
0x2146   :  { %v5502_v16 = vpop.eup %5501 }
0x2147   :  { %v5504_v23 = vpop.eup %5503 }
0x21a9   :  { %v3743_v14 = vpop.permute.xlu1 %3742 }
0x21aa   :  { %v6844_v58 = vmul.f32 %v5502_v16, %v3743_v14 }
0x21ab   :  { %v3773_v13 = vpop.permute.xlu0 %3772 }
0x21ac   :  { %4441 = vmatmul.mubr.msk.f32.vlgmr.msra.gmra.mrb[32].mxu0 %vm238_vm0, %v6844_v58  ;;  %v6851_v29 = vmul.f32 %v5504_v23, %v3773_v13 }
0x21ad   :  { %5088 = vmatpush1.bf16.msra.mxu0 %v6521_v11  ;;  %4074 = vmatprep.mubr.f32.mxu0 %v5856_v0 }
0x21ae   :  { %5090 = vmatprep.subr.bf16.mxu0 %v6525_v8  ;;  %4442 = vmatmul.mubr.msk.f32.vlgmr.msra.gmra.mrb[40].mxu1 %vm238_vm0, %v6851_v29 }
0x21af   :  { %5104 = vmatpush1.bf16.msra.mxu1 %v6523_v30  ;;  %4147 = vmatprep.mubr.f32.mxu1 %v5856_v0  ;;  %v3783_v30 = vrot.slane %v6606_v22, 4  ;;  %v4003_v22 = vrot.slane %v6604_v63, 6 }
0x21b0   :  { %5106 = vmatprep.subr.bf16.mxu1 %v6527_v44 }
0x21b1   :  { %5092 = vmatpush1.bf16.msra.mxu0 %v6534_v49  ;;  %v3861_v49 = vrot.slane %v6598_v31, 2 }
0x21b2   :  { %5094 = vmatprep.subr.bf16.mxu0 %v6540_v24 }
0x21b3   :  { %5108 = vmatpush1.bf16.msra.mxu1 %v6536_v5 }
0x21b4   :  { %5110 = vmatprep.subr.bf16.mxu1 %v6542_v6 }
0x21b5   :  { %5096 = vmatpush1.bf16.msra.mxu0 %v6548_v35 }
0x21b6   :  { %5098 = vmatprep.subr.bf16.mxu0 %v6554_v46 }
0x21b7   :  { %5112 = vmatpush1.bf16.msra.mxu1 %v6550_v33  ;;  %v3782_v33 = vrot.slane %v6604_v63, 4 }
0x21b8   :  { %5114 = vmatprep.subr.bf16.mxu1 %v6556_v55  ;;  %v3860_v55 = vrot.slane %v6596_v53, 2 }
0x21b9   :  { %5100 = vmatpush1.bf16.msra.mxu0 %v6560_v32 }
0x21bb   :  { %5116 = vmatpush1.bf16.msra.mxu1 %v6562_v57 }
0x227f   :  { %v3855_v11 = vpop.f32.mrb[32].mxu0 }
0x2280   :  { %v3857_v0 = vpop.f32.mrb[33].mxu0  ;;  %v3856_v46 = vadd.f32 %v3855_v11, %v3782_v33 }
0x2281   :  { %v3858_v8 = vadd.f32 %v3857_v0, %v3783_v30  ;;  %v3932_v44 = vpop.f32.mrb[40].mxu1 }
0x2282   :  { %v3934_v5 = vpop.f32.mrb[41].mxu1  ;;  %v4443_v32 = vmul.f32 -1.442695, %v3856_v46  ;;  %v3933_v57 = vadd.f32 %v3932_v44, %v3860_v55 }
0x2283   :  { %5505 = vtanh.f32 %v3858_v8  ;;  %v3935_v24 = vadd.f32 %v3934_v5, %v3861_v49  ;;  %v4444_v37 = vmul.f32 -1.442695, %v3858_v8 }
0x2284   :  { %v4445_v42 = vmul.f32 -1.442695, %v3933_v57 }
0x2285   :  { %5507 = vtanh.f32 %v3935_v24  ;;  %v4446_v34 = vmul.f32 -1.442695, %v3935_v24 }
0x2286   :  { %5509 = vpow2.f32 %v4443_v32 }
0x2287   :  { %5511 = vpow2.f32 %v4445_v42 }
0x228d   :  { %v5506_v6 = vpop.eup %5505 }
0x228e   :  { %3952 = vrot.lane.b32.xlu1 %v5506_v6, %s5857_s10 }
0x228f   :  { %v5508_v35 = vpop.eup %5507 }
0x2290   :  { %3982 = vrot.lane.b32.xlu0 %v5508_v35, %s5857_s10  ;;  %v5510_v45 = vpop.eup %5509 }
0x2291   :  { %v3943_v48 = vadd.f32 1.0, %v5510_v45  ;;  %v5512_v59 = vpop.eup %5511 }
0x2292   :  { %v3973_v26 = vadd.f32 1.0, %v5512_v59 }
0x2293   :  { %5513 = vrcp.f32 %v3943_v48 }
0x2294   :  { %5515 = vrcp.f32 %v3973_v26 }
0x229d   :  { %v5514_v40 = vpop.eup %5513 }
0x229e   :  { %v5516_v2 = vpop.eup %5515  ;;  %v3950_v62 = vmul.f32 %v5514_v40, %v6835_v41 }
0x229f   :  { %v3980_v25 = vmul.f32 %v5516_v2, %v6839_v54 }
0x2300   :  { %v3953_v43 = vpop.permute.xlu1 %3952 }
0x2301   :  { %v3955_v36 = vmul.f32 %v5514_v40, %v3953_v43 }
0x2302   :  { %v3983_v50 = vpop.permute.xlu0 %3982 }
0x2303   :  { %3957 = vrot.lane.b32.xlu1 %v3955_v36, %s5857_s10  ;;  %v3985_v9 = vmul.f32 %v5516_v2, %v3983_v50  ;;  %v4222_v36 = vld [vmem:[#allocation19] sm:$0xff]  ;;  %v4223_v2 = vld [vmem:[#allocation19 + $0x8] sm:$0xff]  ;;  %v4224_v50 = vld [vmem:[#allocation19 + $0x10] sm:$0xff] }
0x2305   :  { %3987 = vrot.lane.b32.xlu0 %v3985_v9, %s5857_s10  ;;  %v5117_v9 = vpack.c.bf16 %v4223_v2, %v4222_v36 }
0x2307   :  { %5118 = vmatprep.subr.bf16.mxu0 %v5117_v9 }
0x2375   :  { %v3958_v20 = vpop.permute.xlu1 %3957 }
0x2376   :  { %v6877_v19 = vadd.f32 %v3958_v20, %v3950_v62  ;;  %v4225_v62 = vld [vmem:[#allocation19 + $0x18] sm:$0xff] }
0x2377   :  { %v3988_v60 = vpop.permute.xlu0 %3987  ;;  %v5121_v20 = vpack.c.bf16 %v4225_v62, %v4224_v50 }
0x2378   :  { %5517 = vtanh.f32 %v6877_v19  ;;  %v6881_v39 = vadd.f32 %v3988_v60, %v3980_v25  ;;  %v4228_v60 = vld [vmem:[#allocation19 + $0x30] sm:$0xff] }
0x237a   :  { %5519 = vtanh.f32 %v6881_v39 }
0x237b   :  { %5521 = vpow2.f32 %v4444_v37 }
0x237c   :  { %5523 = vpow2.f32 %v4446_v34  ;;  %v4232_v34 = vld [vmem:[#allocation19 + $0x50] sm:$0xff] }
0x2382   :  { %v5518_v15 = vpop.eup %5517 }
0x2383   :  { %3963 = vrot.lane.b32.xlu1 %v5518_v15, %s5857_s10  ;;  %v4230_v15 = vld [vmem:[#allocation19 + $0x40] sm:$0xff] }
0x2384   :  { %v5520_v21 = vpop.eup %5519 }
0x2385   :  { %3993 = vrot.lane.b32.xlu0 %v5520_v21, %s5857_s10  ;;  %v5522_v41 = vpop.eup %5521  ;;  %v4231_v21 = vld [vmem:[#allocation19 + $0x48] sm:$0xff] }
0x2386   :  { %v3944_v18 = vadd.f32 1.0, %v5522_v41  ;;  %v5524_v38 = vpop.eup %5523  ;;  %v5133_v37 = vpack.c.bf16 %v4231_v21, %v4230_v15 }
0x2387   :  { %v3974_v54 = vadd.f32 1.0, %v5524_v38 }
0x2388   :  { %5525 = vrcp.f32 %v3944_v18 }
0x2389   :  { %5527 = vrcp.f32 %v3974_v54 }
0x2392   :  { %v5526_v17 = vpop.eup %5525 }
0x2393   :  { %v5528_v1 = vpop.eup %5527 }
0x23f5   :  { %v3964_v10 = vpop.permute.xlu1 %3963 }
0x23f6   :  { %v3966_v52 = vmul.f32 %v5526_v17, %v3964_v10  ;;  %v4234_v10 = vld [vmem:[#allocation19 + $0x60] sm:$0xff] }
0x23f7   :  { %v3994_v27 = vpop.permute.xlu0 %3993 }
0x23f8   :  { %4447 = vmatmul.mubr.msk.f32.vlgmr.msra.gmra.mrb[34].mxu0 %vm238_vm0, %v3966_v52  ;;  %v6887_v3 = vmul.f32 %v5528_v1, %v3994_v27 }
0x23f9   :  { %5120 = vmatpush3.bf16.msra.mxu0 %v5117_v9 }
0x23fa   :  { %4448 = vmatmul.mubr.msk.f32.vlgmr.msra.gmra.mrb[42].mxu1 %vm238_vm0, %v6887_v3  ;;  %5122 = vmatprep.subr.bf16.mxu0 %v5121_v20 }
0x23fd   :  { %5124 = vmatpush3.bf16.msra.mxu0 %v5121_v20 }
0x24cb   :  { %v4076_v7 = vpop.f32.mrb[34].mxu0 }
0x24cc   :  { %v4078_v16 = vpop.f32.mrb[35].mxu0  ;;  %v4077_v8 = vadd.f32 %v4076_v7, %v4003_v22  ;;  %v4237_v7 = vld [vmem:[#allocation19 + $0x78] sm:$0xff] }
0x24cd   :  { %v6892_v14 = vadd.f32 %v4078_v16, %v4004_v28  ;;  %v4149_v23 = vpop.f32.mrb[42].mxu1 }
0x24ce   :  { %v4151_v13 = vpop.f32.mrb[43].mxu1  ;;  %v4449_v44 = vmul.f32 -1.442695, %v4077_v8  ;;  %v4150_v49 = vadd.f32 %v4149_v23, %v6596_v53 }
0x24cf   :  { %5529 = vtanh.f32 %v6892_v14  ;;  %v6896_v11 = vadd.f32 %v4151_v13, %v6598_v31  ;;  %v4450_v18 = vmul.f32 -1.442695, %v6892_v14 }
0x24d0   :  { %v4451_v5 = vmul.f32 -1.442695, %v4150_v49 }
0x24d1   :  { %5531 = vtanh.f32 %v6896_v11 }
0x24d2   :  { %5533 = vpow2.f32 %v4449_v44 }
0x24d3   :  { %5535 = vpow2.f32 %v4451_v5 }
0x24d9   :  { %v5530_v30 = vpop.eup %5529 }
0x24da   :  { %4169 = vrot.lane.b32.xlu1 %v5530_v30, %s5857_s10 }
0x24db   :  { %v5532_v0 = vpop.eup %5531 }
0x24dc   :  { %4199 = vrot.lane.b32.xlu0 %v5532_v0, %s5857_s10  ;;  %v5534_v24 = vpop.eup %5533 }
0x24dd   :  { %v4160_v31 = vadd.f32 1.0, %v5534_v24  ;;  %v5536_v6 = vpop.eup %5535 }
0x24de   :  { %v4190_v35 = vadd.f32 1.0, %v5536_v6 }
0x24df   :  { %5537 = vrcp.f32 %v4160_v31  ;;  %v4453_v31 = vld [vmem:[#allocation21] ss:$0 sm:$0xff] }
0x24e0   :  { %5539 = vrcp.f32 %v4190_v35 }
0x24e9   :  { %v5538_v33 = vpop.eup %5537 }
0x24ea   :  { %v5540_v32 = vpop.eup %5539  ;;  %v4167_v53 = vmul.f32 %v5538_v33, %v6877_v19  ;;  %v4226_v19 = vld [vmem:[#allocation19 + $0x20] sm:$0xff] }
0x24eb   :  { %v4197_v48 = vmul.f32 %v5540_v32, %v6881_v39  ;;  %v4229_v39 = vld [vmem:[#allocation19 + $0x38] sm:$0xff] }
0x254c   :  { %v4170_v46 = vpop.permute.xlu1 %4169 }
0x254d   :  { %v4172_v55 = vmul.f32 %v5538_v33, %v4170_v46 }
0x254e   :  { %v4200_v63 = vpop.permute.xlu0 %4199 }
0x254f   :  { %4174 = vrot.lane.b32.xlu1 %v4172_v55, %s5857_s10  ;;  %v4202_v57 = vmul.f32 %v5540_v32, %v4200_v63 }
0x2551   :  { %4204 = vrot.lane.b32.xlu0 %v4202_v57, %s5857_s10 }
0x2553   :  { %2898 = vrot.lane.b32.xlu1 %v6679_v56, %s5857_s10 }
0x2557   :  { %3336 = vrot.lane.b32.xlu1 %v6763_v12, %s5857_s10 }
0x255b   :  { %3778 = vrot.lane.b32.xlu1 %v6851_v29, %s5857_s10 }
0x25c1   :  { %v4175_v42 = vpop.permute.xlu1 %4174 }
0x25c2   :  { %v4177_v45 = vadd.f32 %v4175_v42, %v4167_v53 }
0x25c3   :  { %v4205_v26 = vpop.permute.xlu0 %4204 }
0x25c4   :  { %5541 = vtanh.f32 %v4177_v45  ;;  %v4207_v56 = vadd.f32 %v4205_v26, %v4197_v48 }
0x25c5   :  { %v2899_v59 = vpop.permute.xlu1 %2898 }
0x25c6   :  { %2901 = vst.msk [vmem:[#allocation3 + $0xc] sm:$0x3] %vm648_vm2, %v2899_v59  ;;  %5543 = vtanh.f32 %v4207_v56 }
0x25c7   :  { %3997 = vst.msk [vmem:[#allocation3 + $0xc] sm:$0x3] %vm642_vm1, %v3966_v52  ;;  %v4235_v52 = vld [vmem:[#allocation19 + $0x68] sm:$0xff] }
0x25c8   :  { %v5141_v27 = vpack.c.bf16 %v4235_v52, %v4234_v10 }
0x25c9   :  { %v3337_v40 = vpop.permute.xlu1 %3336 }
0x25ca   :  { %3339 = vst.msk [vmem:[#allocation3 + $0x8] sm:$0x3] %vm648_vm2, %v3337_v40 }
0x25cb   :  { %3553 = vst.msk [vmem:[#allocation3 + $0x8] sm:$0x3] %vm642_vm1, %v6800_v51  ;;  %v4227_v51 = vld [vmem:[#allocation19 + $0x28] sm:$0xff] }
0x25cc   :  { %v5125_v25 = vpack.c.bf16 %v4227_v51, %v4226_v19 }
0x25cd   :  { %v3779_v12 = vpop.permute.xlu1 %3778 }
0x25ce   :  { %v5542_v29 = vpop.eup %5541  ;;  %3781 = vst.msk [vmem:[#allocation3 + $0x4] sm:$0x3] %vm648_vm2, %v3779_v12  ;;  %5126 = vmatprep.subr.bf16.mxu0 %v5125_v25 }
0x25cf   :  { %4180 = vrot.lane.b32.xlu1 %v5542_v29, %s5857_s10  ;;  %5128 = vmatpush3.bf16.msra.mxu0 %v5125_v25 }
0x25d0   :  { %v5544_v43 = vpop.eup %5543 }
0x25d1   :  { %4210 = vrot.lane.b32.xlu0 %v5544_v43, %s5857_s10 }
0x25d5   :  { %2675 = vrot.lane.b32.xlu0 %v6637_v47, %s5857_s10  ;;  %v5129_v47 = vpack.c.bf16 %v4229_v39, %v4228_v60 }
0x25d7   :  { %5130 = vmatprep.subr.bf16.mxu0 %v5129_v47 }
0x25d8   :  { %5132 = vmatpush3.bf16.msra.mxu0 %v5129_v47 }
0x25d9   :  { %3119 = vrot.lane.b32.xlu0 %v6721_v4, %s5857_s10  ;;  %v4233_v4 = vld [vmem:[#allocation19 + $0x58] sm:$0xff]  ;;  %5134 = vmatprep.subr.bf16.mxu0 %v5133_v37 }
0x25da   :  { %v5137_v41 = vpack.c.bf16 %v4233_v4, %v4232_v34 }
0x25dc   :  { %5136 = vmatpush3.bf16.msra.mxu0 %v5133_v37 }
0x25dd   :  { %3555 = vrot.lane.b32.xlu0 %v6807_v61, %s5857_s10  ;;  %5138 = vmatprep.subr.bf16.mxu0 %v5137_v41  ;;  %v4452_v61 = vmul.f32 -1.442695, %v6896_v11 }
0x25df   :  { %5545 = vpow2.f32 %v4452_v61 }
0x25e0   :  { %5140 = vmatpush3.bf16.msra.mxu0 %v5137_v41  ;;  %5547 = vpow2.f32 %v4450_v18 }
0x25e1   :  { %3999 = vrot.lane.b32.xlu0 %v6887_v3, %s5857_s10  ;;  %v4236_v3 = vld [vmem:[#allocation19 + $0x70] sm:$0xff]  ;;  %5142 = vmatprep.subr.bf16.mxu0 %v5141_v27 }
0x25e2   :  { %v5145_v28 = vpack.c.bf16 %v4237_v7, %v4236_v3 }
0x25e4   :  { %5144 = vmatpush3.bf16.msra.mxu0 %v5141_v27 }
0x25e5   :  { %5146 = vmatprep.subr.bf16.mxu0 %v5145_v28 }
0x25e8   :  { %5148 = vmatpush3.bf16.msra.mxu0 %v5145_v28 }
0x25e9   :  { %v5546_v38 = vpop.eup %5545 }
0x25ea   :  { %v5548_v54 = vpop.eup %5547  ;;  %v4191_v17 = vadd.f32 1.0, %v5546_v38 }
0x25eb   :  { %v4161_v1 = vadd.f32 1.0, %v5548_v54 }
0x25ec   :  { %5549 = vrcp.f32 %v4191_v17 }
0x25ed   :  { %5551 = vrcp.f32 %v4161_v1 }
0x25f6   :  { %v5550_v16 = vpop.eup %5549 }
0x25f7   :  { %v5552_v11 = vpop.eup %5551 }
0x2641   :  { %v4181_v13 = vpop.permute.xlu1 %4180 }
0x2642   :  { %v4183_v30 = vmul.f32 %v5552_v11, %v4181_v13 }
0x2643   :  { %v4211_v14 = vpop.permute.xlu0 %4210 }
0x2644   :  { %v4213_v23 = vmul.f32 %v5550_v16, %v4211_v14 }
0x2646   :  { %4216 = vrot.lane.b32.xlu1 %v4213_v23, %s5857_s10 }
0x2647   :  { %v2676_v0 = vpop.permute.xlu0 %2675 }
0x2648   :  { %2678 = vst.msk [vmem:[#allocation3 + $0xe] sm:$0x3] %vm648_vm2, %v2676_v0 }
0x2649   :  { %4214 = vst.msk [vmem:[#allocation3 + $0xe] sm:$0x3] %vm642_vm1, %v4183_v30 }
0x264b   :  { %v3120_v22 = vpop.permute.xlu0 %3119 }
0x264c   :  { %3122 = vst.msk [vmem:[#allocation3 + $0xa] sm:$0x3] %vm648_vm2, %v3120_v22 }
0x264d   :  { %3776 = vst.msk [vmem:[#allocation3 + $0xa] sm:$0x3] %vm642_vm1, %v6844_v58 }
0x264f   :  { %v3556_v8 = vpop.permute.xlu0 %3555 }
0x2650   :  { %3558 = vst.msk [vmem:[#allocation3 + $0x6] sm:$0x3] %vm648_vm2, %v3556_v8 }
0x2653   :  { %v4000_v44 = vpop.permute.xlu0 %3999 }
0x2654   :  { %4002 = vst.msk [vmem:[#allocation3 + $0x2] sm:$0x3] %vm648_vm2, %v4000_v44  ;;  %v4221_v24 = vld [vmem:[#allocation3 + $0x8] sm:$0xff] }
0x26b8   :  { %v4217_v49 = vpop.permute.xlu1 %4216 }
0x26b9   :  { %4219 = vst.msk [vmem:[#allocation3] sm:$0x3] %vm648_vm2, %v4217_v49 }
0x26c0   :  { %v4220_v5 = vld [vmem:[#allocation3] sm:$0xff] }
0x26c1   :  { %4506 = vmatprep.mubr.f32.mxu0 %v4220_v5 }
0x26c2   :  { %4507 = vmatmul.mubr.f32.vlgmr.msra.gmra.mrb[36].mxu0 %v4221_v24 }
0x2795   :  { %v4508_v6 = vpop.f32.mrb[36].mxu0 }
0x2796   :  { %v4317_v35 = vadd.f32 %v4508_v6, %v4453_v31  ;;  %v4311_v33 = vpop.f32.mrb[37].mxu0 }
0x2797   :  { %v4312_v46 = vadd.f32 %v4453_v31, %v4311_v33 }
0x2798   :  { %v4455_v55 = vmul.f32 -1.442695, %v4317_v35 }
0x2799   :  { %v4454_v58 = vmul.f32 -1.442695, %v4312_v46 }
0x279a   :  { %5553 = vpow2.f32 %v4455_v55 }
0x279b   :  { %5555 = vpow2.f32 %v4454_v58 }
0x27a4   :  { %v5554_v32 = vpop.eup %5553 }
0x27a5   :  { %v5556_v63 = vpop.eup %5555  ;;  %v4327_v57 = vadd.f32 1.0, %v5554_v32 }
0x27a6   :  { %v4326_v53 = vadd.f32 1.0, %v5556_v63 }
0x27a7   :  { %5557 = vrcp.f32 %v4327_v57 }
0x27a8   :  { %5559 = vrcp.f32 %v4326_v53 }
0x27b1   :  { %v5558_v42 = vpop.eup %5557 }
0x27b2   :  { %v5560_v45 = vpop.eup %5559  ;;  %4334 = vst.msk [vmem:[#allocation22 + $0x8] sm:$0xff] %vm4332_vm3, %v5558_v42 }
0x27b3   :  { %4333 = vst.msk [vmem:[#allocation22] sm:$0xff] %vm4332_vm3, %v5560_v45 }
0x27b4   :  { %5814 = shalt.err (!%p5811_p8)
}
0x27b5   :  { %s5815_s28 = scalar_lea.hbm %s6966_s11, 256 }
0x27b6   :  { %p5816_p9 = scmp.ne.s32.totalorder %s6966_s11, %s5815_s28  ;;  %p5819_p10 = scmp.lt.u32.totalorder %s5815_s28, %s6966_s11 }
0x27b8   :  { %p5821_p11 = pnand %p5819_p10, %p5816_p9 }
0x27ba   :  { %5824 = shalt.err (!%p5821_p11)
}
0x27bb   :  { %4346 = dma.vmem_to_hbm [thread:$0]  %s4341_s4, 256, %s6966_s11, [#allocation6], %s5849_s22, %s5849_s22, %s5850_s25  }
0x27bc   :  { %5837 = dma.done.wait [#allocation6], 256  }
0x27bd   :  { %5838 = vsyncadd [#allocation6], 4294967040 }
0x27be   :  { %4350 = vsyncpa [#allocation5], 1 }
0x27bf   :  { %4351 = vsyncpa [#allocation8], 1 }
0x27c0   :  { %4352 = vsyncpa [#allocation11], 1 }
0x27c1   :  { %4353 = vsyncpa [#allocation14], 1 }
0x27c2   :  { %4354 = vsyncpa [#allocation17], 1 }
0x27c3   :  { %4355 = vsyncpa [#allocation20], 1 }
0x27c4   :  { %4356 = vsyncpa [#allocation6], 1 }

</bundles_post_ra>
